<compile_context>
chip_gen: v5e
topology: v5e:2x2
jax: 0.10.0
libtpu: 0.0.40
codegen_flags: <defaults>
</compile_context>

<pallas_src>
import math
import functools

import jax
import jax.numpy as jnp
from jax import lax
from jax.experimental import pallas as pl
from jax.experimental.pallas import tpu as pltpu

# keep f32 matmul semantics identical between the kernel, the wrapper-side weight
# folding and the pure-JAX reference (avoids bf16-pass matmul drift on real TPUs)
jax.config.update("jax_default_matmul_precision", "highest")

D_MODEL = 10     # config.d_model (default)
D_STATE = 64     # config.d_state (default)
D_FF = 14        # hidden width of MLPC
LN_EPS = 1e-5

FF_PAD = 128     # d_ff padded to a full lane width -> lane-dense MLP hidden
B_BLK = 32       # default batch rows per block (4 independent (8,128) carry vregs)
L_CHUNK = 256    # default timesteps per grid step along the (arbitrary) time axis
UNROLL = 4       # static unroll of the recurrence loop


def _gelu_exact(x):
    """Exact (erf) GELU via Abramowitz&Stegun 7.1.26 polynomial (|err| < 1.5e-7)."""
    a = x * (1.0 / math.sqrt(2.0))
    sgn = jnp.where(a >= 0.0, 1.0, -1.0)
    z = jnp.abs(a)
    t = 1.0 / (1.0 + 0.3275911 * z)
    poly = t * (0.254829592 + t * (-0.284496736 + t * (1.421413741
             + t * (-1.453152027 + t * 1.061405429))))
    erf = sgn * (1.0 - poly * jnp.exp(-z * z))
    return 0.5 * x * (1.0 + erf)


def ssm_layer_kernel(x_ref, lnw_ref, lam_ref, wzin_ref, wcfc_ref, wpr_ref,
                     out_ref, buf_scr, carry_scr, *, b_blk, unroll):
    """One grid step = (batch block b, time chunk l).

    x_ref/out_ref: (l_chunk*b_blk, Dm), rows ordered (t, b_in_block)   [time-major]
    buf_scr:       (l_chunk*b_blk, 2S+128); lanes [0,2S) hold Bu and are overwritten
                   in place by the states, lanes [2S,2S+128) hold z @ (D.T Wfc) padded.
    carry_scr:     (b_blk, 2S) recurrence state carried across time chunks.
    """
    n, _dm = x_ref.shape
    s2 = carry_scr.shape[1]                   # 2 * d_state (= 128, lane dense)
    l_chunk = n // b_blk
    half = s2 // 2

    x = x_ref[...]                                              # (n, Dm)

    # ---- LayerNorm (elementwise affine, no bias) ----
    mean = jnp.mean(x, axis=-1, keepdims=True)
    var = jnp.mean((x - mean) ** 2, axis=-1, keepdims=True)
    z = (x - mean) * lax.rsqrt(var + LN_EPS) * lnw_ref[...]     # (n, Dm)

    # ---- single fused lane-dense z projection:
    #      lanes [0,2S)      = Bu = z @ [(gamma*B_re).T | (gamma*B_im).T]
    #      lanes [2S,2S+128) = z @ (D.T @ Wfc), zero-padded                 ----
    buf_scr[...] = jnp.dot(z, wzin_ref[...],
                           preferred_element_type=jnp.float32)  # (n, 2S+128)

    # ---- init recurrence carry at the first time chunk of this batch block ----
    @pl.when(pl.program_id(1) == 0)
    def _():
        carry_scr[...] = jnp.zeros_like(carry_scr)

    # lam kept as single (1, 2S) vregs; implicit sublane broadcast in the multiply
    lam_a = lam_ref[0:1, :]                    # [ l_re | l_re ]
    lam_b = lam_ref[1:2, :]                    # [-l_im | l_im ]

    def lane_swap(v):
        # swap the re|im halves (shift == s2/2); slice+concat lowers cleanly everywhere
        return jnp.concatenate([v[:, half:], v[:, :half]], axis=1)

    # ---- complex diagonal recurrence: batch rows on sublanes, re|im packed in lanes:
    #        s <- lam_a * s + lam_b * swap(s) + Bu_t
    #      per-step aligned load/store on the scratch, small static unroll ----
    def chunk_body(c, s):
        base = pl.multiple_of(c * (unroll * b_blk), unroll * b_blk)
        for j in range(unroll):                                 # static unroll
            r = pl.multiple_of(base + j * b_blk, b_blk)
            bu_t = buf_scr[pl.ds(r, b_blk), 0:s2]               # (b_blk, 2S)
            s = lam_a * s + lam_b * lane_swap(s) + bu_t
            buf_scr[pl.ds(r, b_blk), 0:s2] = s                  # aligned, unmasked
        return s

    s = lax.fori_loop(0, l_chunk // unroll, chunk_body, carry_scr[...])
    carry_scr[...] = s                                          # carry to next chunk

    # ---- MLP with the C/D projections folded into its first matmul (lane dense):
    #      h = states @ (Cfold @ Wfc) + z @ (D.T @ Wfc)   -> gelu -> @ Wproj ----
    h = (jnp.dot(buf_scr[:, 0:s2], wcfc_ref[...],
                 preferred_element_type=jnp.float32)
         + buf_scr[:, s2:])                                     # (n, 128)
    h = _gelu_exact(h)
    ff = jnp.dot(h, wpr_ref[...], preferred_element_type=jnp.float32)   # (n, Dm)

    # ---- residual ----
    out_ref[...] = ff + x


def ssm_layer(x, kp, b_blk=B_BLK, l_chunk=L_CHUNK, unroll=UNROLL):
    B, L, Dm = x.shape
    s2 = kp["lam_ab"].shape[1]            # 2 * d_state
    w_all = kp["wzin"].shape[1]           # 2 * d_state + 128

    # batch block: at most the (8-padded) batch, at least 8 rows (full sublanes)
    b_blk = max(8, min(b_blk, -(-B // 8) * 8))
    Bp = -(-B // b_blk) * b_blk
    n_blocks = Bp // b_blk

    # time chunk: multiple of the unroll factor; pad L up to a chunk multiple
    l_chunk = min(l_chunk, -(-L // unroll) * unroll)
    l_chunk = -(-l_chunk // unroll) * unroll
    Lp = -(-L // l_chunk) * l_chunk
    n_lchunks = Lp // l_chunk

    xp = x
    if Bp != B or Lp != L:
        xp = jnp.pad(x, ((0, Bp - B), (0, Lp - L), (0, 0)))

    # time-major rows inside each batch block: row = t * b_blk + b_in_block
    x_arr = (xp.reshape(n_blocks, b_blk, Lp, Dm)
               .transpose(0, 2, 1, 3)
               .reshape(n_blocks, Lp * b_blk, Dm))

    rows = l_chunk * b_blk                 # rows per grid step

    def full_spec(shape):
        return pl.BlockSpec(shape, lambda b, l, _s=shape: (0,) * len(_s))

    grid_spec = pltpu.PrefetchScalarGridSpec(
        num_scalar_prefetch=0,
        grid=(n_blocks, n_lchunks),
        in_specs=[
            pl.BlockSpec((None, rows, Dm), lambda b, l: (b, l, 0)),   # x block
            full_spec(kp["lnw"].shape),      # LayerNorm weight           (1, Dm)
            full_spec(kp["lam_ab"].shape),   # [l_re|l_re ; -l_im|l_im]   (2, 2S)
            full_spec(kp["wzin"].shape),     # fused z projection         (Dm, 2S+128)
            full_spec(kp["wcfc"].shape),     # Cfold @ Wfc (padded)       (2S, 128)
            full_spec(kp["wpr"].shape),      # Wproj (padded)             (128, Dm)
        ],
        out_specs=pl.BlockSpec((None, rows, Dm), lambda b, l: (b, l, 0)),
        scratch_shapes=[
            pltpu.VMEM((rows, w_all), jnp.float32),   # [Bu->states | z @ (D.T Wfc)]
            pltpu.VMEM((b_blk, s2), jnp.float32),     # state carry across time chunks
        ],
    )

    kernel = functools.partial(ssm_layer_kernel, b_blk=b_blk, unroll=unroll)
    out_arr = pl.pallas_call(
        kernel,
        out_shape=jax.ShapeDtypeStruct((n_blocks, Lp * b_blk, Dm), jnp.float32),
        grid_spec=grid_spec,
        compiler_params=pltpu.CompilerParams(
            dimension_semantics=("parallel", "arbitrary")),
    )(x_arr, kp["lnw"], kp["lam_ab"], kp["wzin"], kp["wcfc"], kp["wpr"])

    out = (out_arr.reshape(n_blocks, Lp, b_blk, Dm)
                  .transpose(0, 2, 1, 3)
                  .reshape(Bp, Lp, Dm))[:B, :L]
    return out


def init_params(key):
    """Deterministic synthetic init mirroring the PyTorch __init__ shapes/distributions."""
    ks = jax.random.split(key, 9)
    rmin, rmax, max_phase = 0.0, 1.0, 2.0 * math.pi

    D = jax.random.normal(ks[0], (D_MODEL, D_MODEL)) / math.sqrt(D_MODEL)
    u1 = jax.random.uniform(ks[1], (D_STATE,), minval=1e-3, maxval=1.0)
    u2 = jax.random.uniform(ks[2], (D_STATE,), minval=1e-3, maxval=1.0)
    nu_log = jnp.log(-0.5 * jnp.log(u1 * (rmax + rmin) * (rmax - rmin) + rmin ** 2))
    theta_log = jnp.log(max_phase * u2)
    lam_abs = jnp.exp(-jnp.exp(nu_log))
    gamma_log = jnp.log(jnp.sqrt(1.0 - lam_abs ** 2))
    B_re = jax.random.normal(ks[3], (D_STATE, D_MODEL)) / math.sqrt(2 * D_MODEL)
    B_im = jax.random.normal(ks[4], (D_STATE, D_MODEL)) / math.sqrt(2 * D_MODEL)
    C_re = jax.random.normal(ks[5], (D_MODEL, D_STATE)) / math.sqrt(D_STATE)
    C_im = jax.random.normal(ks[6], (D_MODEL, D_STATE)) / math.sqrt(D_STATE)
    lnw = jnp.ones((1, D_MODEL), jnp.float32)
    wfc = jax.random.uniform(ks[7], (D_FF, D_MODEL), minval=-1.0, maxval=1.0) / math.sqrt(D_MODEL)
    wpr = jax.random.uniform(ks[8], (D_MODEL, D_FF), minval=-1.0, maxval=1.0) / math.sqrt(D_FF)

    # ss_params(): lambda, gamma-scaled B (plain-JAX glue)
    phase = jnp.exp(theta_log)
    lam_re = lam_abs * jnp.cos(phase)
    lam_im = lam_abs * jnp.sin(phase)
    gamma = jnp.exp(gamma_log)[:, None]
    bre = gamma * B_re
    bim = gamma * B_im

    return dict(
        lnw=lnw, lam=jnp.stack([lam_re, lam_im]).astype(jnp.float32),
        bre=bre.astype(jnp.float32), bim=bim.astype(jnp.float32),
        cre=C_re.astype(jnp.float32), cim=C_im.astype(jnp.float32),
        d=D.astype(jnp.float32), wfc=wfc.astype(jnp.float32), wpr=wpr.astype(jnp.float32),
    )


def prepare_kernel_params(p):
    """One-time host-side fusion / pre-transposition / padding of the kernel weights."""
    lam_re, lam_im = p["lam"][0], p["lam"][1]
    lam_a = jnp.concatenate([lam_re, lam_re])[None, :]            # (1, 2S)
    lam_b = jnp.concatenate([-lam_im, lam_im])[None, :]           # (1, 2S)

    d_ff = p["wfc"].shape[0]
    wb = jnp.concatenate([p["bre"].T, p["bim"].T], axis=1)        # (Dm, 2S)
    wc = jnp.concatenate([p["cre"].T, -p["cim"].T], axis=0)       # (2S, Dm)
    wd = p["d"].T                                                 # (Dm, Dm)
    wfc = p["wfc"].T                                              # (Dm, d_ff)
    wpr = p["wpr"].T                                              # (d_ff, Dm)

    # fold the C / D projections into the MLP's first matmul (matmul associativity)
    wc_fc = wc @ wfc                                              # (2S, d_ff)
    wd_fc = wd @ wfc                                              # (Dm, d_ff)

    # zero-pad the d_ff axis to 128 lanes (gelu(0)=0 and zero Wproj rows -> no effect)
    pad = FF_PAD - d_ff
    wc_fc_p = jnp.pad(wc_fc, ((0, 0), (0, pad)))                  # (2S, 128)
    wd_fc_p = jnp.pad(wd_fc, ((0, 0), (0, pad)))                  # (Dm, 128)
    wpr_p = jnp.pad(wpr, ((0, pad), (0, 0)))                      # (128, Dm)

    # single fused z-projection weight: [ Bu weights | D.T @ Wfc (padded) ]
    wzin = jnp.concatenate([wb, wd_fc_p], axis=1)                 # (Dm, 2S+128)

    return dict(
        lnw=p["lnw"].astype(jnp.float32),
        lam_ab=jnp.concatenate([lam_a, lam_b], axis=0).astype(jnp.float32),  # (2, 2S)
        wzin=wzin.astype(jnp.float32),
        wcfc=wc_fc_p.astype(jnp.float32),
        wpr=wpr_p.astype(jnp.float32),
    )


def reference(x, p):
    """Pure-JAX reference of SSMLayer.forward (mode='scan', state=0)."""
    mean = x.mean(-1, keepdims=True)
    var = ((x - mean) ** 2).mean(-1, keepdims=True)
    z = (x - mean) / jnp.sqrt(var + LN_EPS) * p["lnw"][0]
    lam = (p["lam"][0] + 1j * p["lam"][1]).astype(jnp.complex64)
    Bc = (p["bre"] + 1j * p["bim"]).astype(jnp.complex64)
    Cc = (p["cre"] + 1j * p["cim"]).astype(jnp.complex64)
    bu = z.astype(jnp.complex64) @ Bc.T                       # (B, L, S)

    def per_batch(bu_b):
        def step(s, bu_t):
            s = lam * s + bu_t
            return s, s
        _, states = lax.scan(step, jnp.zeros((D_STATE,), jnp.complex64), bu_b)
        return states

    states = jax.vmap(per_batch)(bu)
    y = (states @ Cc.T).real + z @ p["d"].T
    h = jax.nn.gelu(y @ p["wfc"].T, approximate=False)
    ff = h @ p["wpr"].T
    return ff + x


if __name__ == "__main__":
    key = jax.random.PRNGKey(0)
    kx, kp_key, kx2 = jax.random.split(key, 3)
    params = init_params(kp_key)
    kernel_params = prepare_kernel_params(params)

    # main small test (matches the module defaults: d_model=10, d_state=64)
    B, L = 2, 8
    x = jax.random.normal(kx, (B, L, D_MODEL), dtype=jnp.float32)
    out = ssm_layer(x, kernel_params)
    jax.block_until_ready(out)
    ref = reference(x, params)
    err = float(jnp.max(jnp.abs(out - ref)))
    assert jnp.allclose(out, ref, rtol=1e-4, atol=1e-4), f"max abs err = {err}"

    # second test exercising batch padding, multiple batch blocks, multiple time
    # chunks and the cross-chunk state carry
    B2, L2 = 10, 20
    x2 = jax.random.normal(kx2, (B2, L2, D_MODEL), dtype=jnp.float32)
    out2 = ssm_layer(x2, kernel_params, b_blk=8, l_chunk=8)
    jax.block_until_ready(out2)
    ref2 = reference(x2, params)
    err2 = float(jnp.max(jnp.abs(out2 - ref2)))
    assert jnp.allclose(out2, ref2, rtol=1e-4, atol=1e-4), f"max abs err = {err2}"

    print("KERNEL_OK")
</pallas_src>

<mosaic_0001>
module attributes {stable_mosaic.version = 11 : i64} {
  func.func @ssm_layer_kernel(%arg0: i32, %arg1: i32, %arg2: memref<1x64x10xf32, #tpu.memory_space<vmem>>, %arg3: memref<1x10xf32, #tpu.memory_space<vmem>>, %arg4: memref<2x128xf32, #tpu.memory_space<vmem>>, %arg5: memref<10x256xf32, #tpu.memory_space<vmem>>, %arg6: memref<128x128xf32, #tpu.memory_space<vmem>>, %arg7: memref<128x10xf32, #tpu.memory_space<vmem>>, %arg8: memref<1x64x10xf32, #tpu.memory_space<vmem>>, %arg9: memref<64x256xf32, #tpu.memory_space<vmem>>, %arg10: memref<8x128xf32, #tpu.memory_space<vmem>>) attributes {dimension_semantics = [#tpu.dimension_semantics<parallel>, #tpu.dimension_semantics<arbitrary>], iteration_bounds = array<i64: 1, 1>, scalar_prefetch = 0 : i64, scratch_operands = 2 : i64, tpu.core_type = #tpu.core_type<tc>, window_params = [{transform_indices = @transform_0, window_bounds = array<i64: 1, 64, 10>}, {pipeline_mode = #tpu.pipeline_mode<synchronous>, transform_indices = @transform_1, window_bounds = array<i64: 1, 10>}, {pipeline_mode = #tpu.pipeline_mode<synchronous>, transform_indices = @transform_2, window_bounds = array<i64: 2, 128>}, {pipeline_mode = #tpu.pipeline_mode<synchronous>, transform_indices = @transform_3, window_bounds = array<i64: 10, 256>}, {pipeline_mode = #tpu.pipeline_mode<synchronous>, transform_indices = @transform_4, window_bounds = array<i64: 128, 128>}, {pipeline_mode = #tpu.pipeline_mode<synchronous>, transform_indices = @transform_5, window_bounds = array<i64: 128, 10>}, {transform_indices = @transform_6, window_bounds = array<i64: 1, 64, 10>}]} {
    %c0 = arith.constant 0 : index
    %c0_0 = arith.constant 0 : index
    %c0_1 = arith.constant 0 : index
    %0 = vector.load %arg2[%c0, %c0_0, %c0_1] : memref<1x64x10xf32, #tpu.memory_space<vmem>>, vector<1x64x10xf32>
    %1 = vector.shape_cast %0 : vector<1x64x10xf32> to vector<64x10xf32>
    %cst = arith.constant dense<0.000000e+00> : vector<64xf32>
    %2 = vector.multi_reduction <add>, %1, %cst [1] : vector<64x10xf32> to vector<64xf32>
    %3 = vector.shape_cast %2 : vector<64xf32> to vector<64x1xf32>
    %cst_2 = arith.constant 1.000000e+01 : f32
    %4 = vector.broadcast %cst_2 : f32 to vector<64x1xf32>
    %5 = arith.divf %3, %4 : vector<64x1xf32>
    %6 = vector.broadcast %5 : vector<64x1xf32> to vector<64x10xf32>
    %7 = arith.subf %1, %6 : vector<64x10xf32>
    %8 = arith.mulf %7, %7 : vector<64x10xf32>
    %cst_3 = arith.constant dense<0.000000e+00> : vector<64xf32>
    %9 = vector.multi_reduction <add>, %8, %cst_3 [1] : vector<64x10xf32> to vector<64xf32>
    %10 = vector.shape_cast %9 : vector<64xf32> to vector<64x1xf32>
    %cst_4 = arith.constant 1.000000e+01 : f32
    %11 = vector.broadcast %cst_4 : f32 to vector<64x1xf32>
    %12 = arith.divf %10, %11 : vector<64x1xf32>
    %13 = vector.broadcast %5 : vector<64x1xf32> to vector<64x10xf32>
    %14 = arith.subf %1, %13 : vector<64x10xf32>
    %cst_5 = arith.constant 9.99999974E-6 : f32
    %15 = vector.broadcast %cst_5 : f32 to vector<64x1xf32>
    %16 = arith.addf %12, %15 : vector<64x1xf32>
    %17 = math.rsqrt %16 : vector<64x1xf32>
    %18 = vector.broadcast %17 : vector<64x1xf32> to vector<64x10xf32>
    %19 = arith.mulf %14, %18 : vector<64x10xf32>
    %c0_6 = arith.constant 0 : index
    %c0_7 = arith.constant 0 : index
    %20 = vector.load %arg3[%c0_6, %c0_7] : memref<1x10xf32, #tpu.memory_space<vmem>>, vector<1x10xf32>
    %21 = vector.broadcast %20 : vector<1x10xf32> to vector<64x10xf32>
    %22 = arith.mulf %19, %21 : vector<64x10xf32>
    %c0_8 = arith.constant 0 : index
    %c0_9 = arith.constant 0 : index
    %23 = vector.load %arg5[%c0_8, %c0_9] : memref<10x256xf32, #tpu.memory_space<vmem>>, vector<10x256xf32>
    %cst_10 = arith.constant dense<0.000000e+00> : vector<64x256xf32>
    %24 = tpu.matmul %22, %23, %cst_10 {dimension_numbers = #tpu.dot_dimension_numbers<[1], [0], [0], [1], [0, 0, 1, 1], [], []>, precision = #tpu.contract_precision<fp32>} : vector<64x10xf32>, vector<10x256xf32>, vector<64x256xf32> -> vector<64x256xf32>
    %c0_11 = arith.constant 0 : index
    %c0_12 = arith.constant 0 : index
    %25 = vector.load %arg9[%c0_11, %c0_12] : memref<64x256xf32, #tpu.memory_space<vmem>>, vector<64x256xf32>
    tpu.vector_store %arg9[%c0_11, %c0_12], %24 {strides = array<i32>} : memref<64x256xf32, #tpu.memory_space<vmem>>, vector<64x256xf32>,
    %c0_i32 = arith.constant 0 : i32
    %26 = arith.cmpi eq, %arg1, %c0_i32 : i32
    %27 = arith.extui %26 : i1 to i32
    %c0_i32_13 = arith.constant 0 : i32
    %28 = arith.cmpi ne, %27, %c0_i32_13 : i32
    scf.if %28 {
      %cst_51 = arith.constant 0.000000e+00 : f32
      %87 = vector.broadcast %cst_51 : f32 to vector<8x128xf32>
      %c0_52 = arith.constant 0 : index
      %c0_53 = arith.constant 0 : index
      %88 = vector.load %arg10[%c0_52, %c0_53] : memref<8x128xf32, #tpu.memory_space<vmem>>, vector<8x128xf32>
      tpu.vector_store %arg10[%c0_52, %c0_53], %87 {strides = array<i32>} : memref<8x128xf32, #tpu.memory_space<vmem>>, vector<8x128xf32>,
    } else {
    }
    %c0_14 = arith.constant 0 : index
    %c0_15 = arith.constant 0 : index
    %29 = vector.load %arg4[%c0_14, %c0_15] : memref<2x128xf32, #tpu.memory_space<vmem>>, vector<1x128xf32>
    %c1 = arith.constant 1 : index
    %c0_16 = arith.constant 0 : index
    %30 = vector.load %arg4[%c1, %c0_16] : memref<2x128xf32, #tpu.memory_space<vmem>>, vector<1x128xf32>
    %c0_17 = arith.constant 0 : index
    %c0_18 = arith.constant 0 : index
    %31 = vector.load %arg10[%c0_17, %c0_18] : memref<8x128xf32, #tpu.memory_space<vmem>>, vector<8x128xf32>
    %c0_i32_19 = arith.constant 0 : i32
    %c2_i32 = arith.constant 2 : i32
    %32 = arith.addi %c0_i32_19, %c2_i32 : i32
    %c1_i32 = arith.constant 1 : i32
    %33 = scf.for %arg11 = %c0_i32_19 to %32 step %c1_i32 iter_args(%arg12 = %31) -> (vector<8x128xf32>)  : i32 {
      %c32_i32 = arith.constant 32 : i32
      %87 = arith.muli %arg11, %c32_i32 : i32
      %88 = tpu.assume_multiple %87, 32 : i32
      %c0_i32_51 = arith.constant 0 : i32
      %89 = arith.addi %88, %c0_i32_51 : i32
      %90 = tpu.assume_multiple %89, 8 : i32
      %91 = arith.index_cast %90 : i32 to index
      %c0_52 = arith.constant 0 : index
      %92 = vector.load %arg9[%91, %c0_52] : memref<64x256xf32, #tpu.memory_space<vmem>>, vector<8x128xf32>
      %93 = vector.broadcast %29 : vector<1x128xf32> to vector<8x128xf32>
      %94 = arith.mulf %93, %arg12 : vector<8x128xf32>
      %95 = vector.extract_strided_slice %arg12 {offsets = [0, 64], sizes = [8, 64], strides = [1, 1]} : vector<8x128xf32> to vector<8x64xf32>
      %96 = vector.extract_strided_slice %arg12 {offsets = [0, 0], sizes = [8, 64], strides = [1, 1]} : vector<8x128xf32> to vector<8x64xf32>
      %97 = tpu.concatenate %95, %96 in 1 : vector<8x64xf32>, vector<8x64xf32> -> vector<8x128xf32>
      %98 = vector.broadcast %30 : vector<1x128xf32> to vector<8x128xf32>
      %99 = arith.mulf %98, %97 : vector<8x128xf32>
      %100 = arith.addf %94, %99 : vector<8x128xf32>
      %101 = arith.addf %100, %92 : vector<8x128xf32>
      %102 = arith.index_cast %90 : i32 to index
      %c0_53 = arith.constant 0 : index
      %103 = vector.load %arg9[%102, %c0_53] : memref<64x256xf32, #tpu.memory_space<vmem>>, vector<8x128xf32>
      tpu.vector_store %arg9[%102, %c0_53], %101 {strides = array<i32>} : memref<64x256xf32, #tpu.memory_space<vmem>>, vector<8x128xf32>,
      %c8_i32 = arith.constant 8 : i32
      %104 = arith.addi %88, %c8_i32 : i32
      %105 = tpu.assume_multiple %104, 8 : i32
      %106 = arith.index_cast %105 : i32 to index
      %c0_54 = arith.constant 0 : index
      %107 = vector.load %arg9[%106, %c0_54] : memref<64x256xf32, #tpu.memory_space<vmem>>, vector<8x128xf32>
      %108 = vector.broadcast %29 : vector<1x128xf32> to vector<8x128xf32>
      %109 = arith.mulf %108, %101 : vector<8x128xf32>
      %110 = vector.extract_strided_slice %101 {offsets = [0, 64], sizes = [8, 64], strides = [1, 1]} : vector<8x128xf32> to vector<8x64xf32>
      %111 = vector.extract_strided_slice %101 {offsets = [0, 0], sizes = [8, 64], strides = [1, 1]} : vector<8x128xf32> to vector<8x64xf32>
      %112 = tpu.concatenate %110, %111 in 1 : vector<8x64xf32>, vector<8x64xf32> -> vector<8x128xf32>
      %113 = vector.broadcast %30 : vector<1x128xf32> to vector<8x128xf32>
      %114 = arith.mulf %113, %112 : vector<8x128xf32>
      %115 = arith.addf %109, %114 : vector<8x128xf32>
      %116 = arith.addf %115, %107 : vector<8x128xf32>
      %117 = arith.index_cast %105 : i32 to index
      %c0_55 = arith.constant 0 : index
      %118 = vector.load %arg9[%117, %c0_55] : memref<64x256xf32, #tpu.memory_space<vmem>>, vector<8x128xf32>
      tpu.vector_store %arg9[%117, %c0_55], %116 {strides = array<i32>} : memref<64x256xf32, #tpu.memory_space<vmem>>, vector<8x128xf32>,
      %c16_i32 = arith.constant 16 : i32
      %119 = arith.addi %88, %c16_i32 : i32
      %120 = tpu.assume_multiple %119, 8 : i32
      %121 = arith.index_cast %120 : i32 to index
      %c0_56 = arith.constant 0 : index
      %122 = vector.load %arg9[%121, %c0_56] : memref<64x256xf32, #tpu.memory_space<vmem>>, vector<8x128xf32>
      %123 = vector.broadcast %29 : vector<1x128xf32> to vector<8x128xf32>
      %124 = arith.mulf %123, %116 : vector<8x128xf32>
      %125 = vector.extract_strided_slice %116 {offsets = [0, 64], sizes = [8, 64], strides = [1, 1]} : vector<8x128xf32> to vector<8x64xf32>
      %126 = vector.extract_strided_slice %116 {offsets = [0, 0], sizes = [8, 64], strides = [1, 1]} : vector<8x128xf32> to vector<8x64xf32>
      %127 = tpu.concatenate %125, %126 in 1 : vector<8x64xf32>, vector<8x64xf32> -> vector<8x128xf32>
      %128 = vector.broadcast %30 : vector<1x128xf32> to vector<8x128xf32>
      %129 = arith.mulf %128, %127 : vector<8x128xf32>
      %130 = arith.addf %124, %129 : vector<8x128xf32>
      %131 = arith.addf %130, %122 : vector<8x128xf32>
      %132 = arith.index_cast %120 : i32 to index
      %c0_57 = arith.constant 0 : index
      %133 = vector.load %arg9[%132, %c0_57] : memref<64x256xf32, #tpu.memory_space<vmem>>, vector<8x128xf32>
      tpu.vector_store %arg9[%132, %c0_57], %131 {strides = array<i32>} : memref<64x256xf32, #tpu.memory_space<vmem>>, vector<8x128xf32>,
      %c24_i32 = arith.constant 24 : i32
      %134 = arith.addi %88, %c24_i32 : i32
      %135 = tpu.assume_multiple %134, 8 : i32
      %136 = arith.index_cast %135 : i32 to index
      %c0_58 = arith.constant 0 : index
      %137 = vector.load %arg9[%136, %c0_58] : memref<64x256xf32, #tpu.memory_space<vmem>>, vector<8x128xf32>
      %138 = vector.broadcast %29 : vector<1x128xf32> to vector<8x128xf32>
      %139 = arith.mulf %138, %131 : vector<8x128xf32>
      %140 = vector.extract_strided_slice %131 {offsets = [0, 64], sizes = [8, 64], strides = [1, 1]} : vector<8x128xf32> to vector<8x64xf32>
      %141 = vector.extract_strided_slice %131 {offsets = [0, 0], sizes = [8, 64], strides = [1, 1]} : vector<8x128xf32> to vector<8x64xf32>
      %142 = tpu.concatenate %140, %141 in 1 : vector<8x64xf32>, vector<8x64xf32> -> vector<8x128xf32>
      %143 = vector.broadcast %30 : vector<1x128xf32> to vector<8x128xf32>
      %144 = arith.mulf %143, %142 : vector<8x128xf32>
      %145 = arith.addf %139, %144 : vector<8x128xf32>
      %146 = arith.addf %145, %137 : vector<8x128xf32>
      %147 = arith.index_cast %135 : i32 to index
      %c0_59 = arith.constant 0 : index
      %148 = vector.load %arg9[%147, %c0_59] : memref<64x256xf32, #tpu.memory_space<vmem>>, vector<8x128xf32>
      tpu.vector_store %arg9[%147, %c0_59], %146 {strides = array<i32>} : memref<64x256xf32, #tpu.memory_space<vmem>>, vector<8x128xf32>,
      scf.yield %146 : vector<8x128xf32>
    }
    %c2_i32_20 = arith.constant 2 : i32
    %c0_21 = arith.constant 0 : index
    %c0_22 = arith.constant 0 : index
    %34 = vector.load %arg10[%c0_21, %c0_22] : memref<8x128xf32, #tpu.memory_space<vmem>>, vector<8x128xf32>
    tpu.vector_store %arg10[%c0_21, %c0_22], %33 {strides = array<i32>} : memref<8x128xf32, #tpu.memory_space<vmem>>, vector<8x128xf32>,
    %c0_23 = arith.constant 0 : index
    %c0_24 = arith.constant 0 : index
    %35 = vector.load %arg9[%c0_23, %c0_24] : memref<64x256xf32, #tpu.memory_space<vmem>>, vector<64x128xf32>
    %c0_25 = arith.constant 0 : index
    %c0_26 = arith.constant 0 : index
    %36 = vector.load %arg6[%c0_25, %c0_26] : memref<128x128xf32, #tpu.memory_space<vmem>>, vector<128x128xf32>
    %cst_27 = arith.constant dense<0.000000e+00> : vector<64x128xf32>
    %37 = tpu.matmul %35, %36, %cst_27 {dimension_numbers = #tpu.dot_dimension_numbers<[1], [0], [0], [1], [0, 0, 1, 1], [], []>, precision = #tpu.contract_precision<fp32>} : vector<64x128xf32>, vector<128x128xf32>, vector<64x128xf32> -> vector<64x128xf32>
    %c0_28 = arith.constant 0 : index
    %c128 = arith.constant 128 : index
    %38 = vector.load %arg9[%c0_28, %c128] : memref<64x256xf32, #tpu.memory_space<vmem>>, vector<64x128xf32>
    %39 = arith.addf %37, %38 : vector<64x128xf32>
    %cst_29 = arith.constant 0.707106769 : f32
    %40 = vector.broadcast %cst_29 : f32 to vector<64x128xf32>
    %41 = arith.mulf %39, %40 : vector<64x128xf32>
    %cst_30 = arith.constant 0.000000e+00 : f32
    %42 = vector.broadcast %cst_30 : f32 to vector<64x128xf32>
    %43 = arith.cmpf oge, %41, %42 : vector<64x128xf32>
    %cst_31 = arith.constant 1.000000e+00 : f32
    %cst_32 = arith.constant -1.000000e+00 : f32
    %44 = vector.broadcast %cst_31 : f32 to vector<64x128xf32>
    %45 = vector.broadcast %cst_32 : f32 to vector<64x128xf32>
    %46 = arith.select %43, %44, %45 : vector<64x128xi1>, vector<64x128xf32>
    %47 = math.absf %41 : vector<64x128xf32>
    %cst_33 = arith.constant 0.327591091 : f32
    %48 = vector.broadcast %cst_33 : f32 to vector<64x128xf32>
    %49 = arith.mulf %48, %47 : vector<64x128xf32>
    %cst_34 = arith.constant 1.000000e+00 : f32
    %50 = vector.broadcast %cst_34 : f32 to vector<64x128xf32>
    %51 = arith.addf %50, %49 : vector<64x128xf32>
    %cst_35 = arith.constant 1.000000e+00 : f32
    %52 = vector.broadcast %cst_35 : f32 to vector<64x128xf32>
    %53 = arith.divf %52, %51 : vector<64x128xf32>
    %cst_36 = arith.constant 1.06140542 : f32
    %54 = vector.broadcast %cst_36 : f32 to vector<64x128xf32>
    %55 = arith.mulf %53, %54 : vector<64x128xf32>
    %cst_37 = arith.constant -1.45315206 : f32
    %56 = vector.broadcast %cst_37 : f32 to vector<64x128xf32>
    %57 = arith.addf %56, %55 : vector<64x128xf32>
    %58 = arith.mulf %53, %57 : vector<64x128xf32>
    %cst_38 = arith.constant 1.42141378 : f32
    %59 = vector.broadcast %cst_38 : f32 to vector<64x128xf32>
    %60 = arith.addf %59, %58 : vector<64x128xf32>
    %61 = arith.mulf %53, %60 : vector<64x128xf32>
    %cst_39 = arith.constant -0.284496725 : f32
    %62 = vector.broadcast %cst_39 : f32 to vector<64x128xf32>
    %63 = arith.addf %62, %61 : vector<64x128xf32>
    %64 = arith.mulf %53, %63 : vector<64x128xf32>
    %cst_40 = arith.constant 0.254829586 : f32
    %65 = vector.broadcast %cst_40 : f32 to vector<64x128xf32>
    %66 = arith.addf %65, %64 : vector<64x128xf32>
    %67 = arith.mulf %53, %66 : vector<64x128xf32>
    %cst_41 = arith.constant 0.000000e+00 : f32
    %68 = vector.broadcast %cst_41 : f32 to vector<64x128xf32>
    %69 = arith.subf %68, %47 : vector<64x128xf32>
    %70 = arith.mulf %69, %47 : vector<64x128xf32>
    %71 = math.exp %70 : vector<64x128xf32>
    %72 = arith.mulf %67, %71 : vector<64x128xf32>
    %cst_42 = arith.constant 1.000000e+00 : f32
    %73 = vector.broadcast %cst_42 : f32 to vector<64x128xf32>
    %74 = arith.subf %73, %72 : vector<64x128xf32>
    %75 = arith.mulf %46, %74 : vector<64x128xf32>
    %cst_43 = arith.constant 5.000000e-01 : f32
    %76 = vector.broadcast %cst_43 : f32 to vector<64x128xf32>
    %77 = arith.mulf %76, %39 : vector<64x128xf32>
    %cst_44 = arith.constant 1.000000e+00 : f32
    %78 = vector.broadcast %cst_44 : f32 to vector<64x128xf32>
    %79 = arith.addf %78, %75 : vector<64x128xf32>
    %80 = arith.mulf %77, %79 : vector<64x128xf32>
    %c0_45 = arith.constant 0 : index
    %c0_46 = arith.constant 0 : index
    %81 = vector.load %arg7[%c0_45, %c0_46] : memref<128x10xf32, #tpu.memory_space<vmem>>, vector<128x10xf32>
    %cst_47 = arith.constant dense<0.000000e+00> : vector<64x10xf32>
    %82 = tpu.matmul %80, %81, %cst_47 {dimension_numbers = #tpu.dot_dimension_numbers<[1], [0], [0], [1], [0, 0, 1, 1], [], []>, precision = #tpu.contract_precision<fp32>} : vector<64x128xf32>, vector<128x10xf32>, vector<64x10xf32> -> vector<64x10xf32>
    %83 = arith.addf %82, %1 : vector<64x10xf32>
    %c0_48 = arith.constant 0 : index
    %c0_49 = arith.constant 0 : index
    %c0_50 = arith.constant 0 : index
    %84 = vector.load %arg8[%c0_48, %c0_49, %c0_50] : memref<1x64x10xf32, #tpu.memory_space<vmem>>, vector<1x64x10xf32>
    %85 = vector.shape_cast %84 : vector<1x64x10xf32> to vector<64x10xf32>
    %86 = vector.shape_cast %83 : vector<64x10xf32> to vector<1x64x10xf32>
    tpu.vector_store %arg8[%c0_48, %c0_49, %c0_50], %86 {strides = array<i32>} : memref<1x64x10xf32, #tpu.memory_space<vmem>>, vector<1x64x10xf32>,
    return
  }
  func.func @transform_0(%arg0: i32, %arg1: i32) -> (i32, i32, i32) {
    %c0_i32 = arith.constant 0 : i32
    %c0_i32_0 = arith.constant 0 : i32
    return %arg0, %arg1, %c0_i32 : i32, i32, i32
  }
  func.func @transform_1(%arg0: i32, %arg1: i32) -> (i32, i32) {
    %c0_i32 = arith.constant 0 : i32
    %c0_i32_0 = arith.constant 0 : i32
    %c0_i32_1 = arith.constant 0 : i32
    return %c0_i32, %c0_i32_0 : i32, i32
  }
  func.func @transform_2(%arg0: i32, %arg1: i32) -> (i32, i32) {
    %c0_i32 = arith.constant 0 : i32
    %c0_i32_0 = arith.constant 0 : i32
    %c0_i32_1 = arith.constant 0 : i32
    return %c0_i32, %c0_i32_0 : i32, i32
  }
  func.func @transform_3(%arg0: i32, %arg1: i32) -> (i32, i32) {
    %c0_i32 = arith.constant 0 : i32
    %c0_i32_0 = arith.constant 0 : i32
    %c0_i32_1 = arith.constant 0 : i32
    return %c0_i32, %c0_i32_0 : i32, i32
  }
  func.func @transform_4(%arg0: i32, %arg1: i32) -> (i32, i32) {
    %c0_i32 = arith.constant 0 : i32
    %c0_i32_0 = arith.constant 0 : i32
    %c0_i32_1 = arith.constant 0 : i32
    return %c0_i32, %c0_i32_0 : i32, i32
  }
  func.func @transform_5(%arg0: i32, %arg1: i32) -> (i32, i32) {
    %c0_i32 = arith.constant 0 : i32
    %c0_i32_0 = arith.constant 0 : i32
    %c0_i32_1 = arith.constant 0 : i32
    return %c0_i32, %c0_i32_0 : i32, i32
  }
  func.func @transform_6(%arg0: i32, %arg1: i32) -> (i32, i32, i32) {
    %c0_i32 = arith.constant 0 : i32
    %c0_i32_0 = arith.constant 0 : i32
    return %arg0, %arg1, %c0_i32 : i32, i32, i32
  }
}

</mosaic_0001>

<bundles_post_ra>
// kernel: tpu_custom_call.1
= control target key start
LH: loop header
LB: loop body
LE: loop exit
PB: predicated region body
PF: predicated region fallthrough
CT: control target
= control target key end

     0   :  { %vm31_vm0 = vcmask 80896   ;;  %v2724_v14 = vmov 10.0   ;;  %vm255_vm2 = vcmask 1041408   ;;  %s4393_s0 = inlined_call_operand.vmem [shape: f32[1,64,10], index: 0, kind: input, shape index: {}]   ;;  %s4394_s1 = inlined_call_operand.vmem [shape: f32[1,10], index: 1, kind: input, shape index: {}]   ;;  %s4395_s4 = inlined_call_operand.vmem [shape: f32[128,128], index: 4, kind: input, shape index: {}]   ;;  %s4396_s5 = inlined_call_operand.vmem [shape: f32[128,10], index: 5, kind: input, shape index: {}]   ;;  %s4397_s6 = inlined_call_operand.vmem [shape: f32[1,64,10], index: 6, kind: output, shape index: {}]   ;;  %s4398_s3 = inlined_call_operand.vmem [shape: f32[10,256], index: 3, kind: input, shape index: {}]   ;;  %s4399_s2 = inlined_call_operand.vmem [shape: f32[2,128], index: 2, kind: input, shape index: {}]  }
   0x1   :  { %v2765_v0 = vld [vmem:[%s4393_s0 + $0x20] sm:$0xff]  ;;  %v2770_v1 = vld [vmem:[%s4393_s0 + $0x10] sm:$0xff]  ;;  %v2786_v6 = vld [vmem:[%s4393_s0 + $0x28] sm:$0xff]  ;;  %2658 = vrcp.f32 %v2724_v14 }
   0x2   :  { %4447 = vst [vmem:[#allocation4_spill] sm:$0xff] %v2765_v0  ;;  %v2775_v2 = vld [vmem:[%s4393_s0] sm:$0xff]  ;;  %v44_v3 = vsel %vm31_vm0, %v2765_v0, 0.0  ;;  %v38_v4 = vsel %vm31_vm0, %v2770_v1, 0.0  ;;  %v2791_v7 = vld [vmem:[%s4393_s0 + $0x18] sm:$0xff]  ;;  %v2796_v8 = vld [vmem:[%s4393_s0 + $0x8] sm:$0xff] }
   0x3   :  { %4448 = vst [vmem:[#allocation5_spill] sm:$0xff] %v2770_v1  ;;  %v32_v5 = vsel %vm31_vm0, %v2775_v2, 0.0  ;;  %45 = vadd.xlane.f32.xlu2 %v44_v3  ;;  %39 = vadd.xlane.f32.xlu1 %v38_v4  ;;  %v47_v9 = vsel %vm31_vm0, %v2786_v6, 0.0  ;;  %v41_v10 = vsel %vm31_vm0, %v2791_v7, 0.0  ;;  %v35_v11 = vsel %vm31_vm0, %v2796_v8, 0.0  ;;  %v2807_v12 = vld [vmem:[%s4393_s0 + $0x30] sm:$0xff] }
   0x4   :  { %4449 = vst [vmem:[#allocation6_spill] sm:$0xff] %v2775_v2  ;;  %33 = vadd.xlane.f32.xlu0 %v32_v5  ;;  %v50_v13 = vsel %vm31_vm0, %v2807_v12, 0.0  ;;  %v2837_v40 = vld [vmem:[%s4393_s0 + $0x38] sm:$0xff]  ;;  %v229_v58 = vld [vmem:[%s4398_s3 + $0x10] sm:$0x3]  ;;  %v227_v61 = vld [vmem:[%s4398_s3] sm:$0xff] }
   0x5   :  { %4450 = vst [vmem:[#allocation7_spill] sm:$0xff] %v2786_v6  ;;  %v53_v45 = vsel %vm31_vm0, %v2837_v40, 0.0  ;;  %v257_v59 = vsel %vm255_vm2, %v229_v58, 0  ;;  %v278_v63 = vand.u32 4294901760, %v227_v61 }
   0x6   :  { %4451 = vst [vmem:[#allocation8_spill] sm:$0xff] %v2791_v7  ;;  %v276_v60 = vand.u32 4294901760, %v257_v59 }
   0x7   :  { %4452 = vst [vmem:[#allocation9_spill] sm:$0xff] %v2796_v8  ;;  %v2659_v15 = vpop.eup %2658  ;;  %v366_v4 = vsub.f32 %v227_v61, %v278_v63  ;;  %v2900_v61 = vld [vmem:[%s4394_s1] ss:$0 sm:$0xff] }
   0x8   :  { %4453 = vst [vmem:[#allocation10_spill] sm:$0xff] %v2807_v12  ;;  %v57_v16 = vmul.f32 10.0, %v2659_v15  ;;  %vm61_vm1 = vweird.f32 %v2659_v15  ;;  %v360_v62 = vsub.f32 %v257_v59, %v276_v60  ;;  %480 = vmatpush.msra.mxu3 %v276_v60  ;;  %277 = vmatpush.msra.mxu0 %v276_v60 }
   0x9   :  { %4454 = vst [vmem:[#allocation11_spill] sm:$0xff] %v2837_v40 }
   0xa   :  { %v58_v17 = vsub.f32 1.0, %v57_v16  ;;  %v361_v3 = vand.u32 4294901760, %v360_v62  ;;  %420 = vmatpush.msra.mxu2 %v360_v62  ;;  %482 = vmatpush.msra.mxu3 %v278_v63 }
   0xb   :  { %48 = vadd.xlane.f32.xlu2 %v47_v9  ;;  %42 = vadd.xlane.f32.xlu1 %v41_v10  ;;  %v367_v9 = vand.u32 4294901760, %v366_v4 }
   0xc   :  { %36 = vadd.xlane.f32.xlu0 %v35_v11  ;;  %v59_v18 = vmul.f32 %v2659_v15, %v58_v17  ;;  %279 = vmatpush.msra.mxu0 %v278_v63  ;;  %v362_v5 = vsub.f32 %v360_v62, %v361_v3 }
   0xd   :  { %423 = vmatpush.msra.mxu2 %v366_v4  ;;  %v368_v11 = vsub.f32 %v366_v4, %v367_v9 }
   0xe   :  { %v60_v19 = vadd.f32 %v2659_v15, %v59_v18  ;;  %549 = vmatpush.msrb.mxu0 %v361_v3  ;;  %v363_v10 = vand.u32 4294901760, %v362_v5 }
  0x10   :  { %v2811_v20 = vsel %vm61_vm1, %v2659_v15, %v60_v19  ;;  %553 = vmatpush.msrb.mxu0 %v367_v9  ;;  %364 = vmatpush.msra.mxu1 %v363_v10 }
  0x13   :  { %51 = vadd.xlane.f32.xlu1 %v50_v13  ;;  %v369_v13 = vand.u32 4294901760, %v368_v11 }
  0x15   :  { %370 = vmatpush.msra.mxu1 %v369_v13 }
  0x17   :  { %602 = vmatpush.msrb.mxu1 %v276_v60 }
  0x19   :  { %604 = vmatpush.msrb.mxu1 %v278_v63 }
  0x76   :  { %v46_v21 = vpop.xlane.xlu2 %45  ;;  %v40_v22 = vpop.xlane.xlu1 %39 }
  0x77   :  { %v65_v23 = vmul.f32 %v2811_v20, %v40_v22  ;;  %v34_v24 = vpop.xlane.xlu0 %33  ;;  %v67_v36 = vmul.f32 %v2811_v20, %v46_v21 }
  0x78   :  { %v63_v25 = vmul.f32 %v2811_v20, %v34_v24 }
  0x79   :  { %v2816_v26 = vsub.f32 %v2770_v1, %v65_v23  ;;  %v2845_v43 = vsub.f32 %v2765_v0, %v67_v36 }
  0x7a   :  { %v2819_v27 = vsub.f32 %v2775_v2, %v63_v25 }
  0x7b   :  { %v81_v28 = vmul.f32 %v2816_v26, %v2816_v26  ;;  %v83_v51 = vmul.f32 %v2845_v43, %v2845_v43 }
  0x7c   :  { %v79_v29 = vmul.f32 %v2819_v27, %v2819_v27 }
  0x7d   :  { %v93_v30 = vsel %vm31_vm0, %v81_v28, 0.0  ;;  %v99_v54 = vsel %vm31_vm0, %v83_v51, 0.0 }
  0x7e   :  { %v49_v31 = vpop.xlane.xlu2 %48  ;;  %94 = vadd.xlane.f32.xlu1 %v93_v30  ;;  %v87_v32 = vsel %vm31_vm0, %v79_v29, 0.0  ;;  %v43_v33 = vpop.xlane.xlu1 %42 }
  0x7f   :  { %v68_v34 = vmul.f32 %v2811_v20, %v49_v31  ;;  %88 = vadd.xlane.f32.xlu0 %v87_v32  ;;  %v37_v35 = vpop.xlane.xlu0 %36  ;;  %v66_v38 = vmul.f32 %v2811_v20, %v43_v33 }
  0x80   :  { %v64_v37 = vmul.f32 %v2811_v20, %v37_v35 }
  0x81   :  { %v2832_v39 = vsub.f32 %v2786_v6, %v68_v34  ;;  %v2848_v44 = vsub.f32 %v2791_v7, %v66_v38 }
  0x82   :  { %v2840_v41 = vsub.f32 %v2796_v8, %v64_v37 }
  0x83   :  { %v84_v42 = vmul.f32 %v2832_v39, %v2832_v39  ;;  %v82_v52 = vmul.f32 %v2848_v44, %v2848_v44 }
  0x84   :  { %v80_v46 = vmul.f32 %v2840_v41, %v2840_v41 }
  0x85   :  { %v102_v47 = vsel %vm31_vm0, %v84_v42, 0.0  ;;  %v96_v55 = vsel %vm31_vm0, %v82_v52, 0.0 }
  0x86   :  { %103 = vadd.xlane.f32.xlu1 %v102_v47  ;;  %v90_v48 = vsel %vm31_vm0, %v80_v46, 0.0  ;;  %v52_v49 = vpop.xlane.xlu1 %51 }
  0x87   :  { %54 = vadd.xlane.f32.xlu0 %v53_v45  ;;  %91 = vadd.xlane.f32.xlu2 %v90_v48  ;;  %v69_v50 = vmul.f32 %v2811_v20, %v52_v49 }
  0x89   :  { %v2862_v53 = vsub.f32 %v2807_v12, %v69_v50 }
  0x8b   :  { %v85_v56 = vmul.f32 %v2862_v53, %v2862_v53 }
  0x8d   :  { %v105_v57 = vsel %vm31_vm0, %v85_v56, 0.0 }
  0x8f   :  { %100 = vadd.xlane.f32.xlu0 %v99_v54  ;;  %97 = vadd.xlane.f32.xlu2 %v96_v55 }
  0x97   :  { %106 = vadd.xlane.f32.xlu2 %v105_v57 }
  0xf1   :  { %v95_v14 = vpop.xlane.xlu1 %94 }
  0xf2   :  { %v113_v15 = vmul.f32 %v95_v14, %v2811_v20  ;;  %v89_v16 = vpop.xlane.xlu0 %88 }
  0xf3   :  { %v111_v17 = vmul.f32 %v89_v16, %v2811_v20 }
  0xf4   :  { %v121_v18 = vadd.f32 1e-05, %v113_v15 }
  0xf5   :  { %v119_v19 = vadd.f32 1e-05, %v111_v17 }
  0xf6   :  { %2660 = vrsqrt.f32 %v121_v18  ;;  %vm153_vm3 = vweird.f32 %v121_v18 }
  0xf7   :  { %2662 = vrsqrt.f32 %v119_v19  ;;  %vm133_vm7 = vweird.f32 %v119_v19 }
  0xf9   :  { %v104_v21 = vpop.xlane.xlu1 %103 }
  0xfa   :  { %v92_v22 = vpop.xlane.xlu2 %91  ;;  %v55_v23 = vpop.xlane.xlu0 %54  ;;  %v116_v29 = vmul.f32 %v104_v21, %v2811_v20 }
  0xfb   :  { %v112_v24 = vmul.f32 %v92_v22, %v2811_v20  ;;  %v70_v25 = vmul.f32 %v2811_v20, %v55_v23 }
  0xfc   :  { %v2661_v28 = vpop.eup %2660  ;;  %v2886_v38 = vadd.f32 1e-05, %v116_v29 }
  0xfd   :  { %v2663_v30 = vpop.eup %2662  ;;  %v148_v31 = vmul.f32 %v2661_v28, %v121_v18  ;;  %v120_v32 = vadd.f32 1e-05, %v112_v24  ;;  %v2882_v33 = vsub.f32 %v2837_v40, %v70_v25  ;;  %vm154_vm4 = vweird.f32 %v2661_v28 }
  0xfe   :  { %v128_v34 = vmul.f32 %v2663_v30, %v119_v19  ;;  %vm134_vm5 = vweird.f32 %v2663_v30  ;;  %vm2893_vm6 = vmor %vm153_vm3, %vm154_vm4  ;;  %vm183_vm4 = vweird.f32 %v2886_v38 }
  0xff   :  { %v149_v35 = vmul.f32 %v2661_v28, %v148_v31  ;;  %2664 = vrsqrt.f32 %v120_v32  ;;  %v86_v36 = vmul.f32 %v2882_v33, %v2882_v33  ;;  %vm135_vm8 = vmor %vm133_vm7, %vm134_vm5  ;;  %vm143_vm9 = vweird.f32 %v120_v32 }
 0x100   :  { %v129_v37 = vmul.f32 %v2663_v30, %v128_v34  ;;  %2666 = vrsqrt.f32 %v2886_v38 }
 0x101   :  { %v150_v42 = vmul.f32 0.5, %v149_v35  ;;  %v108_v45 = vsel %vm31_vm0, %v86_v36, 0.0 }
 0x102   :  { %v130_v46 = vmul.f32 0.5, %v129_v37  ;;  %v98_v47 = vpop.xlane.xlu2 %97  ;;  %109 = vadd.xlane.f32.xlu0 %v108_v45  ;;  %v101_v48 = vpop.xlane.xlu0 %100 }
 0x103   :  { %v151_v49 = vsub.f32 1.5, %v150_v42  ;;  %v114_v50 = vmul.f32 %v98_v47, %v2811_v20  ;;  %v115_v51 = vmul.f32 %v101_v48, %v2811_v20 }
 0x104   :  { %v131_v52 = vsub.f32 1.5, %v130_v46 }
 0x105   :  { %v2665_v54 = vpop.eup %2664  ;;  %v152_v55 = vmul.f32 %v2661_v28, %v151_v49  ;;  %v122_v56 = vadd.f32 1e-05, %v114_v50  ;;  %v123_v60 = vadd.f32 1e-05, %v115_v51 }
 0x106   :  { %v132_v58 = vmul.f32 %v2663_v30, %v131_v52  ;;  %v138_v59 = vmul.f32 %v2665_v54, %v120_v32  ;;  %v2905_v5 = vpop.eup %2666  ;;  %vm144_vm10 = vweird.f32 %v2665_v54 }
 0x107   :  { %2668 = vrsqrt.f32 %v122_v56  ;;  %v156_v3 = vsel %vm2893_vm6, %v2661_v28, %v152_v55  ;;  %v178_v18 = vmul.f32 %v2905_v5, %v2886_v38  ;;  %vm145_vm11 = vmor %vm143_vm9, %vm144_vm10  ;;  %vm163_vm12 = vweird.f32 %v122_v56 }
 0x108   :  { %v136_v62 = vsel %vm135_vm8, %v2663_v30, %v132_v58  ;;  %v139_v63 = vmul.f32 %v2665_v54, %v138_v59  ;;  %2670 = vrsqrt.f32 %v123_v60  ;;  %v209_v14 = vmul.f32 %v156_v3, %v2816_v26 }
 0x109   :  { %v207_v4 = vmul.f32 %v136_v62, %v2819_v27  ;;  %v179_v29 = vmul.f32 %v2905_v5, %v178_v18  ;;  %vm173_vm14 = vweird.f32 %v123_v60  ;;  %vm184_vm5 = vweird.f32 %v2905_v5 }
 0x10a   :  { %v140_v9 = vmul.f32 0.5, %v139_v63  ;;  %v107_v10 = vpop.xlane.xlu2 %106  ;;  %v221_v26 = vmul.f32 %v2900_v61, %v209_v14  ;;  %vm185_vm6 = vmor %vm183_vm4, %vm184_vm5 }
 0x10b   :  { %v219_v11 = vmul.f32 %v2900_v61, %v207_v4  ;;  %v117_v13 = vmul.f32 %v107_v10, %v2811_v20  ;;  %v180_v46 = vmul.f32 0.5, %v179_v29 }
 0x10c   :  { %v141_v15 = vsub.f32 1.5, %v140_v9  ;;  %v238_v42 = vsel %vm31_vm0, %v221_v26, 0 }
 0x10d   :  { %v2669_v16 = vpop.eup %2668  ;;  %v232_v17 = vsel %vm31_vm0, %v219_v11, 0  ;;  %v2913_v27 = vadd.f32 1e-05, %v117_v13  ;;  %v2946_v55 = vand.u32 4294901760, %v238_v42  ;;  %v181_v62 = vsub.f32 1.5, %v180_v46 }
 0x10e   :  { %v2671_v19 = vpop.eup %2670  ;;  %v2915_v21 = vand.u32 4294901760, %v232_v17  ;;  %v142_v22 = vmul.f32 %v2665_v54, %v141_v15  ;;  %v158_v23 = vmul.f32 %v2669_v16, %v122_v56  ;;  %vm164_vm13 = vweird.f32 %v2669_v16 }
 0x10f   :  { %v168_v24 = vmul.f32 %v2671_v19, %v123_v60  ;;  %2672 = vrsqrt.f32 %v2913_v27  ;;  %vm174_vm15 = vweird.f32 %v2671_v19  ;;  %vm165_vm1 = vmor %vm163_vm12, %vm164_vm13  ;;  %v182_v13 = vmul.f32 %v2905_v5, %v181_v62 }
 0x110   :  { %v146_v25 = vsel %vm145_vm11, %v2665_v54, %v142_v22  ;;  %v159_v28 = vmul.f32 %v2669_v16, %v158_v23  ;;  %372 = vmatmul.f32.vlgmr.msra.gmra.mxu1 %v2915_v21  ;;  %v2923_v32 = vsub.f32 %v232_v17, %v2915_v21  ;;  %vm2940_vm3 = vmor %vm173_vm14, %vm174_vm15  ;;  %vm193_vm7 = vweird.f32 %v2913_v27  ;;  %v230_v22 = vld [vmem:[%s4398_s3 + $0x18] sm:$0x3] }
 0x111   :  { %v208_v30 = vmul.f32 %v146_v25, %v2840_v41  ;;  %v169_v31 = vmul.f32 %v2671_v19, %v168_v24  ;;  %v186_v18 = vsel %vm185_vm6, %v2905_v5, %v182_v13 }
 0x112   :  { %v160_v34 = vmul.f32 0.5, %v159_v28  ;;  %426 = vmatmul.f32.vlgmr.msra.gmra.mxu2 %v2923_v32  ;;  %v2928_v37 = vand.u32 4294901760, %v2923_v32  ;;  %v212_v5 = vmul.f32 %v186_v18, %v2832_v39  ;;  %v260_v28 = vsel %vm255_vm2, %v230_v22, 0 }
 0x113   :  { %v220_v35 = vmul.f32 %v2900_v61, %v208_v30  ;;  %v170_v36 = vmul.f32 0.5, %v169_v31 }
 0x114   :  { %v161_v41 = vsub.f32 1.5, %v160_v34  ;;  %486 = vmatmul.f32.vlgmr.msra.gmra.mxu3 %v2928_v37  ;;  %v283_v49 = vsub.f32 %v2923_v32, %v2928_v37  ;;  %v224_v39 = vmul.f32 %v2900_v61, %v212_v5 }
 0x115   :  { %v2931_v45 = vpop.eup %2672  ;;  %v235_v47 = vsel %vm31_vm0, %v220_v35, 0  ;;  %v171_v48 = vsub.f32 1.5, %v170_v36  ;;  %v652_v35 = vand.u32 4294901760, %v260_v28 }
 0x116   :  { %v2937_v50 = vand.u32 4294901760, %v235_v47  ;;  %v162_v51 = vmul.f32 %v2669_v16, %v161_v41  ;;  %v188_v54 = vmul.f32 %v2931_v45, %v2913_v27  ;;  %v2948_v57 = vand.u32 4294901760, %v283_v49 }
 0x117   :  { %v172_v56 = vmul.f32 %v2671_v19, %v171_v48  ;;  %vm194_vm8 = vweird.f32 %v2931_v45  ;;  %v736_v41 = vsub.f32 %v260_v28, %v652_v35  ;;  %856 = vmatpush.msra.mxu1 %v652_v35  ;;  %v247_v46 = vsel %vm31_vm0, %v224_v39, 0  ;;  %653 = vmatpush.msrb.mxu2 %v652_v35 }
 0x118   :  { %v166_v58 = vsel %vm165_vm1, %v2669_v16, %v162_v51  ;;  %376 = vmatmul.f32.gmra.mxu1 %v2937_v50  ;;  %v2952_v59 = vsub.f32 %v235_v47, %v2937_v50  ;;  %v189_v3 = vmul.f32 %v2931_v45, %v188_v54  ;;  %285 = vmatmul.f32.vlgmr.msra.gmra.mxu0 %v2948_v57  ;;  %vm3001_vm9 = vmor %vm193_vm7, %vm194_vm8  ;;  %v3028_v48 = vand.u32 4294901760, %v247_v46 }
 0x119   :  { %v210_v60 = vmul.f32 %v166_v58, %v2848_v44  ;;  %v176_v63 = vsel %vm2940_vm3, %v2671_v19, %v172_v56  ;;  %v2967_v44 = vsub.f32 %v238_v42, %v2946_v55  ;;  %796 = vmatpush.msra.mxu0 %v736_v41 }
 0x11a   :  { %v2960_v4 = vand.u32 4294901760, %v2952_v59  ;;  %431 = vmatmul.f32.gmra.mxu2 %v2952_v59  ;;  %v211_v10 = vmul.f32 %v176_v63, %v2845_v43  ;;  %v190_v15 = vmul.f32 0.5, %v189_v3  ;;  %v3042_v58 = vsub.f32 %v247_v46, %v3028_v48 }
 0x11b   :  { %v222_v9 = vmul.f32 %v2900_v61, %v210_v60  ;;  %v2980_v17 = vand.u32 4294901760, %v2967_v44 }
 0x11c   :  { %v291_v11 = vsub.f32 %v2952_v59, %v2960_v4  ;;  %492 = vmatmul.f32.gmra.mxu3 %v2960_v4  ;;  %v223_v43 = vmul.f32 %v2900_v61, %v211_v10  ;;  %v191_v19 = vsub.f32 1.5, %v190_v15  ;;  %v3051_v3 = vand.u32 4294901760, %v3042_v58 }
 0x11d   :  { %v241_v14 = vsel %vm31_vm0, %v222_v9, 0  ;;  %v299_v23 = vsub.f32 %v2967_v44, %v2980_v17 }
 0x11e   :  { %v2975_v38 = vand.u32 4294901760, %v291_v11  ;;  %v2977_v16 = vand.u32 4294901760, %v241_v14  ;;  %v244_v26 = vsel %vm31_vm0, %v223_v43, 0  ;;  %v192_v27 = vmul.f32 %v2931_v45, %v191_v19  ;;  %v228_v43 = vld [vmem:[%s4398_s3 + $0x8] sm:$0xff] }
 0x11f   :  { %v3006_v29 = vand.u32 4294901760, %v244_v26  ;;  %v3008_v30 = vand.u32 4294901760, %v299_v23  ;;  %v323_v9 = vsub.f32 %v3042_v58, %v3051_v3  ;;  %v654_v18 = vand.u32 4294901760, %v228_v43 }
 0x120   :  { %380 = vmatmul.f32.gmra.mxu1 %v2946_v55  ;;  %293 = vmatmul.f32.gmra.mxu0 %v2975_v38  ;;  %v2995_v24 = vsub.f32 %v241_v14, %v2977_v16  ;;  %v196_v34 = vsel %vm3001_vm9, %v2931_v45, %v192_v27  ;;  %v737_v45 = vand.u32 4294901760, %v736_v41 }
 0x121   :  { %v3023_v42 = vsub.f32 %v244_v26, %v3006_v29  ;;  %v213_v47 = vmul.f32 %v196_v34, %v2862_v53  ;;  %v3062_v11 = vand.u32 4294901760, %v323_v9  ;;  %655 = vmatpush.msrb.mxu2 %v654_v18  ;;  %v742_v19 = vsub.f32 %v228_v43, %v654_v18  ;;  %858 = vmatpush.msra.mxu1 %v654_v18 }
 0x122   :  { %436 = vmatmul.f32.gmra.mxu2 %v2967_v44  ;;  %v3011_v31 = vand.u32 4294901760, %v2995_v24  ;;  %v738_v52 = vsub.f32 %v736_v41, %v737_v45 }
 0x123   :  { %v3033_v51 = vand.u32 4294901760, %v3023_v42  ;;  %v225_v54 = vmul.f32 %v2900_v61, %v213_v47  ;;  %925 = vmatpush.msra.mxu2 %v737_v45  ;;  %v743_v5 = vand.u32 4294901760, %v742_v19  ;;  %799 = vmatpush.msra.mxu0 %v742_v19 }
 0x124   :  { %498 = vmatmul.f32.gmra.mxu3 %v2980_v17  ;;  %v307_v36 = vsub.f32 %v2995_v24, %v3011_v31  ;;  %v739_v53 = vand.u32 4294901760, %v738_v52 }
 0x125   :  { %v315_v56 = vsub.f32 %v3023_v42, %v3033_v51  ;;  %v250_v62 = vsel %vm31_vm0, %v225_v54, 0  ;;  %v744_v27 = vsub.f32 %v742_v19, %v743_v5  ;;  %929 = vmatpush.msra.mxu2 %v743_v5 }
 0x126   :  { %v3030_v49 = vand.u32 4294901760, %v307_v36  ;;  %740 = vmatpush.msrb.mxu3 %v739_v53  ;;  %v3046_v60 = vand.u32 4294901760, %v250_v62 }
 0x127   :  { %v3048_v63 = vand.u32 4294901760, %v315_v56  ;;  %v745_v25 = vand.u32 4294901760, %v744_v27 }
 0x128   :  { %384 = vmatmul.f32.gmra.mxu1 %v2977_v16  ;;  %301 = vmatmul.f32.gmra.mxu0 %v3008_v30  ;;  %v3059_v10 = vsub.f32 %v250_v62, %v3046_v60 }
 0x129   :  { %746 = vmatpush.msrb.mxu3 %v745_v25 }
 0x12a   :  { %441 = vmatmul.f32.gmra.mxu2 %v2995_v24  ;;  %v3065_v13 = vand.u32 4294901760, %v3059_v10 }
 0x12b   :  { %978 = vmatpush.msra.mxu3 %v652_v35 }
 0x12c   :  { %504 = vmatmul.f32.gmra.mxu3 %v3011_v31  ;;  %v331_v14 = vsub.f32 %v3059_v10, %v3065_v13 }
 0x12d   :  { %980 = vmatpush.msra.mxu3 %v654_v18 }
 0x12e   :  { %v3073_v15 = vand.u32 4294901760, %v331_v14 }
 0x130   :  { %388 = vmatmul.f32.gmra.mxu1 %v3006_v29  ;;  %309 = vmatmul.f32.gmra.mxu0 %v3030_v49 }
 0x132   :  { %446 = vmatmul.f32.gmra.mxu2 %v3023_v42 }
 0x134   :  { %510 = vmatmul.f32.gmra.mxu3 %v3033_v51 }
 0x138   :  { %392 = vmatmul.f32.gmra.mxu1 %v3028_v48  ;;  %317 = vmatmul.f32.gmra.mxu0 %v3048_v63 }
 0x13a   :  { %451 = vmatmul.f32.gmra.mxu2 %v3042_v58 }
 0x13c   :  { %516 = vmatmul.f32.gmra.mxu3 %v3051_v3 }
 0x140   :  { %396 = vmatmul.f32.gmra.mxu1 %v3046_v60  ;;  %325 = vmatmul.f32.gmra.mxu0 %v3062_v11 }
 0x142   :  { %456 = vmatmul.f32.gmra.mxu2 %v3059_v10 }
 0x144   :  { %522 = vmatmul.f32.gmra.mxu3 %v3065_v13 }
 0x148   :  { %333 = vmatmul.f32.gmra.mxu0 %v3073_v15 }
 0x175   :  { %v110_v22 = vpop.xlane.xlu0 %109 }
 0x176   :  { %v118_v23 = vmul.f32 %v110_v22, %v2811_v20 }
 0x178   :  { %v126_v26 = vadd.f32 1e-05, %v118_v23 }
 0x17a   :  { %2674 = vrsqrt.f32 %v126_v26  ;;  %vm203_vm10 = vweird.f32 %v126_v26 }
 0x180   :  { %v2675_v28 = vpop.eup %2674 }
 0x181   :  { %v198_v39 = vmul.f32 %v2675_v28, %v126_v26  ;;  %vm204_vm2 = vweird.f32 %v2675_v28 }
 0x182   :  { %vm205_vm11 = vmor %vm203_vm10, %vm204_vm2 }
 0x183   :  { %v199_v34 = vmul.f32 %v2675_v28, %v198_v39 }
 0x185   :  { %v200_v36 = vmul.f32 0.5, %v199_v34 }
 0x187   :  { %v201_v41 = vsub.f32 1.5, %v200_v36 }
 0x189   :  { %v202_v46 = vmul.f32 %v2675_v28, %v201_v41 }
 0x18b   :  { %v206_v20 = vsel %vm205_vm11, %v2675_v28, %v202_v46 }
 0x18c   :  { %v214_v47 = vmul.f32 %v206_v20, %v2882_v33 }
 0x18e   :  { %v226_v45 = vmul.f32 %v2900_v61, %v214_v47 }
 0x190   :  { %v253_v52 = vsel %vm31_vm0, %v226_v45, 0 }
 0x191   :  { %v3083_v54 = vand.u32 4294901760, %v253_v52 }
 0x193   :  { %400 = vmatmul.f32.gmra.mxu1 %v3083_v54  ;;  %v3087_v35 = vsub.f32 %v253_v52, %v3083_v54 }
 0x195   :  { %461 = vmatmul.f32.gmra.mxu2 %v3087_v35  ;;  %v3091_v53 = vand.u32 4294901760, %v3087_v35 }
 0x197   :  { %528 = vmatmul.f32.gmra.mxu3 %v3091_v53  ;;  %v339_v33 = vsub.f32 %v3087_v35, %v3091_v53  ;;  %v3133_v56 = vpop.f32.mrf.mxu3 }
 0x199   :  { %v340_v61 = vand.u32 4294901760, %v339_v33 }
 0x19b   :  { %341 = vmatmul.f32.gmra.mxu0 %v340_v61  ;;  %606 = vmatmul.f32.vlgmr.msrb.gmra.mxu1 %v2915_v21 }
 0x19d   :  { %661 = vmatmul.f32.vlgmr.msrb.gmra.mxu2 %v2948_v57  ;;  %v3121_v57 = vpop.f32.mrf.mxu1 }
 0x19f   :  { %748 = vmatmul.f32.vlgmr.msrb.gmra.mxu3 %v2915_v21 }
 0x1a3   :  { %555 = vmatmul.f32.vlgmr.msrb.gmra.mxu0 %v2915_v21  ;;  %610 = vmatmul.f32.gmra.mxu1 %v2937_v50 }
 0x1a5   :  { %669 = vmatmul.f32.gmra.mxu2 %v2975_v38  ;;  %v3125_v38 = vpop.f32.mrf.mxu0 }
 0x1a7   :  { %752 = vmatmul.f32.gmra.mxu3 %v2937_v50 }
 0x1ab   :  { %559 = vmatmul.f32.gmra.mxu0 %v2937_v50  ;;  %614 = vmatmul.f32.gmra.mxu1 %v2946_v55 }
 0x1ad   :  { %677 = vmatmul.f32.gmra.mxu2 %v3008_v30  ;;  %v3129_v30 = vpop.f32.mrf.mxu2  ;;  %v294_v62 = vpop.f32.mrf.mxu0 }
 0x1af   :  { %756 = vmatmul.f32.gmra.mxu3 %v2946_v55 }
 0x1b3   :  { %563 = vmatmul.f32.gmra.mxu0 %v2946_v55  ;;  %618 = vmatmul.f32.gmra.mxu1 %v2977_v16 }
 0x1b5   :  { %685 = vmatmul.f32.gmra.mxu2 %v3030_v49  ;;  %v3131_v49 = vpop.f32.mrf.mxu1  ;;  %v3149_v14 = vpop.f32.mrf.mxu0 }
 0x1b6   :  { %v378_v23 = vadd.f32 %v3131_v49, %v294_v62 }
 0x1b7   :  { %760 = vmatmul.f32.gmra.mxu3 %v2977_v16 }
 0x1bb   :  { %567 = vmatmul.f32.gmra.mxu0 %v2977_v16  ;;  %622 = vmatmul.f32.gmra.mxu1 %v3006_v29 }
 0x1bd   :  { %693 = vmatmul.f32.gmra.mxu2 %v3048_v63  ;;  %v3139_v63 = vpop.f32.mrf.mxu2  ;;  %v3142_v9 = vpop.f32.mrf.mxu1 }
 0x1be   :  { %v433_v39 = vadd.f32 %v3139_v63, %v378_v23  ;;  %v382_v41 = vadd.f32 %v3142_v9, %v3149_v14 }
 0x1bf   :  { %764 = vmatmul.f32.gmra.mxu3 %v3006_v29 }
 0x1c3   :  { %571 = vmatmul.f32.gmra.mxu0 %v3006_v29  ;;  %626 = vmatmul.f32.gmra.mxu1 %v3028_v48 }
 0x1c5   :  { %701 = vmatmul.f32.gmra.mxu2 %v3062_v11  ;;  %v3144_v11 = vpop.f32.mrf.mxu3 }
 0x1c6   :  { %v494_v36 = vadd.f32 %v3144_v11, %v433_v39 }
 0x1c7   :  { %768 = vmatmul.f32.gmra.mxu3 %v3028_v48 }
 0x1cb   :  { %575 = vmatmul.f32.gmra.mxu0 %v3028_v48  ;;  %630 = vmatmul.f32.gmra.mxu1 %v3046_v60 }
 0x1cd   :  { %709 = vmatmul.f32.gmra.mxu2 %v3073_v15  ;;  %v3154_v15 = vpop.f32.mrf.mxu1  ;;  %v3156_v43 = vpop.f32.mrf.mxu3 }
 0x1cf   :  { %772 = vmatmul.f32.gmra.mxu3 %v3046_v60 }
 0x1d3   :  { %579 = vmatmul.f32.gmra.mxu0 %v3046_v60  ;;  %634 = vmatmul.f32.gmra.mxu1 %v3083_v54 }
 0x1d5   :  { %717 = vmatmul.f32.gmra.mxu2 %v340_v61 }
 0x1d7   :  { %776 = vmatmul.f32.gmra.mxu3 %v3083_v54 }
 0x1db   :  { %583 = vmatmul.f32.gmra.mxu0 %v3083_v54  ;;  %862 = vmatmul.f32.vlgmr.msra.gmra.mxu1 %v2928_v37  ;;  %v3152_v37 = vpop.f32.mrf.mxu2 }
 0x1dd   :  { %931 = vmatmul.f32.vlgmr.msra.gmra.mxu2 %v2915_v21 }
 0x1df   :  { %982 = vmatmul.f32.vlgmr.msra.gmra.mxu3 %v2915_v21  ;;  %v3162_v21 = vpop.f32.mrf.mxu0 }
 0x1e0   :  { %v386_v33 = vadd.f32 %v3154_v15, %v3162_v21 }
 0x1e3   :  { %802 = vmatmul.f32.vlgmr.msra.gmra.mxu0 %v2923_v32  ;;  %868 = vmatmul.f32.gmra.mxu1 %v2960_v4  ;;  %v3164_v32 = vpop.f32.mrf.mxu2  ;;  %v3170_v4 = vpop.f32.mrf.mxu3 }
 0x1e5   :  { %935 = vmatmul.f32.gmra.mxu2 %v2937_v50 }
 0x1e7   :  { %986 = vmatmul.f32.gmra.mxu3 %v2937_v50  ;;  %v3168_v50 = vpop.f32.mrf.mxu1 }
 0x1eb   :  { %807 = vmatmul.f32.gmra.mxu0 %v2952_v59  ;;  %874 = vmatmul.f32.gmra.mxu1 %v2980_v17  ;;  %v3174_v59 = vpop.f32.mrf.mxu0  ;;  %v3183_v17 = vpop.f32.mrf.mxu3 }
 0x1ec   :  { %v390_v9 = vadd.f32 %v3168_v50, %v3174_v59 }
 0x1ed   :  { %939 = vmatmul.f32.gmra.mxu2 %v2946_v55 }
 0x1ef   :  { %990 = vmatmul.f32.gmra.mxu3 %v2946_v55  ;;  %v3178_v55 = vpop.f32.mrf.mxu2 }
 0x1f0   :  { %v448_v21 = vadd.f32 %v3178_v55, %v390_v9 }
 0x1f3   :  { %812 = vmatmul.f32.gmra.mxu0 %v2967_v44  ;;  %880 = vmatmul.f32.gmra.mxu1 %v3011_v31  ;;  %v3181_v44 = vpop.f32.mrf.mxu1 }
 0x1f5   :  { %943 = vmatmul.f32.gmra.mxu2 %v2977_v16 }
 0x1f7   :  { %994 = vmatmul.f32.gmra.mxu3 %v2977_v16  ;;  %v3188_v16 = vpop.f32.mrf.mxu0 }
 0x1fb   :  { %817 = vmatmul.f32.gmra.mxu0 %v2995_v24  ;;  %886 = vmatmul.f32.gmra.mxu1 %v3033_v51  ;;  %v3191_v24 = vpop.f32.mrf.mxu2  ;;  %v3194_v31 = vpop.f32.mrf.mxu1 }
 0x1fc   :  { %v3196_v51 = vpop.f32.mrf.mxu3 }
 0x1fd   :  { %947 = vmatmul.f32.gmra.mxu2 %v3006_v29 }
 0x1ff   :  { %998 = vmatmul.f32.gmra.mxu3 %v3006_v29  ;;  %v3201_v29 = vpop.f32.mrf.mxu0 }
 0x203   :  { %822 = vmatmul.f32.gmra.mxu0 %v3023_v42  ;;  %892 = vmatmul.f32.gmra.mxu1 %v3051_v3  ;;  %v3204_v42 = vpop.f32.mrf.mxu2 }
 0x204   :  { %v3208_v18 = vpop.f32.mrf.mxu3 }
 0x205   :  { %951 = vmatmul.f32.gmra.mxu2 %v3028_v48 }
 0x207   :  { %1002 = vmatmul.f32.gmra.mxu3 %v3028_v48  ;;  %v374_v48 = vadd.f32 %v3121_v57, %v3125_v38 }
 0x209   :  { %v428_v22 = vadd.f32 %v3129_v30, %v374_v48 }
 0x20b   :  { %827 = vmatmul.f32.gmra.mxu0 %v3042_v58  ;;  %898 = vmatmul.f32.gmra.mxu1 %v3065_v13 }
 0x20d   :  { %955 = vmatmul.f32.gmra.mxu2 %v3046_v60 }
 0x20f   :  { %1006 = vmatmul.f32.gmra.mxu3 %v3046_v60 }
 0x210   :  { %v3206_v3 = vpop.f32.mrf.mxu1 }
 0x213   :  { %832 = vmatmul.f32.gmra.mxu0 %v3059_v10  ;;  %904 = vmatmul.f32.gmra.mxu1 %v3091_v53  ;;  %v488_v10 = vadd.f32 %v3133_v56, %v428_v22  ;;  %v443_v56 = vadd.f32 %v3164_v32, %v386_v33  ;;  %v512_v32 = vadd.f32 %v3183_v17, %v448_v21 }
 0x215   :  { %959 = vmatmul.f32.gmra.mxu2 %v3083_v54  ;;  %v506_v63 = vadd.f32 %v3170_v4, %v443_v56 }
 0x217   :  { %1010 = vmatmul.f32.gmra.mxu3 %v3083_v54  ;;  %v438_v54 = vadd.f32 %v3152_v37, %v382_v41 }
 0x218   :  { %v3216_v58 = vpop.f32.mrf.mxu0  ;;  %v3218_v60 = vpop.f32.mrf.mxu2 }
 0x219   :  { %v607_v13 = vpop.f32.mrf.mxu1  ;;  %v500_v53 = vadd.f32 %v3156_v43, %v438_v54  ;;  %v402_v41 = vadd.f32 %v3206_v3, %v3216_v58 }
 0x21a   :  { %v3220_v19 = vpop.f32.mrf.mxu3 }
 0x21b   :  { %837 = vmatmul.f32.gmra.mxu0 %v3087_v35 }
 0x220   :  { %v556_v5 = vpop.f32.mrf.mxu0  ;;  %v3226_v26 = vpop.f32.mrf.mxu2 }
 0x221   :  { %v557_v27 = vadd.f32 %v556_v5, %v488_v10  ;;  %v611_v25 = vpop.f32.mrf.mxu1 }
 0x222   :  { %v3228_v28 = vpop.f32.mrf.mxu3 }
 0x223   :  { %v608_v34 = vadd.f32 %v607_v13, %v557_v27  ;;  %v394_v13 = vadd.f32 %v3181_v44, %v3188_v16  ;;  %v398_v27 = vadd.f32 %v3194_v31, %v3201_v29  ;;  %v750_v58 = vadd.f32 %v3228_v28, %v3226_v26 }
 0x225   :  { %1014 = vst [vmem:[#allocation2] sm:$0xff] %v608_v34  ;;  %v453_v23 = vadd.f32 %v3191_v24, %v394_v13  ;;  %v458_v34 = vadd.f32 %v3204_v42, %v398_v27 }
 0x227   :  { %v518_v55 = vadd.f32 %v3196_v51, %v453_v23  ;;  %v524_v24 = vadd.f32 %v3208_v18, %v458_v34 }
 0x228   :  { %v560_v46 = vpop.f32.mrf.mxu0  ;;  %v3234_v20 = vpop.f32.mrf.mxu2 }
 0x229   :  { %v561_v47 = vadd.f32 %v560_v46, %v494_v36  ;;  %v615_v45 = vpop.f32.mrf.mxu1 }
 0x22a   :  { %v3236_v52 = vpop.f32.mrf.mxu3 }
 0x22b   :  { %v612_v35 = vadd.f32 %v611_v25, %v561_v47 }
 0x22d   :  { %1016 = vst [vmem:[#allocation2 + $0x10] sm:$0xff] %v612_v35 }
 0x230   :  { %v564_v61 = vpop.f32.mrf.mxu0  ;;  %v3242_v57 = vpop.f32.mrf.mxu2 }
 0x231   :  { %v565_v38 = vadd.f32 %v564_v61, %v500_v53  ;;  %v619_v30 = vpop.f32.mrf.mxu1 }
 0x232   :  { %v3244_v49 = vpop.f32.mrf.mxu3 }
 0x233   :  { %v616_v62 = vadd.f32 %v615_v45, %v565_v38  ;;  %v463_v45 = vadd.f32 %v3218_v60, %v402_v41  ;;  %v758_v26 = vadd.f32 %v3244_v49, %v3242_v57 }
 0x235   :  { %1018 = vst [vmem:[#allocation2 + $0x20] sm:$0xff] %v616_v62  ;;  %v530_v42 = vadd.f32 %v3220_v19, %v463_v45  ;;  %v754_v19 = vadd.f32 %v3236_v52, %v3234_v20 }
 0x238   :  { %v568_v11 = vpop.f32.mrf.mxu0  ;;  %v3250_v14 = vpop.f32.mrf.mxu2 }
 0x239   :  { %v569_v37 = vadd.f32 %v568_v11, %v506_v63  ;;  %v623_v15 = vpop.f32.mrf.mxu1 }
 0x23a   :  { %v3252_v43 = vpop.f32.mrf.mxu3 }
 0x23b   :  { %v620_v48 = vadd.f32 %v619_v30, %v569_v37  ;;  %v762_v27 = vadd.f32 %v3252_v43, %v3250_v14  ;;  %v3297_v14 = vld [vmem:[%s4399_s2] sm:$0x1]  ;;  %v3302_v43 = vld [vmem:[%s4399_s2 + $0x1] sm:$0x1]  ;;  %s3310_s2 = smov 0  }
 0x23d   :  { %1020 = vst [vmem:[#allocation2 + $0x30] sm:$0xff] %v620_v48 }
 0x240   :  { %v572_v4 = vpop.f32.mrf.mxu0  ;;  %v3258_v22 = vpop.f32.mrf.mxu2 }
 0x241   :  { %v573_v50 = vadd.f32 %v572_v4, %v512_v32  ;;  %v627_v59 = vpop.f32.mrf.mxu1 }
 0x242   :  { %v3260_v10 = vpop.f32.mrf.mxu3 }
 0x243   :  { %v624_v5 = vadd.f32 %v623_v15, %v573_v50  ;;  %v766_v41 = vadd.f32 %v3260_v10, %v3258_v22 }
 0x245   :  { %1022 = vst [vmem:[#allocation2 + $0x40] sm:$0xff] %v624_v5 }
 0x248   :  { %v576_v17 = vpop.f32.mrf.mxu0  ;;  %v3266_v25 = vpop.f32.mrf.mxu2 }
 0x249   :  { %v577_v44 = vadd.f32 %v576_v17, %v518_v55  ;;  %v631_v16 = vpop.f32.mrf.mxu1 }
 0x24a   :  { %v3268_v39 = vpop.f32.mrf.mxu3 }
 0x24b   :  { %v628_v36 = vadd.f32 %v627_v59, %v577_v44  ;;  %v770_v22 = vadd.f32 %v3268_v39, %v3266_v25 }
 0x24d   :  { %1024 = vst [vmem:[#allocation2 + $0x50] sm:$0xff] %v628_v36 }
 0x250   :  { %v580_v51 = vpop.f32.mrf.mxu0  ;;  %v3274_v46 = vpop.f32.mrf.mxu2 }
 0x251   :  { %v581_v31 = vadd.f32 %v580_v51, %v524_v24  ;;  %v635_v29 = vpop.f32.mrf.mxu1 }
 0x252   :  { %v3276_v47 = vpop.f32.mrf.mxu3 }
 0x253   :  { %v632_v54 = vadd.f32 %v631_v16, %v581_v31 }
 0x255   :  { %1026 = vst [vmem:[#allocation2 + $0x60] sm:$0xff] %v632_v54 }
 0x258   :  { %v584_v35 = vpop.f32.mrf.mxu0  ;;  %v3280_v53 = vpop.f32.mrf.mxu2 }
 0x259   :  { %v585_v18 = vadd.f32 %v584_v35, %v530_v42  ;;  %v863_v33 = vpop.f32.mrf.mxu1 }
 0x25a   :  { %v3282_v61 = vpop.f32.mrf.mxu3 }
 0x25b   :  { %v636_v3 = vadd.f32 %v635_v29, %v585_v18  ;;  %v778_v39 = vadd.f32 %v3282_v61, %v3280_v53 }
 0x25d   :  { %1028 = vst [vmem:[#allocation2 + $0x70] sm:$0xff] %v636_v3 }
 0x260   :  { %v803_v38 = vpop.f32.mrf.mxu0  ;;  %v932_v30 = vpop.f32.mrf.mxu2 }
 0x261   :  { %v804_v56 = vadd.f32 %v803_v38, %v750_v58  ;;  %v869_v60 = vpop.f32.mrf.mxu1 }
 0x262   :  { %v983_v62 = vpop.f32.mrf.mxu3 }
 0x263   :  { %v864_v63 = vadd.f32 %v863_v33, %v804_v56 }
 0x265   :  { %v933_v9 = vadd.f32 %v932_v30, %v864_v63 }
 0x267   :  { %v984_v11 = vadd.f32 %v983_v62, %v933_v9 }
 0x268   :  { %v808_v37 = vpop.f32.mrf.mxu0  ;;  %v936_v15 = vpop.f32.mrf.mxu2 }
 0x269   :  { %1015 = vst [vmem:[#allocation2 + $0x8] sm:$0xff] %v984_v11  ;;  %v809_v21 = vadd.f32 %v808_v37, %v754_v19  ;;  %v875_v48 = vpop.f32.mrf.mxu1 }
 0x26a   :  { %v987_v32 = vpop.f32.mrf.mxu3 }
 0x26b   :  { %v870_v13 = vadd.f32 %v869_v60, %v809_v21  ;;  %v774_v60 = vadd.f32 %v3276_v47, %v3274_v46 }
 0x26d   :  { %v937_v4 = vadd.f32 %v936_v15, %v870_v13 }
 0x26f   :  { %v988_v28 = vadd.f32 %v987_v32, %v937_v4 }
 0x270   :  { %v813_v50 = vpop.f32.mrf.mxu0  ;;  %v940_v59 = vpop.f32.mrf.mxu2 }
 0x271   :  { %1017 = vst [vmem:[#allocation2 + $0x18] sm:$0xff] %v988_v28  ;;  %v814_v23 = vadd.f32 %v813_v50, %v758_v26  ;;  %v881_v5 = vpop.f32.mrf.mxu1  ;;  %v2716_v50 = vmov 0.0  }
 0x272   :  { %v991_v55 = vpop.f32.mrf.mxu3 }
 0x273   :  { %v876_v20 = vadd.f32 %v875_v48, %v814_v23 }
 0x275   :  { %v941_v52 = vadd.f32 %v940_v59, %v876_v20 }
 0x277   :  { %v992_v17 = vadd.f32 %v991_v55, %v941_v52 }
 0x278   :  { %v818_v44 = vpop.f32.mrf.mxu0  ;;  %v944_v16 = vpop.f32.mrf.mxu2 }
 0x279   :  { %1019 = vst [vmem:[#allocation2 + $0x28] sm:$0xff] %v992_v17  ;;  %v819_v34 = vadd.f32 %v818_v44, %v762_v27  ;;  %v887_v57 = vpop.f32.mrf.mxu1 }
 0x27a   :  { %v995_v36 = vpop.f32.mrf.mxu3 }
 0x27b   :  { %v882_v24 = vadd.f32 %v881_v5, %v819_v34 }
 0x27d   :  { %v945_v49 = vadd.f32 %v944_v16, %v882_v24 }
 0x27f   :  { %v996_v51 = vadd.f32 %v995_v36, %v945_v49 }
 0x280   :  { %v823_v31 = vpop.f32.mrf.mxu0  ;;  %v948_v29 = vpop.f32.mrf.mxu2 }
 0x281   :  { %1021 = vst [vmem:[#allocation2 + $0x38] sm:$0xff] %v996_v51  ;;  %v824_v45 = vadd.f32 %v823_v31, %v766_v41  ;;  %v893_v18 = vpop.f32.mrf.mxu1 }
 0x282   :  { %v999_v54 = vpop.f32.mrf.mxu3 }
 0x283   :  { %v888_v42 = vadd.f32 %v887_v57, %v824_v45 }
 0x285   :  { %v949_v35 = vadd.f32 %v948_v29, %v888_v42 }
 0x287   :  { %v1000_v10 = vadd.f32 %v999_v54, %v949_v35 }
 0x288   :  { %v828_v33 = vpop.f32.mrf.mxu0  ;;  %v952_v3 = vpop.f32.mrf.mxu2 }
 0x289   :  { %1023 = vst [vmem:[#allocation2 + $0x48] sm:$0xff] %v1000_v10  ;;  %v829_v58 = vadd.f32 %v828_v33, %v770_v22  ;;  %v899_v63 = vpop.f32.mrf.mxu1 }
 0x28a   :  { %v1003_v38 = vpop.f32.mrf.mxu3 }
 0x28b   :  { %v894_v30 = vadd.f32 %v893_v18, %v829_v58 }
 0x28d   :  { %v953_v56 = vadd.f32 %v952_v3, %v894_v30 }
 0x28f   :  { %v1004_v62 = vadd.f32 %v1003_v38, %v953_v56 }
 0x290   :  { %v833_v9 = vpop.f32.mrf.mxu0  ;;  %v956_v11 = vpop.f32.mrf.mxu2 }
 0x291   :  { %1025 = vst [vmem:[#allocation2 + $0x58] sm:$0xff] %v1004_v62  ;;  %v834_v19 = vadd.f32 %v833_v9, %v774_v60  ;;  %v905_v13 = vpop.f32.mrf.mxu1 }
 0x292   :  { %v1007_v15 = vpop.f32.mrf.mxu3 }
 0x293   :  { %v900_v37 = vadd.f32 %v899_v63, %v834_v19 }
 0x295   :  { %v957_v25 = vadd.f32 %v956_v11, %v900_v37 }
 0x297   :  { %v1008_v21 = vadd.f32 %v1007_v15, %v957_v25 }
 0x298   :  { %v838_v48 = vpop.f32.mrf.mxu0  ;;  %v960_v26 = vpop.f32.mrf.mxu2 }
 0x299   :  { %1027 = vst [vmem:[#allocation2 + $0x68] sm:$0xff] %v1008_v21  ;;  %v839_v32 = vadd.f32 %v838_v48, %v778_v39 }
 0x29a   :  { %v1011_v47 = vpop.f32.mrf.mxu3 }
 0x29b   :  { %v906_v4 = vadd.f32 %v905_v13, %v839_v32 }
 0x29d   :  { %v961_v46 = vadd.f32 %v960_v26, %v906_v4 }
 0x29f   :  { %v1012_v28 = vadd.f32 %v1011_v47, %v961_v46 }
 0x2a1   :  { %1029 = vst [vmem:[#allocation2 + $0x78] sm:$0xff] %v1012_v28 }
 0x2a2 LB: > { %s2725_s24 = smov 64   ;;  %s3317_s25 = sshll.u32 %s2722_s2, 5  ;;  %v1052_v53 = vperm.slane %v3297_v14, 0  ;;  %v1058_v61 = vperm.slane %v3302_v43, 0  ;;  %s2722_s2 = sphi %s3310_s2, %s1043_s2   ;;  %v2718_v50 = vphi %v2716_v50, %v1109_v50  }
 0x2a3   : > { %1055 = vrot.lane.b32.xlu0 %v2718_v50, %s2725_s24  ;;  %s1046_s26 = sshra.s32 %s3317_s25, 3  ;;  %s1063_s29 = sadd.s32 8, %s3317_s25 }
 0x2a4   : > { %s2633_s27 = sshll.u32 %s1046_s26, 4  ;;  %v1053_v59 = vmul.f32 %v2718_v50, %v1052_v53  ;;  %s1064_s30 = sshra.s32 %s1063_s29, 3 }
 0x2a5   : > { %s1050_s28 = scalar_lea.vmem [#allocation2], %s2633_s27  ;;  %s2634_s7 = sshll.u32 %s1064_s30, 4 }
 0x2a6   : > { %s1068_s8 = scalar_lea.vmem [#allocation2], %s2634_s7  ;;  %s1079_s9 = sadd.s32 16, %s3317_s25 }
 0x2a7   : > { %s1080_s10 = sshra.s32 %s1079_s9, 3  ;;  %s1095_s0 = sadd.s32 24, %s3317_s25 }
 0x2a8   : > { %v1051_v55 = vld [vmem:[%s1050_s28] sm:$0xff]  ;;  %s2635_s11 = sshll.u32 %s1080_s10, 4  ;;  %s1096_s13 = sshra.s32 %s1095_s0, 3 }
 0x2a9   : > { %s1084_s12 = scalar_lea.vmem [#allocation2], %s2635_s11  ;;  %s2636_s14 = sshll.u32 %s1096_s13, 4 }
 0x2aa   : > { %s1100_s15 = scalar_lea.vmem [#allocation2], %s2636_s14  ;;  %s1043_s2 = sadd.s32 1, %s2722_s2  }
 0x2ab   : > { %p1040_p0 = scmp.ge.s32.totalorder %s1043_s2, 2  }
 0x2ac   :  { %v1135_v18 = vld [vmem:[%s4395_s4 + $0x78] sm:$0xff] (%p1040_p0)  ;;  %v1134_v22 = vld [vmem:[%s4395_s4 + $0x70] sm:$0xff] (%p1040_p0)  ;;  %v1133_v10 = vld [vmem:[%s4395_s4 + $0x68] sm:$0xff] (%p1040_p0) }
 0x2ad   :  { %v3340_v33 = vand.u32 (%p1040_p0), 4294901760, %v1135_v18  ;;  %v3342_v3 = vand.u32 (%p1040_p0), 4294901760, %v1134_v22  ;;  %v3344_v58 = vand.u32 (%p1040_p0), 4294901760, %v1133_v10  ;;  %v1132_v14 = vld [vmem:[%s4395_s4 + $0x60] sm:$0xff] (%p1040_p0)  ;;  %v1131_v43 = vld [vmem:[%s4395_s4 + $0x58] sm:$0xff] (%p1040_p0)  ;;  %v1130_v38 = vld [vmem:[%s4395_s4 + $0x50] sm:$0xff] (%p1040_p0) }
 0x2ae   :  { %v3355_v30 = vand.u32 (%p1040_p0), 4294901760, %v1132_v14  ;;  %v3357_v56 = vand.u32 (%p1040_p0), 4294901760, %v1131_v43  ;;  %v3359_v60 = vand.u32 (%p1040_p0), 4294901760, %v1130_v38  ;;  %v1129_v62 = vld [vmem:[%s4395_s4 + $0x48] sm:$0xff] (%p1040_p0)  ;;  %v1128_v63 = vld [vmem:[%s4395_s4 + $0x40] sm:$0xff] (%p1040_p0)  ;;  %v1127_v15 = vld [vmem:[%s4395_s4 + $0x38] sm:$0xff] (%p1040_p0) }
 0x2af   :  { %1145 = vmatpush.msrb.mxu0 (%p1040_p0), %v3340_v33  ;;  %v3369_v9 = vsub.f32 (%p1040_p0), %v1135_v18, %v3340_v33  ;;  %v3372_v19 = vsub.f32 (%p1040_p0), %v1134_v22, %v3342_v3  ;;  %1460 = vmatpush.msrb.mxu3 (%p1040_p0), %v3340_v33  ;;  %v3376_v11 = vsub.f32 (%p1040_p0), %v1133_v10, %v3344_v58  ;;  %v3378_v37 = vand.u32 (%p1040_p0), 4294901760, %v1129_v62  ;;  %v1126_v28 = vld [vmem:[%s4395_s4 + $0x30] sm:$0xff] (%p1040_p0) }
 0x2b0   :  { %v3384_v25 = vsub.f32 (%p1040_p0), %v1132_v14, %v3355_v30  ;;  %v3387_v39 = vsub.f32 (%p1040_p0), %v1131_v43, %v3357_v56  ;;  %v3389_v21 = vand.u32 (%p1040_p0), 4294901760, %v1128_v63  ;;  %v3392_v48 = vsub.f32 (%p1040_p0), %v1130_v38, %v3359_v60 }
 0x2b1   :  { %1147 = vmatpush.msrb.mxu0 (%p1040_p0), %v3342_v3  ;;  %1372 = vmatpush.msrb.mxu2 (%p1040_p0), %v3369_v9  ;;  %v1243_v32 = vand.u32 (%p1040_p0), 4294901760, %v3369_v9  ;;  %v1249_v13 = vand.u32 (%p1040_p0), 4294901760, %v3372_v19  ;;  %v1255_v4 = vand.u32 (%p1040_p0), 4294901760, %v3376_v11  ;;  %v3401_v46 = vand.u32 (%p1040_p0), 4294901760, %v1127_v15 }
 0x2b2   :  { %1462 = vmatpush.msrb.mxu3 (%p1040_p0), %v3342_v3  ;;  %v1261_v26 = vand.u32 (%p1040_p0), 4294901760, %v3384_v25  ;;  %v3404_v47 = vsub.f32 (%p1040_p0), %v1129_v62, %v3378_v37  ;;  %v1121_v62 = vld [vmem:[%s4395_s4 + $0x8] sm:$0xff] (%p1040_p0) }
 0x2b3   :  { %1149 = vmatpush.msrb.mxu0 (%p1040_p0), %v3344_v58  ;;  %1375 = vmatpush.msrb.mxu2 (%p1040_p0), %v3372_v19 }
 0x2b4   :  { %1464 = vmatpush.msrb.mxu3 (%p1040_p0), %v3344_v58 }
 0x2b5   :  { %1151 = vmatpush.msrb.mxu0 (%p1040_p0), %v3355_v30  ;;  %1378 = vmatpush.msrb.mxu2 (%p1040_p0), %v3376_v11 }
 0x2b6   :  { %1466 = vmatpush.msrb.mxu3 (%p1040_p0), %v3355_v30 }
 0x2b7   :  { %1153 = vmatpush.msrb.mxu0 (%p1040_p0), %v3357_v56  ;;  %1381 = vmatpush.msrb.mxu2 (%p1040_p0), %v3384_v25 }
 0x2b8   :  { %1468 = vmatpush.msrb.mxu3 (%p1040_p0), %v3357_v56 }
 0x2b9   :  { %1155 = vmatpush.msrb.mxu0 (%p1040_p0), %v3359_v60  ;;  %1384 = vmatpush.msrb.mxu2 (%p1040_p0), %v3387_v39 }
 0x2ba   :  { %1470 = vmatpush.msrb.mxu3 (%p1040_p0), %v3359_v60 }
 0x2bb   :  { %1157 = vmatpush.msrb.mxu0 (%p1040_p0), %v3378_v37  ;;  %1387 = vmatpush.msrb.mxu2 (%p1040_p0), %v3392_v48 }
 0x2bc   :  { %1472 = vmatpush.msrb.mxu3 (%p1040_p0), %v3378_v37 }
 0x2bd   :  { %1159 = vmatpush.msrb.mxu0 (%p1040_p0), %v3389_v21  ;;  %1390 = vmatpush.msrb.mxu2 (%p1040_p0), %v3404_v47 }
 0x2be   :  { %1474 = vmatpush.msrb.mxu3 (%p1040_p0), %v3389_v21 }
 0x2bf   :  { %1161 = vmatpush.msrb.mxu0 (%p1040_p0), %v3401_v46 }
 0x2c0   :  { %1476 = vmatpush.msrb.mxu3 (%p1040_p0), %v3401_v46 }
 0x315   : > { %v1056_v23 = vpop.permute.xlu0 %1055 }
 0x316   : > { %v1059_v5 = vmul.f32 %v1058_v61, %v1056_v23  ;;  %v4407_v23 = vand.u32 (%p1040_p0), 4294901760, %v3392_v48 }
 0x318   : > { %v1060_v20 = vadd.f32 %v1059_v5, %v1053_v59  ;;  %v4408_v59 = vand.u32 (%p1040_p0), 4294901760, %v3387_v39  ;;  %v3424_v5 = vsub.f32 (%p1040_p0), %v1128_v63, %v3389_v21 }
 0x31a   : > { %v1061_v52 = vadd.f32 %v1060_v20, %v1051_v55  ;;  %v1125_v55 = vld [vmem:[%s4395_s4 + $0x28] sm:$0xff] (%p1040_p0)  ;;  %1393 = vmatpush.msrb.mxu2 (%p1040_p0), %v3424_v5 }
 0x31c   : > { %1072 = vrot.lane.b32.xlu0 %v1061_v52, %s2725_s24  ;;  %1062 = vst [vmem:[%s1050_s28] sm:$0xff] %v1061_v52  ;;  %v1070_v17 = vmul.f32 %v1061_v52, %v1052_v53 }
 0x323   : > { %v1069_v34 = vld [vmem:[%s1068_s8] sm:$0xff] }
 0x38e   : > { %v1073_v27 = vpop.permute.xlu0 %1072 }
 0x38f   : > { %v1075_v44 = vmul.f32 %v1073_v27, %v1058_v61  ;;  %v1262_v27 = vsub.f32 (%p1040_p0), %v3384_v25, %v1261_v26 }
 0x391   : > { %v1076_v16 = vadd.f32 %v1075_v44, %v1070_v17  ;;  %v3434_v17 = vand.u32 (%p1040_p0), 4294901760, %v1126_v28  ;;  %v4405_v44 = vand.u32 (%p1040_p0), 4294901760, %v3404_v47 }
 0x393   : > { %v1077_v36 = vadd.f32 %v1076_v16, %v1069_v34  ;;  %v3439_v16 = vsub.f32 (%p1040_p0), %v1127_v15, %v3401_v46  ;;  %v1124_v34 = vld [vmem:[%s4395_s4 + $0x20] sm:$0xff] (%p1040_p0)  ;;  %1163 = vmatpush.msrb.mxu0 (%p1040_p0), %v3434_v17  ;;  %1478 = vmatpush.msrb.mxu3 (%p1040_p0), %v3434_v17 }
 0x395   : > { %1088 = vrot.lane.b32.xlu1 %v1077_v36, %s2725_s24  ;;  %1078 = vst [vmem:[%s1068_s8] sm:$0xff] %v1077_v36  ;;  %v1086_v57 = vmul.f32 %v1077_v36, %v1052_v53  ;;  %1396 = vmatpush.msrb.mxu2 (%p1040_p0), %v3439_v16 }
 0x39c   : > { %v1085_v51 = vld [vmem:[%s1084_s12] sm:$0xff] }
 0x407   : > { %v1089_v24 = vpop.permute.xlu1 %1088 }
 0x408   : > { %v1091_v49 = vmul.f32 %v1089_v24, %v1058_v61  ;;  %v1268_v24 = vsub.f32 (%p1040_p0), %v3387_v39, %v4408_v59 }
 0x40a   : > { %v1092_v41 = vadd.f32 %v1091_v49, %v1086_v57  ;;  %v3448_v57 = vand.u32 (%p1040_p0), 4294901760, %v1125_v55  ;;  %v1274_v49 = vsub.f32 (%p1040_p0), %v3392_v48, %v4407_v23  ;;  %v1269_v22 = vand.u32 (%p1040_p0), 4294901760, %v1268_v24 }
 0x40c   : > { %v1093_v31 = vadd.f32 %v1092_v41, %v1085_v51  ;;  %v4403_v41 = vand.u32 (%p1040_p0), 4294901760, %v3424_v5  ;;  %v1123_v51 = vld [vmem:[%s4395_s4 + $0x18] sm:$0xff] (%p1040_p0)  ;;  %v3478_v14 = vsub.f32 (%p1040_p0), %v1125_v55, %v3448_v57  ;;  %v1275_v43 = vand.u32 (%p1040_p0), 4294901760, %v1274_v49  ;;  %v1120_v55 = vld [vmem:[%s4395_s4] sm:$0xff] (%p1040_p0)  ;;  %1165 = vmatpush.msrb.mxu0 (%p1040_p0), %v3448_v57  ;;  %1480 = vmatpush.msrb.mxu3 (%p1040_p0), %v3448_v57 }
 0x40d   :  { %v3475_v10 = vand.u32 (%p1040_p0), 4294901760, %v1123_v51 }
 0x40e   : > { %1104 = vrot.lane.b32.xlu1 %v1093_v31, %s2725_s24  ;;  %1094 = vst [vmem:[%s1084_s12] sm:$0xff] %v1093_v31  ;;  %v1102_v45 = vmul.f32 %v1093_v31, %v1052_v53  ;;  %v1250_v53 = vsub.f32 (%p1040_p0), %v3372_v19, %v1249_v13  ;;  %v1263_v31 = vand.u32 (%p1040_p0), 4294901760, %v1262_v27  ;;  %v1286_v38 = vsub.f32 (%p1040_p0), %v3424_v5, %v4403_v41 }
 0x40f   :  { %v3510_v27 = vsub.f32 (%p1040_p0), %v1123_v51, %v3475_v10 }
 0x410   :  { %v1251_v52 = vand.u32 (%p1040_p0), 4294901760, %v1250_v53  ;;  %v1287_v24 = vand.u32 (%p1040_p0), 4294901760, %v1286_v38 }
 0x415   : > { %v1101_v35 = vld [vmem:[%s1100_s15] sm:$0xff] }
 0x480   : > { %v1105_v29 = vpop.permute.xlu1 %1104 }
 0x481   : > { %v1107_v54 = vmul.f32 %v1105_v29, %v1058_v61  ;;  %v1256_v61 = vsub.f32 (%p1040_p0), %v3376_v11, %v1255_v4  ;;  %v3460_v29 = vand.u32 (%p1040_p0), 4294901760, %v1124_v34  ;;  %v4462_v11 = vand.u32 (%p1040_p0), 4294901760, %v3392_v48 }
 0x482   :  { %v4465_v48 = vand.u32 (%p1040_p0), 4294901760, %v3439_v16 }
 0x483   : > { %v1108_v42 = vadd.f32 %v1107_v54, %v1102_v45  ;;  %1042 = sbr.rel (!%p1040_p0) target bundleno = 674 (0x2a2), region = 59  ;;  %v1257_v36 = vand.u32 (%p1040_p0), 4294901760, %v1256_v61  ;;  %v3463_v45 = vsub.f32 (%p1040_p0), %v1126_v28, %v3434_v17  ;;  %v1280_v54 = vsub.f32 (%p1040_p0), %v3404_v47, %v4405_v44  ;;  %1167 = vmatpush.msrb.mxu0 (%p1040_p0), %v3460_v29  ;;  %1482 = vmatpush.msrb.mxu3 (%p1040_p0), %v3460_v29 }
 0x484   :  { %v3493_v28 = vsub.f32 (%p1040_p0), %v1124_v34, %v3460_v29 }
 0x485   : > { %v1109_v50 = vadd.f32 %v1108_v42, %v1101_v35   ;;  %v4401_v42 = vand.u32 (%p1040_p0), 4294901760, %v3439_v16  ;;  %v1122_v35 = vld [vmem:[%s4395_s4 + $0x10] sm:$0xff] (%p1040_p0)  ;;  %v4400_v15 = vand.u32 (%p1040_p0), 4294901760, %v3463_v45  ;;  %v1281_v53 = vand.u32 (%p1040_p0), 4294901760, %v1280_v54  ;;  %1399 = vmatpush.msrb.mxu2 (%p1040_p0), %v3463_v45  ;;  %1169 = vmatpush.msrb.mxu0 (%p1040_p0), %v3475_v10 }
 0x486   :  { %v3489_v63 = vand.u32 (%p1040_p0), 4294901760, %v1122_v35  ;;  %v4404_v51 = vand.u32 (%p1040_p0), 4294901760, %v3493_v28  ;;  %1484 = vmatpush.msrb.mxu3 (%p1040_p0), %v3475_v10 }
 0x487   : > { %1110 = vst [vmem:[%s1100_s15] sm:$0xff] %v1109_v50  ;;  %v1244_v50 = vsub.f32 (%p1040_p0), %v3369_v9, %v1243_v32  ;;  %v1292_v61 = vsub.f32 (%p1040_p0), %v3439_v16, %v4401_v42  ;;  %v1298_v49 = vsub.f32 (%p1040_p0), %v3463_v45, %v4400_v15  ;;  %v4406_v15 = vand.u32 (%p1040_p0), 4294901760, %v3510_v27  ;;  %1402 = vmatpush.msrb.mxu2 (%p1040_p0), %v3478_v14 }
 0x488   :  { %v3525_v54 = vsub.f32 %v1122_v35, %v3489_v63  ;;  %1171 = vmatpush.msrb.mxu0 %v3489_v63  ;;  %1486 = vmatpush.msrb.mxu3 %v3489_v63  ;;  %v4468_v16 = vand.u32 4294901760, %v3493_v28 }
 0x489   :  { %v1245_v20 = vand.u32 4294901760, %v1244_v50  ;;  %v1299_v42 = vand.u32 4294901760, %v1298_v49  ;;  %v1316_v49 = vsub.f32 %v3510_v27, %v4406_v15  ;;  %1405 = vmatpush.msrb.mxu2 %v3493_v28 }
 0x48b   :  { %1246 = vmatpush.msrb.mxu1 %v1245_v20  ;;  %v3506_v20 = vand.u32 4294901760, %v1121_v62  ;;  %1408 = vmatpush.msrb.mxu2 %v3510_v27  ;;  %v1317_v59 = vand.u32 4294901760, %v1316_v49 }
 0x48d   :  { %1252 = vmatpush.msrb.mxu1 %v1251_v52  ;;  %v4402_v52 = vand.u32 4294901760, %v3478_v14  ;;  %v3538_v35 = vsub.f32 %v1121_v62, %v3506_v20  ;;  %1173 = vmatpush.msrb.mxu0 %v3506_v20 }
 0x48e   :  { %v1112_v18 = vld [vmem:[#allocation2] sm:$0xff]  ;;  %1411 = vmatpush.msrb.mxu2 %v3525_v54  ;;  %1488 = vmatpush.msrb.mxu3 %v3506_v20  ;;  %v1117_v25 = vld [vmem:[#allocation2 + $0x50] sm:$0xff] }
 0x48f   :  { %1258 = vmatpush.msrb.mxu1 %v1257_v36  ;;  %v3495_v50 = vand.u32 4294901760, %v1112_v18  ;;  %v1113_v36 = vld [vmem:[#allocation2 + $0x10] sm:$0xff]  ;;  %v1304_v38 = vsub.f32 %v3478_v14, %v4402_v52  ;;  %v1116_v9 = vld [vmem:[#allocation2 + $0x40] sm:$0xff] }
 0x490   :  { %1414 = vmatpush.msrb.mxu2 %v3538_v35 }
 0x491   :  { %1264 = vmatpush.msrb.mxu1 %v1263_v31  ;;  %v3513_v34 = vsub.f32 %v1112_v18, %v3495_v50  ;;  %v3521_v31 = vand.u32 4294901760, %v1120_v55 }
 0x493   :  { %1270 = vmatpush.msrb.mxu1 %v1269_v22  ;;  %v1178_v18 = vand.u32 4294901760, %v3513_v34  ;;  %v3530_v22 = vand.u32 4294901760, %v1113_v36  ;;  %v3548_v52 = vsub.f32 %v1120_v55, %v3521_v31  ;;  %v1114_v55 = vld [vmem:[#allocation2 + $0x20] sm:$0xff]  ;;  %1175 = vmatpush.msrb.mxu0 %v3521_v31 }
 0x494   :  { %v3568_v23 = vand.u32 4294901760, %v1114_v55  ;;  %1490 = vmatpush.msrb.mxu3 %v3521_v31 }
 0x495   :  { %1276 = vmatpush.msrb.mxu1 %v1275_v43  ;;  %v1293_v43 = vand.u32 4294901760, %v1292_v61  ;;  %v4410_v61 = vand.u32 4294901760, %v3525_v54  ;;  %v1179_v62 = vsub.f32 %v3513_v34, %v1178_v18  ;;  %v1185_v41 = vsub.f32 %v1113_v36, %v3530_v22  ;;  %1417 = vmatpush.msrb.mxu2 %v3548_v52 }
 0x496   :  { %v1193_v49 = vsub.f32 %v1114_v55, %v3568_v23  ;;  %1494 = vmatmul.f32.vlgmr.msrb.gmra.mxu3 %v1178_v18  ;;  %1420 = vmatmul.f32.vlgmr.msrb.gmra.mxu2 %v3513_v34  ;;  %v4461_v34 = vand.u32 4294901760, %v3387_v39  ;;  %v4463_v39 = vand.u32 4294901760, %v3404_v47  ;;  %v1118_v47 = vld [vmem:[#allocation2 + $0x60] sm:$0xff]  ;;  %v4471_v55 = vand.u32 4294901760, %v3538_v35 }
 0x497   :  { %1282 = vmatpush.msrb.mxu1 %v1281_v53  ;;  %v1310_v53 = vsub.f32 %v3493_v28, %v4404_v51  ;;  %v4409_v51 = vand.u32 4294901760, %v3538_v35  ;;  %v1322_v36 = vsub.f32 %v3525_v54, %v4410_v61  ;;  %v1186_v15 = vand.u32 4294901760, %v1185_v41  ;;  %v1115_v61 = vld [vmem:[#allocation2 + $0x30] sm:$0xff]  ;;  %1543 = vmatpush.msra.mxu0 %v1243_v32 }
 0x498   :  { %v4470_v28 = vand.u32 4294901760, %v3525_v54 }
 0x499   :  { %1288 = vmatpush.msrb.mxu1 %v1287_v24  ;;  %v1305_v24 = vand.u32 4294901760, %v1304_v38  ;;  %v1311_v44 = vand.u32 4294901760, %v1310_v53  ;;  %v1180_v38 = vand.u32 4294901760, %v1179_v62  ;;  %v1323_v53 = vand.u32 4294901760, %v1322_v36  ;;  %1547 = vmatpush.msra.mxu0 %v1249_v13 }
 0x49a   :  { %v3599_v13 = vand.u32 4294901760, %v1116_v9 }
 0x49b   :  { %1294 = vmatpush.msrb.mxu1 %v1293_v43  ;;  %v4411_v43 = vand.u32 4294901760, %v3548_v52  ;;  %1181 = vmatmul.f32.vlgmr.msrb.gmra.mxu0 %v1180_v38  ;;  %v1194_v38 = vand.u32 4294901760, %v1193_v49 }
 0x49c   :  { %1551 = vmatpush.msra.mxu0 %v1255_v4  ;;  %v3613_v4 = vand.u32 4294901760, %v1117_v25 }
 0x49d   :  { %1300 = vmatpush.msrb.mxu1 %v1299_v42  ;;  %v1328_v42 = vsub.f32 %v3538_v35, %v4409_v51  ;;  %v1334_v62 = vsub.f32 %v3548_v52, %v4411_v43  ;;  %v3587_v43 = vand.u32 4294901760, %v1115_v61 }
 0x49e   :  { %1500 = vmatmul.f32.gmra.mxu3 %v1186_v15  ;;  %1425 = vmatmul.f32.gmra.mxu2 %v1185_v41 }
 0x49f   :  { %1306 = vmatpush.msrb.mxu1 %v1305_v24  ;;  %v1187_v24 = vsub.f32 %v1185_v41, %v1186_v15  ;;  %v1329_v51 = vand.u32 4294901760, %v1328_v42  ;;  %v1201_v18 = vsub.f32 %v1115_v61, %v3587_v43  ;;  %1555 = vmatpush.msra.mxu0 %v1261_v26  ;;  %v4464_v26 = vand.u32 4294901760, %v3424_v5 }
 0x4a0   :  { %v4467_v15 = vand.u32 4294901760, %v3478_v14 }
 0x4a1   :  { %1312 = vmatpush.msrb.mxu1 %v1311_v44  ;;  %v1335_v44 = vand.u32 4294901760, %v1334_v62  ;;  %v1188_v36 = vand.u32 4294901760, %v1187_v24  ;;  %v1202_v19 = vand.u32 4294901760, %v1201_v18  ;;  %1559 = vmatpush.msra.mxu0 %v4461_v34 }
 0x4a3   :  { %1318 = vmatpush.msrb.mxu1 %v1317_v59  ;;  %1189 = vmatmul.f32.gmra.mxu0 %v1188_v36  ;;  %v1195_v59 = vsub.f32 %v1193_v49, %v1194_v38 }
 0x4a4   :  { %1563 = vmatpush.msra.mxu0 %v4462_v11 }
 0x4a5   :  { %1324 = vmatpush.msrb.mxu1 %v1323_v53  ;;  %v1196_v32 = vand.u32 4294901760, %v1195_v59 }
 0x4a6   :  { %1506 = vmatmul.f32.gmra.mxu3 %v1194_v38  ;;  %1430 = vmatmul.f32.gmra.mxu2 %v1193_v49 }
 0x4a7   :  { %1330 = vmatpush.msrb.mxu1 %v1329_v51  ;;  %1567 = vmatpush.msra.mxu0 %v4463_v39 }
 0x4a9   :  { %1336 = vmatpush.msrb.mxu1 %v1335_v44  ;;  %1571 = vmatpush.msra.mxu0 %v4464_v26 }
 0x4aa   :  { %1338 = vmatmul.f32.vlgmr.msrb.gmra.mxu1 %v3495_v50 }
 0x4ab   :  { %1638 = vmatpush.msra.mxu1 %v3340_v33  ;;  %1197 = vmatmul.f32.gmra.mxu0 %v1196_v32  ;;  %v1203_v33 = vsub.f32 %v1201_v18, %v1202_v19 }
 0x4ac   :  { %1575 = vmatpush.msra.mxu0 %v4465_v48 }
 0x4ad   :  { %1640 = vmatpush.msra.mxu1 %v3342_v3  ;;  %v1209_v3 = vsub.f32 %v1116_v9, %v3599_v13 }
 0x4ae   :  { %1512 = vmatmul.f32.gmra.mxu3 %v1202_v19  ;;  %1435 = vmatmul.f32.gmra.mxu2 %v1201_v18 }
 0x4af   :  { %1642 = vmatpush.msra.mxu1 %v3344_v58  ;;  %v1204_v58 = vand.u32 4294901760, %v1203_v33 }
 0x4b1   :  { %1644 = vmatpush.msra.mxu1 %v3355_v30  ;;  %v1210_v30 = vand.u32 4294901760, %v1209_v3 }
 0x4b2   :  { %1342 = vmatmul.f32.gmra.mxu1 %v3530_v22 }
 0x4b3   :  { %1646 = vmatpush.msra.mxu1 %v3357_v56  ;;  %1205 = vmatmul.f32.gmra.mxu0 %v1204_v58  ;;  %v1211_v56 = vsub.f32 %v1209_v3, %v1210_v30 }
 0x4b5   :  { %1648 = vmatpush.msra.mxu1 %v3359_v60  ;;  %v1217_v60 = vsub.f32 %v1117_v25, %v3613_v4  ;;  %v1212_v5 = vand.u32 4294901760, %v1211_v56  ;;  %v2037_v25 = vld [vmem:[%s4396_s5 + $0x78] sm:$0xff] }
 0x4b6   :  { %1518 = vmatmul.f32.gmra.mxu3 %v1210_v30  ;;  %1440 = vmatmul.f32.gmra.mxu2 %v1209_v3  ;;  %v3699_v39 = vand.u32 4294901760, %v2037_v25  ;;  %v2036_v30 = vld [vmem:[%s4396_s5 + $0x70] sm:$0xff] }
 0x4b7   :  { %1650 = vmatpush.msra.mxu1 %v3378_v37  ;;  %v4466_v37 = vand.u32 4294901760, %v3463_v45  ;;  %v1218_v41 = vand.u32 4294901760, %v1217_v60  ;;  %v4469_v45 = vand.u32 4294901760, %v3510_v27  ;;  %v3708_v56 = vand.u32 4294901760, %v2036_v30 }
 0x4b8   :  { %2039 = vmatpush.msra.mxu2 %v3699_v39  ;;  %v3706_v26 = vsub.f32 %v2037_v25, %v3699_v39 }
 0x4b9   :  { %1652 = vmatpush.msra.mxu1 %v3389_v21  ;;  %1579 = vmatpush.msra.mxu0 %v4466_v37  ;;  %v1224_v21 = vand.u32 4294901760, %v1118_v47 }
 0x4ba   :  { %1346 = vmatmul.f32.gmra.mxu1 %v3568_v23  ;;  %v4419_v48 = vand.u32 4294901760, %v3706_v26  ;;  %2041 = vmatpush.msra.mxu2 %v3708_v56 }
 0x4bb   :  { %1654 = vmatpush.msra.mxu1 %v3401_v46  ;;  %1583 = vmatpush.msra.mxu0 %v4467_v15  ;;  %v1219_v46 = vsub.f32 %v1217_v60, %v1218_v41  ;;  %v1225_v51 = vsub.f32 %v1118_v47, %v1224_v21  ;;  %v2035_v47 = vld [vmem:[%s4396_s5 + $0x68] sm:$0xff] }
 0x4bc   :  { %1213 = vmatmul.f32.gmra.mxu0 %v1212_v5  ;;  %v3720_v5 = vsub.f32 %v2036_v30, %v3708_v56  ;;  %v2031_v30 = vld [vmem:[%s4396_s5 + $0x48] sm:$0xff] }
 0x4bd   :  { %1656 = vmatpush.msra.mxu1 %v3434_v17  ;;  %1587 = vmatpush.msra.mxu0 %v4468_v16  ;;  %v1119_v17 = vld [vmem:[#allocation2 + $0x70] sm:$0xff]  ;;  %v1220_v14 = vand.u32 4294901760, %v1219_v46  ;;  %v2138_v46 = vsub.f32 %v3706_v26, %v4419_v48 }
 0x4be   :  { %v1232_v61 = vand.u32 4294901760, %v1119_v17  ;;  %1524 = vmatmul.f32.gmra.mxu3 %v1218_v41  ;;  %1445 = vmatmul.f32.gmra.mxu2 %v1217_v60  ;;  %v1137_v60 = vld [vmem:[#allocation2 + $0x18] sm:$0xff]  ;;  %v3722_v41 = vand.u32 4294901760, %v2035_v47 }
 0x4bf   :  { %1658 = vmatpush.msra.mxu1 %v3448_v57  ;;  %1591 = vmatpush.msra.mxu0 %v4469_v45  ;;  %v1226_v57 = vand.u32 4294901760, %v1225_v51 }
 0x4c0   :  { %v1233_v27 = vsub.f32 %v1119_v17, %v1232_v61  ;;  %v4418_v17 = vand.u32 4294901760, %v3720_v5  ;;  %2043 = vmatpush.msra.mxu2 %v3722_v41 }
 0x4c1   :  { %1660 = vmatpush.msra.mxu1 %v3460_v29  ;;  %1595 = vmatpush.msra.mxu0 %v4470_v28  ;;  %v1227_v29 = vsub.f32 %v1225_v51, %v1226_v57  ;;  %v2033_v28 = vld [vmem:[%s4396_s5 + $0x58] sm:$0xff] }
 0x4c2   :  { %1350 = vmatmul.f32.gmra.mxu1 %v3587_v43  ;;  %v1234_v42 = vand.u32 4294901760, %v1233_v27 }
 0x4c3   :  { %1662 = vmatpush.msra.mxu1 %v3475_v10  ;;  %1599 = vmatpush.msra.mxu0 %v4471_v55  ;;  %v4472_v10 = vand.u32 4294901760, %v3548_v52  ;;  %v1228_v54 = vand.u32 4294901760, %v1227_v29  ;;  %v2144_v55 = vsub.f32 %v3720_v5, %v4418_v17 }
 0x4c4   :  { %1221 = vmatmul.f32.gmra.mxu0 %v1220_v14  ;;  %v3736_v14 = vsub.f32 %v2035_v47, %v3722_v41 }
 0x4c5   :  { %1664 = vmatpush.msra.mxu1 %v3489_v63  ;;  %1603 = vmatpush.msra.mxu0 %v4472_v10  ;;  %v1235_v63 = vsub.f32 %v1233_v27, %v1234_v42 }
 0x4c6   :  { %1530 = vmatmul.f32.gmra.mxu3 %v1226_v57  ;;  %1450 = vmatmul.f32.gmra.mxu2 %v1225_v51  ;;  %v2034_v51 = vld [vmem:[%s4396_s5 + $0x60] sm:$0xff]  ;;  %v2139_v57 = vand.u32 4294901760, %v2138_v46  ;;  %v4416_v29 = vand.u32 4294901760, %v3736_v14  ;;  %v3787_v46 = vand.u32 4294901760, %v2031_v30 }
 0x4c7   :  { %1666 = vmatpush.msra.mxu1 %v3506_v20  ;;  %v1236_v20 = vand.u32 4294901760, %v1235_v63  ;;  %2266 = vmatpush.msrb.mxu0 %v3706_v26  ;;  %v2032_v63 = vld [vmem:[%s4396_s5 + $0x50] sm:$0xff] }
 0x4c8   :  { %2140 = vmatpush.msra.mxu3 %v2139_v57  ;;  %4473 = vst [vmem:[#allocation12_spill] sm:$0xff] %v3787_v46  ;;  %v2030_v57 = vld [vmem:[%s4396_s5 + $0x40] sm:$0xff] }
 0x4c9   :  { %1668 = vmatpush.msra.mxu1 %v3521_v31  ;;  %2269 = vmatpush.msrb.mxu0 %v3720_v5 }
 0x4ca   :  { %1354 = vmatmul.f32.gmra.mxu1 %v3599_v13 }
 0x4cb   :  { %2354 = vmatpush.msrb.mxu1 %v3699_v39  ;;  %2272 = vmatpush.msrb.mxu0 %v3736_v14 }
 0x4cc   :  { %1229 = vmatmul.f32.gmra.mxu0 %v1228_v54 }
 0x4cd   :  { %2356 = vmatpush.msrb.mxu1 %v3708_v56 }
 0x4ce   :  { %1536 = vmatmul.f32.gmra.mxu3 %v1234_v42  ;;  %1455 = vmatmul.f32.gmra.mxu2 %v1233_v27  ;;  %v3749_v27 = vand.u32 4294901760, %v2033_v28 }
 0x4cf   :  { %2358 = vmatpush.msrb.mxu1 %v3722_v41 }
 0x4d2   :  { %1358 = vmatmul.f32.gmra.mxu1 %v3613_v4 }
 0x4d4   :  { %1237 = vmatmul.f32.gmra.mxu0 %v1236_v20  ;;  %v1138_v20 = vld [vmem:[#allocation2 + $0x28] sm:$0xff] }
 0x4da   :  { %1362 = vmatmul.f32.gmra.mxu1 %v1224_v21 }
 0x4dc   :  { %1605 = vmatmul.f32.vlgmr.msra.gmra.mxu0 %v3495_v50 }
 0x4e2   :  { %1366 = vmatmul.f32.gmra.mxu1 %v1232_v61 }
 0x4e4   :  { %1609 = vmatmul.f32.gmra.mxu0 %v3530_v22 }
 0x4ea   :  { %1670 = vmatmul.f32.vlgmr.msra.gmra.mxu1 %v3495_v50 }
 0x4ec   :  { %1613 = vmatmul.f32.gmra.mxu0 %v3568_v23 }
 0x4f2   :  { %1674 = vmatmul.f32.gmra.mxu1 %v3530_v22 }
 0x4f4   :  { %1617 = vmatmul.f32.gmra.mxu0 %v3587_v43 }
 0x4fa   :  { %1678 = vmatmul.f32.gmra.mxu1 %v3568_v23 }
 0x4fc   :  { %1621 = vmatmul.f32.gmra.mxu0 %v3599_v13 }
 0x502   :  { %1682 = vmatmul.f32.gmra.mxu1 %v3587_v43 }
 0x504   :  { %1625 = vmatmul.f32.gmra.mxu0 %v3613_v4 }
 0x50a   :  { %1686 = vmatmul.f32.gmra.mxu1 %v3599_v13  ;;  %v1136_v13 = vld [vmem:[#allocation2 + $0x8] sm:$0xff] }
 0x50c   :  { %1629 = vmatmul.f32.gmra.mxu0 %v1224_v21 }
 0x512   :  { %1690 = vmatmul.f32.gmra.mxu1 %v3613_v4 }
 0x514   :  { %1633 = vmatmul.f32.gmra.mxu0 %v1232_v61 }
 0x518   :  { %v1182_v50 = vpop.f32.mrf.mxu0 }
 0x519   :  { %v1421_v35 = vpop.f32.mrf.mxu2  ;;  %v1495_v62 = vpop.f32.mrf.mxu3  ;;  %v1183_v33 = vadd.f32 %v1182_v50, %v1136_v13  ;;  %v3771_v13 = vand.u32 4294901760, %v2032_v63 }
 0x51a   :  { %1694 = vmatmul.f32.gmra.mxu1 %v1224_v21 }
 0x520   :  { %v1190_v52 = vpop.f32.mrf.mxu0 }
 0x521   :  { %v3672_v44 = vpop.f32.mrf.mxu2  ;;  %v3674_v36 = vpop.f32.mrf.mxu3  ;;  %v1191_v45 = vadd.f32 %v1190_v52, %v1137_v60  ;;  %v2145_v52 = vand.u32 4294901760, %v2144_v55 }
 0x522   :  { %1698 = vmatmul.f32.gmra.mxu1 %v1232_v61  ;;  %v3739_v61 = vand.u32 4294901760, %v2034_v51 }
 0x523   :  { %2146 = vmatpush.msra.mxu3 %v2145_v52 }
 0x524   :  { %2045 = vmatpush.msra.mxu2 %v3739_v61  ;;  %v3756_v42 = vsub.f32 %v2034_v51, %v3739_v61  ;;  %2360 = vmatpush.msrb.mxu1 %v3739_v61 }
 0x526   :  { %2047 = vmatpush.msra.mxu2 %v3749_v27  ;;  %2275 = vmatpush.msrb.mxu0 %v3756_v42 }
 0x527   :  { %v1339_v31 = vpop.f32.mrf.mxu1  ;;  %2362 = vmatpush.msrb.mxu1 %v3749_v27 }
 0x528   :  { %v3660_v22 = vpop.f32.mrf.mxu0  ;;  %v1340_v4 = vadd.f32 %v1339_v31, %v1183_v33  ;;  %v2150_v31 = vsub.f32 %v3736_v14, %v4416_v29  ;;  %2049 = vmatpush.msra.mxu2 %v3771_v13 }
 0x529   :  { %v3680_v18 = vpop.f32.mrf.mxu2  ;;  %v3682_v9 = vpop.f32.mrf.mxu3  ;;  %2364 = vmatpush.msrb.mxu1 %v3771_v13 }
 0x52a   :  { %v1422_v21 = vadd.f32 %v1421_v35, %v1340_v4  ;;  %v3766_v35 = vsub.f32 %v2033_v28, %v3749_v27  ;;  %v1199_v4 = vadd.f32 %v3660_v22, %v1138_v20  ;;  %2051 = vmatpush.msra.mxu2 %v3787_v46  ;;  %v1139_v20 = vld [vmem:[#allocation2 + $0x38] sm:$0xff] }
 0x52b   :  { %2366 = vmatpush.msrb.mxu1 %v3787_v46 }
 0x52c   :  { %v1496_v10 = vadd.f32 %v1495_v62, %v1422_v21  ;;  %v4414_v62 = vand.u32 4294901760, %v3756_v42  ;;  %v4413_v25 = vand.u32 4294901760, %v3766_v35  ;;  %2278 = vmatpush.msrb.mxu0 %v3766_v35 }
 0x52e   :  { %v2156_v21 = vsub.f32 %v3756_v42, %v4414_v62  ;;  %v2162_v22 = vsub.f32 %v3766_v35, %v4413_v25 }
 0x52f   :  { %v3662_v23 = vpop.f32.mrf.mxu1 }
 0x530   :  { %v3664_v53 = vpop.f32.mrf.mxu0  ;;  %v1344_v50 = vadd.f32 %v3662_v23, %v1191_v45  ;;  %v2151_v23 = vand.u32 4294901760, %v2150_v31  ;;  %v2157_v55 = vand.u32 4294901760, %v2156_v21  ;;  %v2163_v52 = vand.u32 4294901760, %v2162_v22 }
 0x531   :  { %v3688_v34 = vpop.f32.mrf.mxu2  ;;  %v3697_v58 = vpop.f32.mrf.mxu3  ;;  %v1207_v22 = vadd.f32 %v3664_v53, %v1139_v20 }
 0x532   :  { %v1427_v51 = vadd.f32 %v3672_v44, %v1344_v50  ;;  %2152 = vmatpush.msra.mxu3 %v2151_v23  ;;  %v3805_v44 = vsub.f32 %v2031_v30, %v3787_v46 }
 0x534   :  { %2158 = vmatpush.msra.mxu3 %v2157_v55  ;;  %v1502_v23 = vadd.f32 %v3674_v36, %v1427_v51 }
 0x536   :  { %2164 = vmatpush.msra.mxu3 %v2163_v52 }
 0x537   :  { %v3666_v43 = vpop.f32.mrf.mxu1 }
 0x538   :  { %v1348_v30 = vadd.f32 %v3666_v43, %v1199_v4  ;;  %v2029_v4 = vld [vmem:[%s4396_s5 + $0x38] sm:$0xff] }
 0x539   :  { %v3668_v24 = vpop.f32.mrf.mxu0  ;;  %v3717_v37 = vpop.f32.mrf.mxu2  ;;  %v3840_v52 = vand.u32 4294901760, %v2029_v4 }
 0x53a   :  { %v3752_v54 = vpop.f32.mrf.mxu3 }
 0x53b   :  { %4475 = vst [vmem:[#allocation14_spill] sm:$0xff] %v3840_v52 }
 0x53f   :  { %v3670_v49 = vpop.f32.mrf.mxu1 }
 0x541   :  { %v3676_v38 = vpop.f32.mrf.mxu0  ;;  %v3800_v28 = vpop.f32.mrf.mxu2 }
 0x542   :  { %v3827_v55 = vpop.f32.mrf.mxu3 }
 0x547   :  { %v3678_v59 = vpop.f32.mrf.mxu1 }
 0x549   :  { %v3684_v32 = vpop.f32.mrf.mxu0 }
 0x54f   :  { %v3686_v19 = vpop.f32.mrf.mxu1 }
 0x551   :  { %v3690_v3 = vpop.f32.mrf.mxu0 }
 0x557   :  { %v3692_v11 = vpop.f32.mrf.mxu1 }
 0x559   :  { %v1606_v16 = vpop.f32.mrf.mxu0 }
 0x55a   :  { %v1607_v33 = vadd.f32 %v1606_v16, %v1496_v10  ;;  %v3785_v16 = vsub.f32 %v2032_v63, %v3771_v13  ;;  %v3807_v63 = vand.u32 4294901760, %v2030_v57 }
 0x55c   :  { %v4412_v10 = vand.u32 4294901760, %v3785_v16  ;;  %4474 = vst [vmem:[#allocation13_spill] sm:$0xff] %v3807_v63  ;;  %2281 = vmatpush.msrb.mxu0 %v3785_v16  ;;  %2053 = vmatpush.msra.mxu2 %v3807_v63  ;;  %v3838_v20 = vsub.f32 %v2030_v57, %v3807_v63 }
 0x55d   :  { %2368 = vmatpush.msrb.mxu1 %v3807_v63 }
 0x55e   :  { %v2168_v31 = vsub.f32 %v3785_v16, %v4412_v10  ;;  %2284 = vmatpush.msrb.mxu0 %v3805_v44  ;;  %v4417_v57 = vand.u32 4294901760, %v3838_v20  ;;  %2055 = vmatpush.msra.mxu2 %v3840_v52 }
 0x55f   :  { %v3725_v15 = vpop.f32.mrf.mxu1  ;;  %2370 = vmatpush.msrb.mxu1 %v3840_v52 }
 0x560   :  { %v2169_v10 = vand.u32 4294901760, %v2168_v31  ;;  %v1432_v31 = vadd.f32 %v3680_v18, %v1348_v30  ;;  %v1142_v30 = vld [vmem:[#allocation2 + $0x68] sm:$0xff]  ;;  %2287 = vmatpush.msrb.mxu0 %v3838_v20 }
 0x561   :  { %v1610_v60 = vpop.f32.mrf.mxu0 }
 0x562   :  { %v1611_v51 = vadd.f32 %v1610_v60, %v1502_v23  ;;  %2170 = vmatpush.msra.mxu3 %v2169_v10  ;;  %v1352_v10 = vadd.f32 %v3670_v49, %v1207_v22  ;;  %v1451_v22 = vpop.f32.mrf.mxu2 }
 0x567   :  { %v1671_v47 = vpop.f32.mrf.mxu1 }
 0x568   :  { %v3791_v45 = vadd.f32 %v1671_v47, %v1607_v33  ;;  %v4415_v33 = vand.u32 4294901760, %v3805_v44  ;;  %v1140_v47 = vld [vmem:[#allocation2 + $0x48] sm:$0xff] }
 0x569   :  { %v1215_v25 = vadd.f32 %v3668_v24, %v1140_v47  ;;  %v1614_v23 = vpop.f32.mrf.mxu0  ;;  %v2028_v24 = vld [vmem:[%s4396_s5 + $0x30] sm:$0xff]  ;;  %v3854_v47 = vsub.f32 %v2029_v4, %v3840_v52 }
 0x56a   :  { %v3811_v50 = vmul.f32 0.70710677, %v3791_v45  ;;  %v2174_v36 = vsub.f32 %v3805_v44, %v4415_v33  ;;  %v1141_v33 = vld [vmem:[#allocation2 + $0x58] sm:$0xff]  ;;  %v3856_v18 = vand.u32 4294901760, %v2028_v24 }
 0x56b   :  { %v1356_v49 = vadd.f32 %v3678_v59, %v1215_v25  ;;  %v4421_v4 = vand.u32 4294901760, %v3854_v47  ;;  %2290 = vmatpush.msrb.mxu0 %v3854_v47  ;;  %v1231_v59 = vadd.f32 %v3684_v32, %v1142_v30  ;;  %v1143_v25 = vld [vmem:[#allocation2 + $0x78] sm:$0xff]  ;;  %v3892_v30 = vpop.f32.mrf.mxu3 }
 0x56c   :  { %v3822_v21 = vand.u32 2147483647, %v3811_v50  ;;  %v2175_v53 = vand.u32 4294901760, %v2174_v36  ;;  %4476 = vst [vmem:[#allocation15_spill] sm:$0xff] %v3856_v18  ;;  %2057 = vmatpush.msra.mxu2 %v3856_v18  ;;  %2372 = vmatpush.msrb.mxu1 %v3856_v18  ;;  %v3886_v17 = vsub.f32 %v2028_v24, %v3856_v18  ;;  %vm1710_vm1 = vcmp.ge.f32.partialorder %v3811_v50, 0.0 }
 0x56d   :  { %v1442_v32 = vadd.f32 %v3717_v37, %v1356_v49  ;;  %v1364_v49 = vadd.f32 %v3692_v11, %v1231_v59 }
 0x56e   :  { %v1734_v43 = vmul.f32 0.3275911, %v3822_v21  ;;  %2176 = vmatpush.msra.mxu3 %v2175_v53  ;;  %v4422_v24 = vand.u32 4294901760, %v3886_v17  ;;  %2293 = vmatpush.msrb.mxu0 %v3886_v17 }
 0x56f   :  { %v1675_v62 = vpop.f32.mrf.mxu1 }
 0x570   :  { %v3843_v60 = vadd.f32 1.0, %v1734_v43  ;;  %v3845_v29 = vadd.f32 %v1675_v62, %v1611_v51  ;;  %v1223_v62 = vadd.f32 %v3676_v38, %v1141_v33  ;;  %v2180_v51 = vsub.f32 %v3838_v20, %v4417_v57  ;;  %v2027_v57 = vld [vmem:[%s4396_s5 + $0x28] sm:$0xff] }
 0x571   :  { %v1508_v43 = vadd.f32 %v3682_v9, %v1432_v31  ;;  %v1437_v38 = vadd.f32 %v3688_v34, %v1352_v10  ;;  %v2186_v31 = vsub.f32 %v3854_v47, %v4421_v4  ;;  %v3888_v34 = vand.u32 4294901760, %v2027_v57 }
 0x572   :  { %2676 = vrcp.f32 %v3843_v60  ;;  %v3864_v36 = vmul.f32 0.70710677, %v3845_v29  ;;  %v2181_v53 = vand.u32 4294901760, %v2180_v51  ;;  %v1360_v10 = vadd.f32 %v3686_v19, %v1223_v62 }
 0x573   :  { %v1615_v9 = vadd.f32 %v1614_v23, %v1508_v43  ;;  %4477 = vst [vmem:[#allocation16_spill] sm:$0xff] %v3888_v34  ;;  %v1239_v43 = vadd.f32 %v3690_v3, %v1143_v25  ;;  %v2187_v4 = vand.u32 4294901760, %v2186_v31  ;;  %2059 = vmatpush.msra.mxu2 %v3888_v34  ;;  %v1514_v19 = vadd.f32 %v3697_v58, %v1437_v38  ;;  %v1618_v3 = vpop.f32.mrf.mxu0 }
 0x574   :  { %v3877_v33 = vand.u32 2147483647, %v3864_v36  ;;  %2182 = vmatpush.msra.mxu3 %v2181_v53  ;;  %2374 = vmatpush.msrb.mxu1 %v3888_v34  ;;  %v2192_v25 = vsub.f32 %v3886_v17, %v4422_v24  ;;  %v3914_v53 = vsub.f32 %v2027_v57, %v3888_v34  ;;  %v3917_v58 = vadd.f32 %v3752_v54, %v1442_v32  ;;  %v2026_v57 = vld [vmem:[%s4396_s5 + $0x20] sm:$0xff]  ;;  %v1456_v54 = vpop.f32.mrf.mxu2 }
 0x575   :  { %v1447_v11 = vadd.f32 %v3800_v28, %v1360_v10  ;;  %v1368_v59 = vadd.f32 %v3725_v15, %v1239_v43  ;;  %v1759_v32 = vand.u32 2147483647, %v3843_v60  ;;  %v1452_v28 = vadd.f32 %v1451_v22, %v1364_v49 }
 0x576   :  { %v1735_v51 = vmul.f32 0.3275911, %v3877_v33  ;;  %2188 = vmatpush.msra.mxu3 %v2187_v4  ;;  %2296 = vmatpush.msrb.mxu0 %v3914_v53  ;;  %v1942_v15 = vsub.f32 0.0, %v3822_v21  ;;  %v1619_v10 = vadd.f32 %v1618_v3, %v1514_v19  ;;  %vm1755_vm13 = vweird.f32 %v3843_v60  ;;  %v1537_v19 = vpop.f32.mrf.mxu3 }
 0x577   :  { %v1679_v48 = vpop.f32.mrf.mxu1  ;;  %v4427_v12 = vand.u32 4294901760, %v3914_v53  ;;  %v3935_v6 = vand.u32 4294901760, %v2026_v57  ;;  %vm1760_vm15 = vcmp.eq.f32.partialorder %v1759_v32, 8.507059e+37  ;;  %vm1711_vm8 = vcmp.ge.f32.partialorder %v3864_v36, 0.0 }
 0x578   :  { %v2677_v23 = vpop.eup %2676  ;;  %v3896_v40 = vadd.f32 %v1679_v48, %v1615_v9  ;;  %v3903_v62 = vadd.f32 1.0, %v1735_v51  ;;  %v1761_v9 = vand.u32 2147483648, %v3843_v60  ;;  %v2193_v51 = vand.u32 4294901760, %v2192_v25 }
 0x579   :  { %v1751_v37 = vmul.f32 %v2677_v23, %v3843_v60  ;;  %vm1756_vm12 = vweird.f32 %v2677_v23  ;;  %4478 = vst [vmem:[#allocation17_spill] sm:$0xff] %v3935_v6  ;;  %v2198_v60 = vsub.f32 %v3914_v53, %v4427_v12  ;;  %2061 = vmatpush.msra.mxu2 %v3935_v6  ;;  %v3946_v25 = vsub.f32 %v2026_v57, %v3935_v6 }
 0x57a   :  { %v3908_v48 = vmul.f32 0.70710677, %v3896_v40  ;;  %2678 = vrcp.f32 %v3903_v62  ;;  %2194 = vmatpush.msra.mxu3 %v2193_v51  ;;  %vm1757_vm14 = vmor %vm1755_vm13, %vm1756_vm12  ;;  %v1762_v0 = vor.u32 1.1754944e-38, %v1761_v9  ;;  %2376 = vmatpush.msrb.mxu1 %v3935_v6  ;;  %v3958_v9 = vadd.f32 %v3892_v30, %v1452_v28 }
 0x57b   :  { %v1752_v38 = vsub.f32 1.0, %v1751_v37  ;;  %v1950_v57 = vmul.f32 %v1942_v15, %v3822_v21  ;;  %2299 = vmatpush.msrb.mxu0 %v3946_v25  ;;  %v1622_v51 = vpop.f32.mrf.mxu0  ;;  %v4428_v30 = vmov -1.0   ;;  %v2199_v28 = vand.u32 4294901760, %v2198_v60 }
 0x57c   :  { %v3924_v4 = vand.u32 2147483647, %v3908_v48  ;;  %v3979_v21 = vsel %vm1710_vm1, 1.0, %v4428_v30  ;;  %vm1770_vm4 = vweird.f32 %v3903_v62  ;;  %v1943_v60 = vsub.f32 0.0, %v3877_v33 }
 0x57d   :  { %v1753_v31 = vmul.f32 %v2677_v23, %v1752_v38  ;;  %v1457_v38 = vadd.f32 %v1456_v54, %v1368_v59  ;;  %2200 = vmatpush.msra.mxu3 %v2199_v28 }
 0x57e   :  { %v1736_v43 = vmul.f32 0.3275911, %v3924_v4 }
 0x57f   :  { %v1754_v37 = vadd.f32 %v2677_v23, %v1753_v31  ;;  %v1683_v24 = vpop.f32.mrf.mxu1  ;;  %v3963_v31 = vadd.f32 %v1537_v19, %v1457_v38  ;;  %v1958_v19 = vmul.f32 1.442695, %v1950_v57 }
 0x580   :  { %v3937_v7 = vadd.f32 1.0, %v1736_v43  ;;  %v3939_v22 = vadd.f32 %v1683_v24, %v1619_v10  ;;  %v2679_v49 = vpop.eup %2678  ;;  %v1774_v43 = vand.u32 2147483647, %v3903_v62 }
 0x581   :  { %v1758_v3 = vsel %vm1757_vm14, %v2677_v23, %v1754_v37  ;;  %v1766_v24 = vmul.f32 %v2679_v49, %v3903_v62  ;;  %v3955_v23 = vadd.f32 %v3827_v55, %v1447_v11  ;;  %v3974_v55 = vld [vmem:[%s4396_s5 + $0x18] sm:$0xff]  ;;  %vm1771_vm3 = vweird.f32 %v2679_v49 }
 0x582   :  { %v3950_v59 = vsel %vm1760_vm15, %v1762_v0, %v1758_v3  ;;  %2680 = vrcp.f32 %v3937_v7  ;;  %v3966_v0 = vmul.f32 0.5, %v3791_v45  ;;  %v3969_v10 = vmul.f32 0.70710677, %v3939_v22  ;;  %vm1772_vm5 = vmor %vm1770_vm4, %vm1771_vm3 }
 0x583   :  { %v1870_v54 = vmul.f32 1.0614054, %v3950_v59  ;;  %v1767_v32 = vsub.f32 1.0, %v1766_v24  ;;  %v1776_v45 = vand.u32 2147483648, %v3903_v62  ;;  %v1623_v3 = vadd.f32 %v1622_v51, %v3917_v58 }
 0x584   :  { %v3984_v37 = vand.u32 2147483647, %v3969_v10  ;;  %v3989_v50 = vand.u32 4294901760, %v3974_v55  ;;  %vm1775_vm6 = vcmp.eq.f32.partialorder %v1774_v43, 8.507059e+37  ;;  %v1944_v62 = vsub.f32 0.0, %v3924_v4 }
 0x585   :  { %v1878_v11 = vadd.f32 -1.4531521, %v1870_v54  ;;  %v1768_v15 = vmul.f32 %v2679_v49, %v1767_v32  ;;  %v1791_v8 = vand.u32 2147483648, %v3937_v7  ;;  %v1789_v43 = vand.u32 2147483647, %v3937_v7 }
 0x586   :  { %4479 = vst [vmem:[#allocation18_spill] sm:$0xff] %v3989_v50  ;;  %v1737_v32 = vmul.f32 0.3275911, %v3984_v37  ;;  %2063 = vmatpush.msra.mxu2 %v3989_v50  ;;  %2378 = vmatpush.msrb.mxu1 %v3989_v50  ;;  %vm1785_vm9 = vweird.f32 %v3937_v7  ;;  %vm1712_vm15 = vcmp.ge.f32.partialorder %v3908_v48, 0.0  ;;  %vm1713_vm1 = vcmp.ge.f32.partialorder %v3969_v10, 0.0 }
 0x587   :  { %v1886_v38 = vmul.f32 %v1878_v11, %v3950_v59  ;;  %v1687_v24 = vpop.f32.mrf.mxu1  ;;  %v1769_v12 = vadd.f32 %v2679_v49, %v1768_v15  ;;  %v1777_v11 = vor.u32 1.1754944e-38, %v1776_v45  ;;  %vm1790_vm10 = vcmp.eq.f32.partialorder %v1789_v43, 8.507059e+37 }
 0x588   :  { %v2681_v54 = vpop.eup %2680  ;;  %v3996_v58 = vadd.f32 %v1687_v24, %v1623_v3  ;;  %v4001_v28 = vadd.f32 1.0, %v1737_v32  ;;  %v1951_v24 = vmul.f32 %v1943_v60, %v3877_v33  ;;  %v1626_v32 = vpop.f32.mrf.mxu0  ;;  %v1952_v60 = vmul.f32 %v1944_v62, %v3924_v4 }
 0x589   :  { %v1894_v30 = vadd.f32 1.4214138, %v1886_v38  ;;  %v1781_v57 = vmul.f32 %v2681_v54, %v3937_v7  ;;  %v1773_v51 = vsel %vm1772_vm5, %v2679_v49, %v1769_v12  ;;  %vm1786_vm7 = vweird.f32 %v2681_v54 }
 0x58a   :  { %v4004_v38 = vsel %vm1775_vm6, %v1777_v11, %v1773_v51  ;;  %v4007_v45 = vmul.f32 0.70710677, %v3996_v58  ;;  %2682 = vrcp.f32 %v4001_v28  ;;  %v4023_v51 = vmul.f32 0.5, %v3845_v29  ;;  %vm1787_vm2 = vmor %vm1785_vm9, %vm1786_vm7 }
 0x58b   :  { %v1902_v15 = vmul.f32 %v1894_v30, %v3950_v59  ;;  %v1782_v1 = vsub.f32 1.0, %v1781_v57  ;;  %v1871_v3 = vmul.f32 1.0614054, %v4004_v38  ;;  %2684 = vpow2.f32 %v1958_v19 }
 0x58c   :  { %v4016_v11 = vand.u32 2147483647, %v4007_v45  ;;  %v1792_v19 = vor.u32 1.1754944e-38, %v1791_v8  ;;  %v1960_v2 = vmul.f32 1.442695, %v1951_v24  ;;  %v1627_v36 = vadd.f32 %v1626_v32, %v3955_v23 }
 0x58d   :  { %v1910_v12 = vadd.f32 -0.28449672, %v1902_v15  ;;  %v1783_v49 = vmul.f32 %v2681_v54, %v1782_v1  ;;  %v1879_v30 = vadd.f32 -1.4531521, %v1871_v3  ;;  %vm1800_vm12 = vweird.f32 %v4001_v28 }
 0x58e   :  { %v1738_v15 = vmul.f32 0.3275911, %v4016_v11 }
 0x58f   :  { %v1918_v57 = vmul.f32 %v1910_v12, %v3950_v59  ;;  %v1784_v33 = vadd.f32 %v2681_v54, %v1783_v49  ;;  %v1887_v1 = vmul.f32 %v1879_v30, %v4004_v38  ;;  %v1691_v34 = vpop.f32.mrf.mxu1  ;;  %v4480_v49 = vmov -1.0  }
 0x590   :  { %v2683_v12 = vpop.eup %2682  ;;  %v4029_v7 = vsel %vm1711_vm8, 1.0, %v4480_v49  ;;  %v4033_v29 = vadd.f32 1.0, %v1738_v15 }
 0x591   :  { %v1926_v3 = vadd.f32 0.2548296, %v1918_v57  ;;  %v1788_v6 = vsel %vm1787_vm2, %v2681_v54, %v1784_v33  ;;  %v1895_v4 = vadd.f32 1.4214138, %v1887_v1  ;;  %v1962_v57 = vmul.f32 1.442695, %v1952_v60  ;;  %v2685_v24 = vpop.eup %2684 }
 0x592   :  { %v4031_v62 = vsel %vm1790_vm10, %v1792_v19, %v1788_v6  ;;  %v1796_v54 = vmul.f32 %v2683_v12, %v4001_v28  ;;  %v1945_v33 = vsub.f32 0.0, %v3984_v37  ;;  %2686 = vrcp.f32 %v4033_v29 }
 0x593   :  { %v1934_v8 = vmul.f32 %v1926_v3, %v3950_v59  ;;  %v1872_v30 = vmul.f32 1.0614054, %v4031_v62  ;;  %v1903_v43 = vmul.f32 %v1895_v4, %v4004_v38  ;;  %2688 = vpow2.f32 %v1960_v2  ;;  %v1630_v2 = vpop.f32.mrf.mxu0 }
 0x594   :  { %v1797_v19 = vsub.f32 1.0, %v1796_v54  ;;  %v1804_v59 = vand.u32 2147483647, %v4001_v28  ;;  %v1806_v60 = vand.u32 2147483648, %v4001_v28  ;;  %v4044_v3 = vadd.f32 %v1691_v34, %v1627_v36 }
 0x595   :  { %v1974_v6 = vmul.f32 %v2685_v24, %v1934_v8  ;;  %v1880_v1 = vadd.f32 -1.4531521, %v1872_v30  ;;  %v1911_v15 = vadd.f32 -0.28449672, %v1903_v43  ;;  %2690 = vpow2.f32 %v1962_v57 }
 0x596   :  { %v1798_v4 = vmul.f32 %v2683_v12, %v1797_v19  ;;  %vm1801_vm11 = vweird.f32 %v2683_v12  ;;  %v1953_v32 = vmul.f32 %v1945_v33, %v3984_v37  ;;  %v4050_v8 = vmul.f32 0.70710677, %v4044_v3 }
 0x597   :  { %v1888_v18 = vmul.f32 %v1880_v1, %v4031_v62  ;;  %v1982_v52 = vsub.f32 1.0, %v1974_v6  ;;  %v1919_v23 = vmul.f32 %v1911_v15, %v4004_v38  ;;  %v1946_v34 = vsub.f32 0.0, %v4016_v11  ;;  %vm1802_vm13 = vmor %vm1800_vm12, %vm1801_vm11  ;;  %v1695_v1 = vpop.f32.mrf.mxu1 }
 0x598   :  { %v1799_v54 = vadd.f32 %v2683_v12, %v1798_v4  ;;  %v2687_v24 = vpop.eup %2686  ;;  %vm1805_vm14 = vcmp.eq.f32.partialorder %v1804_v59, 8.507059e+37  ;;  %v1807_v57 = vor.u32 1.1754944e-38, %v1806_v60  ;;  %v4055_v36 = vand.u32 2147483647, %v4050_v8 }
 0x599   :  { %v1896_v30 = vadd.f32 1.4214138, %v1888_v18  ;;  %v1927_v43 = vadd.f32 0.2548296, %v1919_v23  ;;  %v2689_v6 = vpop.eup %2688  ;;  %v1811_v28 = vmul.f32 %v2687_v24, %v4033_v29  ;;  %v1631_v33 = vadd.f32 %v1630_v2, %v3958_v9 }
 0x59a   :  { %v1803_v18 = vsel %vm1802_vm13, %v2683_v12, %v1799_v54  ;;  %v1990_v19 = vmul.f32 %v1982_v52, %v3979_v21  ;;  %v1819_v60 = vand.u32 2147483647, %v4033_v29  ;;  %v1954_v12 = vmul.f32 %v1946_v34, %v4016_v11 }
 0x59b   :  { %v1904_v37 = vmul.f32 %v1896_v30, %v4031_v62  ;;  %v1935_v15 = vmul.f32 %v1927_v43, %v4004_v38  ;;  %v4064_v59 = vsel %vm1805_vm14, %v1807_v57, %v1803_v18  ;;  %v2691_v4 = vpop.eup %2690  ;;  %v1812_v63 = vsub.f32 1.0, %v1811_v28 }
 0x59c   :  { %v1873_v30 = vmul.f32 1.0614054, %v4064_v59  ;;  %vm1816_vm3 = vweird.f32 %v2687_v24  ;;  %v1821_v54 = vand.u32 2147483648, %v4033_v29  ;;  %v1739_v9 = vmul.f32 0.3275911, %v4055_v36 }
 0x59d   :  { %v1912_v23 = vadd.f32 -0.28449672, %v1904_v37  ;;  %v4071_v2 = vadd.f32 %v1695_v1, %v1631_v33  ;;  %v1975_v52 = vmul.f32 %v2689_v6, %v1935_v15  ;;  %v1813_v43 = vmul.f32 %v2687_v24, %v1812_v63 }
 0x59e   :  { %v1881_v38 = vadd.f32 -1.4531521, %v1873_v30  ;;  %v2006_v57 = vadd.f32 1.0, %v1990_v19  ;;  %v1964_v18 = vmul.f32 1.442695, %v1953_v32  ;;  %v4074_v37 = vadd.f32 1.0, %v1739_v9 }
 0x59f   :  { %v1920_v21 = vmul.f32 %v1912_v23, %v4031_v62  ;;  %v4439_v28 = vand.u32 4294901760, %v3946_v25  ;;  %v1814_v34 = vadd.f32 %v2687_v24, %v1813_v43  ;;  %vm1815_vm4 = vweird.f32 %v4033_v29 }
 0x5a0   :  { %v1889_v11 = vmul.f32 %v1881_v38, %v4064_v59  ;;  %vm1817_vm5 = vmor %vm1815_vm4, %vm1816_vm3  ;;  %vm1820_vm6 = vcmp.eq.f32.partialorder %v1819_v60, 8.507059e+37  ;;  %v1822_v6 = vor.u32 1.1754944e-38, %v1821_v54  ;;  %2692 = vrcp.f32 %v4074_v37 }
 0x5a1   :  { %v1928_v46 = vadd.f32 0.2548296, %v1920_v21  ;;  %v4082_v63 = vmul.f32 0.70710677, %v4071_v2  ;;  %v1983_v32 = vsub.f32 1.0, %v1975_v52  ;;  %v1818_v1 = vsel %vm1817_vm5, %v2687_v24, %v1814_v34 }
 0x5a2   :  { %v1897_v33 = vadd.f32 1.4214138, %v1889_v11  ;;  %v1966_v19 = vmul.f32 1.442695, %v1954_v12  ;;  %v2014_v15 = vmul.f32 %v2006_v57, %v3966_v0  ;;  %v4086_v30 = vsel %vm1820_vm6, %v1822_v6, %v1818_v1  ;;  %v1634_v6 = vpop.f32.mrf.mxu0 }
 0x5a3   :  { %v1936_v23 = vmul.f32 %v1928_v46, %v4031_v62  ;;  %v2204_v29 = vsub.f32 %v3946_v25, %v4439_v28  ;;  %v4092_v60 = vmul.f32 0.5, %v3896_v40  ;;  %v1874_v9 = vmul.f32 1.0614054, %v4086_v30 }
 0x5a4   :  { %v1905_v54 = vmul.f32 %v1897_v33, %v4064_v59  ;;  %v1947_v24 = vsub.f32 0.0, %v4055_v36  ;;  %v1720_v0 = vsel %vm1712_vm15, 1.0, %v4480_v49  ;;  %v4103_v46 = vsel %vm1713_vm1, 1.0, %v4480_v49 }
 0x5a5   :  { %2694 = vpow2.f32 %v1964_v18  ;;  %v4106_v62 = vand.u32 2147483647, %v4082_v63  ;;  %v1991_v40 = vmul.f32 %v1983_v32, %v4029_v7  ;;  %v1882_v52 = vadd.f32 -1.4531521, %v1874_v9 }
 0x5a6   :  { %v1913_v12 = vadd.f32 -0.28449672, %v1905_v54  ;;  %2696 = vpow2.f32 %v1966_v19  ;;  %v2693_v21 = vpop.eup %2692  ;;  %v4109_v38 = vand.u32 4294901760, %v2014_v15  ;;  %v1976_v43 = vmul.f32 %v2691_v4, %v1936_v23 }
 0x5a7   :  { %v1740_v48 = vmul.f32 0.3275911, %v4106_v62  ;;  %v2205_v57 = vand.u32 4294901760, %v2204_v29  ;;  %v1890_v11 = vmul.f32 %v1882_v52, %v4086_v30  ;;  %v1826_v18 = vmul.f32 %v2693_v21, %v4074_v37 }
 0x5a8   :  { %v1921_v10 = vmul.f32 %v1913_v12, %v4064_v59  ;;  %v1955_v34 = vmul.f32 %v1947_v24, %v4055_v36  ;;  %v1834_v7 = vand.u32 2147483647, %v4074_v37  ;;  %v1836_v32 = vand.u32 2147483648, %v4074_v37 }
 0x5a9   :  { %v4118_v33 = vadd.f32 1.0, %v1740_v48  ;;  %2206 = vmatpush.msra.mxu3 %v2205_v57  ;;  %v4122_v4 = vsub.f32 %v3974_v55, %v3989_v50  ;;  %v2007_v1 = vadd.f32 1.0, %v1991_v40  ;;  %v1898_v23 = vadd.f32 1.4214138, %v1890_v11  ;;  %v1699_v57 = vpop.f32.mrf.mxu1 }
 0x5aa   :  { %v1929_v19 = vadd.f32 0.2548296, %v1921_v10  ;;  %v1827_v29 = vsub.f32 1.0, %v1826_v18  ;;  %v4125_v9 = vsub.f32 %v2014_v15, %v4109_v38  ;;  %v1984_v36 = vsub.f32 1.0, %v1976_v43  ;;  %v2024_v15 = vld [vmem:[%s4396_s5 + $0x10] sm:$0xff] }
 0x5ab   :  { %v2695_v54 = vpop.eup %2694  ;;  %v1635_v24 = vadd.f32 %v1634_v6, %v3963_v31  ;;  %2698 = vrcp.f32 %v4118_v33  ;;  %2302 = vmatpush.msrb.mxu0 %v4122_v4  ;;  %v1906_v40 = vmul.f32 %v1898_v23, %v4086_v30  ;;  %vm1831_vm7 = vweird.f32 %v2693_v21  ;;  %v2023_v31 = vld [vmem:[%s4396_s5 + $0x8] sm:$0xff] }
 0x5ac   :  { %v4130_v12 = vpop.eup %2696  ;;  %v1937_v55 = vmul.f32 %v1929_v19, %v4064_v59  ;;  %v1828_v52 = vmul.f32 %v2693_v21, %v1827_v29  ;;  %vm1830_vm8 = vweird.f32 %v4074_v37  ;;  %vm4141_vm9 = vcmp.eq.f32.partialorder %v1834_v7, 8.507059e+37 }
 0x5ad   :  { %v4145_v48 = vmul.f32 1.442695, %v1955_v34  ;;  %v4443_v59 = vand.u32 4294901760, %v4122_v4  ;;  %v4149_v10 = vmul.f32 %v2007_v1, %v4023_v51  ;;  %v1914_v11 = vadd.f32 -0.28449672, %v1906_v40  ;;  %vm1832_vm2 = vmor %vm1830_vm8, %vm1831_vm7 }
 0x5ae   :  { %v1829_v18 = vadd.f32 %v2693_v21, %v1828_v52  ;;  %v1837_v6 = vor.u32 1.1754944e-38, %v1836_v32  ;;  %v1977_v19 = vmul.f32 %v2695_v54, %v1937_v55  ;;  %v4154_v7 = vand.u32 4294901760, %v2024_v15 }
 0x5af   :  { %v2210_v37 = vsub.f32 %v4122_v4, %v4443_v59  ;;  %v4156_v23 = vand.u32 4294901760, %v2023_v31  ;;  %v1992_v34 = vmul.f32 %v1984_v36, %v1720_v0  ;;  %v1922_v29 = vmul.f32 %v1914_v11, %v4086_v30 }
 0x5b0   :  { %4483 = vst [vmem:[#allocation19_spill] sm:$0xff] %v4154_v7  ;;  %v1833_v28 = vsel %vm1832_vm2, %v2693_v21, %v1829_v18  ;;  %v4159_v50 = vadd.f32 %v1699_v57, %v1635_v24  ;;  %v4166_v54 = vsub.f32 %v2024_v15, %v4154_v7  ;;  %2065 = vmatpush.msra.mxu2 %v4154_v7  ;;  %v1948_v24 = vsub.f32 0.0, %v4106_v62 }
 0x5b1   :  { %4484 = vst [vmem:[#allocation20_spill] sm:$0xff] %v4156_v23  ;;  %v2699_v51 = vpop.eup %2698  ;;  %v4163_v32 = vsel %vm4141_vm9, %v1837_v6, %v1833_v28  ;;  %v2211_v1 = vand.u32 4294901760, %v2210_v37  ;;  %v4170_v55 = vsub.f32 %v2023_v31, %v4156_v23  ;;  %2380 = vmatpush.msrb.mxu1 %v4154_v7  ;;  %v1930_v0 = vadd.f32 0.2548296, %v1922_v29 }
 0x5b2   :  { %4485 = vst [vmem:[#allocation21_spill] sm:$0xff] %v4159_v50  ;;  %v1875_v21 = vmul.f32 1.0614054, %v4163_v32  ;;  %v1841_v36 = vmul.f32 %v2699_v51, %v4118_v33  ;;  %v1985_v28 = vsub.f32 1.0, %v1977_v19  ;;  %vm1714_vm10 = vcmp.ge.f32.partialorder %v4007_v45, 0.0  ;;  %2305 = vmatpush.msrb.mxu0 %v4166_v54  ;;  %2067 = vmatpush.msra.mxu2 %v4156_v23 }
 0x5b3   :  { %2212 = vmatpush.msra.mxu3 %v2211_v1  ;;  %v4442_v40 = vand.u32 4294901760, %v4166_v54  ;;  %v4441_v52 = vand.u32 4294901760, %v4170_v55  ;;  %v4181_v15 = vmul.f32 0.70710677, %v4159_v50  ;;  %v2008_v31 = vadd.f32 1.0, %v1992_v34  ;;  %2382 = vmatpush.msrb.mxu1 %v4156_v23  ;;  %v2022_v1 = vld [vmem:[%s4396_s5] sm:$0xff] }
 0x5b4   :  { %v1938_v43 = vmul.f32 %v1930_v0, %v4086_v30  ;;  %v1883_v57 = vadd.f32 -1.4531521, %v1875_v21  ;;  %v1842_v11 = vsub.f32 1.0, %v1841_v36  ;;  %v1851_v18 = vand.u32 2147483648, %v4118_v33  ;;  %2308 = vmatpush.msrb.mxu0 %v4170_v55 }
 0x5b5   :  { %v2216_v6 = vsub.f32 %v4166_v54, %v4442_v40  ;;  %v2222_v19 = vsub.f32 %v4170_v55, %v4441_v52  ;;  %v4194_v37 = vand.u32 2147483647, %v4181_v15  ;;  %vm1846_vm11 = vweird.f32 %v2699_v51 }
 0x5b6   :  { %v1891_v30 = vmul.f32 %v1883_v57, %v4163_v32  ;;  %v1843_v34 = vmul.f32 %v2699_v51, %v1842_v11  ;;  %v1849_v29 = vand.u32 2147483647, %v4118_v33  ;;  %v1993_v0 = vmul.f32 %v1985_v28, %v4103_v46 }
 0x5b7   :  { %v2217_v21 = vand.u32 4294901760, %v2216_v6  ;;  %v2223_v36 = vand.u32 4294901760, %v2222_v19  ;;  %v1741_v52 = vmul.f32 0.3275911, %v4194_v37  ;;  %v1978_v40 = vmul.f32 %v4130_v12, %v1938_v43 }
 0x5b8   :  { %v1899_v59 = vadd.f32 1.4214138, %v1891_v30  ;;  %v1844_v50 = vadd.f32 %v2699_v51, %v1843_v34  ;;  %vm1845_vm12 = vweird.f32 %v4118_v33  ;;  %v2016_v57 = vmul.f32 %v2008_v31, %v4092_v60 }
 0x5b9   :  { %vm1847_vm13 = vmor %vm1845_vm12, %vm1846_vm11  ;;  %v1852_v11 = vor.u32 1.1754944e-38, %v1851_v18  ;;  %2218 = vmatpush.msra.mxu3 %v2217_v21  ;;  %v4207_v23 = vadd.f32 1.0, %v1741_v52  ;;  %v4209_v7 = vand.u32 4294901760, %v2022_v1  ;;  %vm1850_vm14 = vcmp.eq.f32.partialorder %v1849_v29, 8.507059e+37 }
 0x5ba   :  { %v1907_v46 = vmul.f32 %v1899_v59, %v4163_v32  ;;  %v1848_v28 = vsel %vm1847_vm13, %v2699_v51, %v1844_v50  ;;  %v2072_v6 = vand.u32 4294901760, %v4125_v9  ;;  %v4214_v12 = vand.u32 4294901760, %v4149_v10 }
 0x5bb   :  { %v2009_v43 = vadd.f32 1.0, %v1993_v0  ;;  %v4216_v33 = vsel %vm1850_vm14, %v1852_v11, %v1848_v28  ;;  %2224 = vmatpush.msra.mxu3 %v2223_v36  ;;  %2700 = vrcp.f32 %v4207_v23  ;;  %2384 = vmatpush.msrb.mxu1 %v4209_v7  ;;  %v2001_v60 = vmul.f32 0.5, %v3939_v22 }
 0x5bc   :  { %v1986_v52 = vsub.f32 1.0, %v1978_v40  ;;  %v1915_v31 = vadd.f32 -0.28449672, %v1907_v46  ;;  %v1876_v50 = vmul.f32 1.0614054, %v4216_v33  ;;  %2069 = vmatpush.msra.mxu2 %v4209_v7  ;;  %2388 = vmatmul.f32.vlgmr.msrb.gmra.mxu1 %v2072_v6  ;;  %v4223_v59 = vand.u32 4294901760, %v2016_v57 }
 0x5bd   :  { %2702 = vpow2.f32 %v4145_v48  ;;  %v4227_v51 = vsub.f32 %v2022_v1, %v4209_v7  ;;  %v2073_v18 = vsub.f32 %v4125_v9, %v2072_v6  ;;  %v4486_v19 = vand.u32 4294901760, %v3706_v26 }
 0x5be   :  { %v1722_v22 = vsel %vm1714_vm10, 1.0, %v4480_v49  ;;  %v1923_v40 = vmul.f32 %v1915_v31, %v4163_v32  ;;  %v1884_v30 = vadd.f32 -1.4531521, %v1876_v50  ;;  %v1956_v34 = vmul.f32 %v1948_v24, %v4106_v62 }
 0x5bf   :  { %2437 = vmatpush.msrb.mxu2 %v4486_v19  ;;  %v2017_v29 = vmul.f32 %v2009_v43, %v2001_v60  ;;  %v2227_v48 = vand.u32 4294901760, %v4227_v51  ;;  %2311 = vmatpush.msrb.mxu0 %v4227_v51  ;;  %v2074_v1 = vand.u32 4294901760, %v2073_v18  ;;  %v2079_v0 = vsub.f32 %v4149_v10, %v4214_v12 }
 0x5c0   :  { %v4487_v26 = vand.u32 4294901760, %v3720_v5  ;;  %v1994_v21 = vmul.f32 %v1986_v52, %v1722_v22  ;;  %v1931_v45 = vadd.f32 0.2548296, %v1923_v40  ;;  %v1892_v36 = vmul.f32 %v1884_v30, %v4216_v33  ;;  %2314 = vmatmul.f32.vlgmr.msrb.gmra.mxu0 %v4125_v9 }
 0x5c1   :  { %v2701_v11 = vpop.eup %2700  ;;  %v2002_v62 = vmul.f32 0.5, %v3996_v58  ;;  %v2228_v24 = vsub.f32 %v4227_v51, %v2227_v48  ;;  %2075 = vmatmul.f32.vlgmr.msra.gmra.mxu2 %v2074_v1  ;;  %v2080_v46 = vand.u32 4294901760, %v2079_v0  ;;  %v4250_v10 = vsub.f32 %v2016_v57, %v4223_v59 }
 0x5c2   :  { %2441 = vmatpush.msrb.mxu2 %v4487_v26  ;;  %vm1715_vm15 = vcmp.ge.f32.partialorder %v4050_v8, 0.0  ;;  %v1939_v5 = vmul.f32 %v1931_v45, %v4163_v32  ;;  %v1900_v28 = vadd.f32 1.4214138, %v1892_v36  ;;  %v1856_v6 = vmul.f32 %v2701_v11, %v4207_v23 }
 0x5c3   :  { %v4488_v9 = vand.u32 4294901760, %v3736_v14  ;;  %v2703_v58 = vpop.eup %2702  ;;  %v4257_v43 = vand.u32 4294901760, %v2017_v29  ;;  %v1970_v60 = vmul.f32 1.442695, %v1956_v34  ;;  %v2229_v52 = vand.u32 4294901760, %v2228_v24 }
 0x5c4   :  { %v2081_v31 = vsub.f32 %v2079_v0, %v2080_v46  ;;  %v2010_v50 = vadd.f32 1.0, %v1994_v21  ;;  %v1979_v18 = vmul.f32 %v2703_v58, %v1939_v5  ;;  %v1908_v57 = vmul.f32 %v1900_v28, %v4216_v33  ;;  %2394 = vmatmul.f32.gmra.mxu1 %v2080_v46 }
 0x5c5   :  { %2445 = vmatpush.msrb.mxu2 %v4488_v9  ;;  %v1857_v19 = vsub.f32 1.0, %v1856_v6  ;;  %v4489_v32 = vand.u32 4294901760, %v3756_v42  ;;  %v1864_v22 = vand.u32 2147483647, %v4207_v23  ;;  %v1866_v14 = vand.u32 2147483648, %v4207_v23  ;;  %2230 = vmatpush.msra.mxu3 %v2229_v52 }
 0x5c6   :  { %v2082_v40 = vand.u32 4294901760, %v2081_v31  ;;  %v2088_v30 = vand.u32 4294901760, %v4250_v10  ;;  %v1987_v34 = vsub.f32 1.0, %v1979_v18  ;;  %v1916_v1 = vadd.f32 -0.28449672, %v1908_v57  ;;  %2232 = vmatmul.f32.vlgmr.msra.gmra.mxu3 %v4109_v38 }
 0x5c7   :  { %2449 = vmatpush.msrb.mxu2 %v4489_v32  ;;  %v1858_v26 = vmul.f32 %v2701_v11, %v1857_v19  ;;  %vm1861_vm1 = vweird.f32 %v2701_v11  ;;  %v4490_v21 = vand.u32 4294901760, %v3766_v35  ;;  %v1723_v42 = vsel %vm1715_vm15, 1.0, %v4480_v49  ;;  %2532 = vmatpush.msrb.mxu3 %v3699_v39 }
 0x5c8   :  { %2704 = vpow2.f32 %v1970_v60  ;;  %v2018_v45 = vmul.f32 %v2010_v50, %v2002_v62  ;;  %v1924_v36 = vmul.f32 %v1916_v1, %v4216_v33  ;;  %vm1860_vm3 = vweird.f32 %v4207_v23  ;;  %2319 = vmatmul.f32.gmra.mxu0 %v2079_v0 }
 0x5c9   :  { %2453 = vmatpush.msrb.mxu2 %v4490_v21  ;;  %v1859_v24 = vadd.f32 %v2701_v11, %v1858_v26  ;;  %v4491_v46 = vand.u32 4294901760, %v3785_v16  ;;  %v1995_v5 = vmul.f32 %v1987_v34, %v1723_v42  ;;  %vm1862_vm4 = vmor %vm1860_vm3, %vm1861_vm1  ;;  %v1867_v35 = vor.u32 1.1754944e-38, %v1866_v14  ;;  %2534 = vmatpush.msrb.mxu3 %v3708_v56  ;;  %v4499_v34 = vld [vmem:[#allocation13_spill] sm:$0xff]  ;;  %v4501_v21 = vld [vmem:[#allocation14_spill] sm:$0xff] }
 0x5ca   :  { %2083 = vmatmul.f32.gmra.mxu2 %v2082_v40  ;;  %v2089_v8 = vsub.f32 %v4250_v10, %v2088_v30  ;;  %v2095_v39 = vsub.f32 %v2017_v29, %v4257_v43  ;;  %v1932_v62 = vadd.f32 0.2548296, %v1924_v36  ;;  %vm1865_vm5 = vcmp.eq.f32.partialorder %v1864_v22, 8.507059e+37  ;;  %v4497_v22 = vld [vmem:[#allocation12_spill] sm:$0xff] }
 0x5cb   :  { %2457 = vmatpush.msrb.mxu2 %v4491_v46  ;;  %v1863_v28 = vsel %vm1862_vm4, %v2701_v11, %v1859_v24  ;;  %v4492_v6 = vand.u32 4294901760, %v3805_v44  ;;  %v1949_v16 = vsub.f32 0.0, %v4194_v37  ;;  %2536 = vmatpush.msrb.mxu3 %v3722_v41  ;;  %v4493_v56 = vand.u32 4294901760, %v3838_v20  ;;  %v4503_v46 = vld [vmem:[#allocation15_spill] sm:$0xff] }
 0x5cc   :  { %v1868_v23 = vsel %vm1865_vm5, %v1867_v35, %v1863_v28  ;;  %v1940_v0 = vmul.f32 %v1932_v62, %v4216_v33  ;;  %2400 = vmatmul.f32.gmra.mxu1 %v2088_v30  ;;  %v4286_v29 = vand.u32 4294901760, %v2018_v45  ;;  %v2011_v11 = vadd.f32 1.0, %v1995_v5  ;;  %v4506_v28 = vld [vmem:[#allocation17_spill] sm:$0xff] }
 0x5cd   :  { %2461 = vmatpush.msrb.mxu2 %v4492_v6  ;;  %v1877_v9 = vmul.f32 1.0614054, %v1868_v23  ;;  %2538 = vmatpush.msrb.mxu3 %v3739_v61  ;;  %v2090_v44 = vand.u32 4294901760, %v2089_v8  ;;  %v2096_v60 = vand.u32 4294901760, %v2095_v39  ;;  %vm1716_vm6 = vcmp.ge.f32.partialorder %v4082_v63, 0.0 }
 0x5ce   :  { %v2705_v58 = vpop.eup %2704  ;;  %2236 = vmatmul.f32.gmra.mxu3 %v4214_v12  ;;  %v4494_v41 = vand.u32 4294901760, %v3854_v47  ;;  %v2003_v20 = vmul.f32 0.5, %v4044_v3  ;;  %v1957_v33 = vmul.f32 %v1949_v16, %v4194_v37  ;;  %v4495_v61 = vand.u32 4294901760, %v3886_v17 }
 0x5cf   :  { %2465 = vmatpush.msrb.mxu2 %v4493_v56  ;;  %v1980_v52 = vmul.f32 %v2705_v58, %v1940_v0  ;;  %v1885_v31 = vadd.f32 -1.4531521, %v1877_v9  ;;  %2540 = vmatpush.msrb.mxu3 %v3749_v27  ;;  %v1724_v57 = vsel %vm1716_vm6, 1.0, %v4480_v49  ;;  %v2097_v47 = vsub.f32 %v2095_v39, %v2096_v60  ;;  %v4508_v0 = vld [vmem:[#allocation19_spill] sm:$0xff]  ;;  %v4509_v56 = vld [vmem:[#allocation20_spill] sm:$0xff]  ;;  %v4510_v58 = vld [vmem:[#allocation21_spill] sm:$0xff] }
 0x5d0   :  { %2324 = vmatmul.f32.gmra.mxu0 %v4250_v10  ;;  %v2019_v63 = vmul.f32 %v2011_v11, %v2003_v20  ;;  %v2103_v3 = vsub.f32 %v2018_v45, %v4286_v29  ;;  %v4496_v27 = vand.u32 4294901760, %v3914_v53  ;;  %v1972_v32 = vmul.f32 1.442695, %v1957_v33 }
 0x5d1   :  { %2469 = vmatpush.msrb.mxu2 %v4494_v41  ;;  %v1988_v50 = vsub.f32 1.0, %v1980_v52  ;;  %v1893_v18 = vmul.f32 %v1885_v31, %v1868_v23  ;;  %2542 = vmatpush.msrb.mxu3 %v3771_v13  ;;  %v4498_v17 = vand.u32 4294901760, %v3946_v25  ;;  %v2098_v13 = vand.u32 4294901760, %v2097_v47 }
 0x5d2   :  { %2091 = vmatmul.f32.gmra.mxu2 %v2090_v44  ;;  %v4307_v14 = vand.u32 4294901760, %v2019_v63  ;;  %v2104_v30 = vand.u32 4294901760, %v2103_v3  ;;  %v4500_v53 = vand.u32 4294901760, %v4122_v4  ;;  %v2004_v26 = vmul.f32 0.5, %v4071_v2  ;;  %v4505_v2 = vld [vmem:[#allocation16_spill] sm:$0xff] }
 0x5d3   :  { %2473 = vmatpush.msrb.mxu2 %v4495_v61  ;;  %v1996_v19 = vmul.f32 %v1988_v50, %v1724_v57  ;;  %v1901_v37 = vadd.f32 1.4214138, %v1893_v18  ;;  %2544 = vmatpush.msrb.mxu3 %v4497_v22  ;;  %2706 = vpow2.f32 %v1972_v32  ;;  %v4502_v42 = vand.u32 4294901760, %v4166_v54  ;;  %v4511_v22 = vld [vmem:[#allocation6_spill] sm:$0xff] }
 0x5d4   :  { %2406 = vmatmul.f32.gmra.mxu1 %v2096_v60  ;;  %v2105_v36 = vsub.f32 %v2103_v3, %v2104_v30  ;;  %v2111_v24 = vsub.f32 %v2019_v63, %v4307_v14  ;;  %v4504_v4 = vand.u32 4294901760, %v4170_v55  ;;  %vm1717_vm7 = vcmp.ge.f32.partialorder %v4181_v15, 0.0  ;;  %v4507_v55 = vld [vmem:[#allocation18_spill] sm:$0xff] }
 0x5d5   :  { %2477 = vmatpush.msrb.mxu2 %v4496_v27  ;;  %v1909_v10 = vmul.f32 %v1901_v37, %v1868_v23  ;;  %v2012_v40 = vadd.f32 1.0, %v1996_v19  ;;  %2546 = vmatpush.msrb.mxu3 %v4499_v34  ;;  %v2005_v11 = vmul.f32 0.5, %v4510_v58  ;;  %v4512_v34 = vld [vmem:[#allocation9_spill] sm:$0xff] }
 0x5d6   :  { %2240 = vmatmul.f32.gmra.mxu3 %v4223_v59  ;;  %v2112_v62 = vand.u32 4294901760, %v2111_v24 }
 0x5d7   :  { %2481 = vmatpush.msrb.mxu2 %v4498_v17  ;;  %v1917_v1 = vadd.f32 -0.28449672, %v1909_v10  ;;  %2548 = vmatpush.msrb.mxu3 %v4501_v21  ;;  %v2020_v45 = vmul.f32 %v2012_v40, %v2004_v26 }
 0x5d8   :  { %2329 = vmatmul.f32.gmra.mxu0 %v2095_v39  ;;  %v2106_v39 = vand.u32 4294901760, %v2105_v36  ;;  %v2113_v51 = vsub.f32 %v2111_v24, %v2112_v62 }
 0x5d9   :  { %2485 = vmatpush.msrb.mxu2 %v4500_v53  ;;  %v1925_v25 = vmul.f32 %v1917_v1, %v1868_v23  ;;  %2550 = vmatpush.msrb.mxu3 %v4503_v46  ;;  %v2707_v54 = vpop.eup %2706  ;;  %v2118_v8 = vand.u32 4294901760, %v2020_v45 }
 0x5da   :  { %2099 = vmatmul.f32.gmra.mxu2 %v2098_v13  ;;  %v2114_v44 = vand.u32 4294901760, %v2113_v51 }
 0x5db   :  { %2489 = vmatpush.msrb.mxu2 %v4502_v42  ;;  %v1933_v5 = vadd.f32 0.2548296, %v1925_v25  ;;  %2552 = vmatpush.msrb.mxu3 %v4505_v2 }
 0x5dc   :  { %2412 = vmatmul.f32.gmra.mxu1 %v2104_v30 }
 0x5dd   :  { %2493 = vmatpush.msrb.mxu2 %v4504_v4  ;;  %v1941_v35 = vmul.f32 %v1933_v5, %v1868_v23  ;;  %2554 = vmatpush.msrb.mxu3 %v4506_v28  ;;  %v1725_v23 = vsel %vm1717_vm7, 1.0, %v4480_v49 }
 0x5de   :  { %2244 = vmatmul.f32.gmra.mxu3 %v4257_v43 }
 0x5df   :  { %2497 = vmatpush.msrb.mxu2 %v2227_v48  ;;  %v1981_v6 = vmul.f32 %v2707_v54, %v1941_v35  ;;  %2556 = vmatpush.msrb.mxu3 %v4507_v55  ;;  %v2119_v48 = vsub.f32 %v2020_v45, %v2118_v8 }
 0x5e0   :  { %2334 = vmatmul.f32.gmra.mxu0 %v2103_v3 }
 0x5e1   :  { %v1989_v16 = vsub.f32 1.0, %v1981_v6  ;;  %2558 = vmatpush.msrb.mxu3 %v4508_v0  ;;  %v2120_v60 = vand.u32 4294901760, %v2119_v48  ;;  %v4514_v6 = vld [vmem:[#allocation8_spill] sm:$0xff] }
 0x5e2   :  { %2107 = vmatmul.f32.gmra.mxu2 %v2106_v39 }
 0x5e3   :  { %v1997_v9 = vmul.f32 %v1989_v16, %v1725_v23  ;;  %2560 = vmatpush.msrb.mxu3 %v4509_v56  ;;  %v2121_v31 = vsub.f32 %v2119_v48, %v2120_v60 }
 0x5e4   :  { %2418 = vmatmul.f32.gmra.mxu1 %v2112_v62 }
 0x5e5   :  { %v2013_v15 = vadd.f32 1.0, %v1997_v9  ;;  %2562 = vmatpush.msrb.mxu3 %v4209_v7  ;;  %v2122_v20 = vand.u32 4294901760, %v2121_v31 }
 0x5e6   :  { %2248 = vmatmul.f32.gmra.mxu3 %v4286_v29 }
 0x5e7   :  { %v2021_v52 = vmul.f32 %v2013_v15, %v2005_v11  ;;  %v4515_v11 = vld [vmem:[#allocation4_spill] sm:$0xff] }
 0x5e8   :  { %2339 = vmatmul.f32.gmra.mxu0 %v2111_v24  ;;  %v4513_v24 = vld [vmem:[#allocation5_spill] sm:$0xff] }
 0x5e9   :  { %v2126_v49 = vand.u32 4294901760, %v2021_v52 }
 0x5ea   :  { %2115 = vmatmul.f32.gmra.mxu2 %v2114_v44 }
 0x5eb   :  { %v2127_v41 = vsub.f32 %v2021_v52, %v2126_v49 }
 0x5ec   :  { %2424 = vmatmul.f32.gmra.mxu1 %v2120_v60 }
 0x5ed   :  { %v2128_v33 = vand.u32 4294901760, %v2127_v41 }
 0x5ee   :  { %2252 = vmatmul.f32.gmra.mxu3 %v4307_v14 }
 0x5ef   :  { %v2129_v50 = vsub.f32 %v2127_v41, %v2128_v33 }
 0x5f0   :  { %2344 = vmatmul.f32.gmra.mxu0 %v2119_v48 }
 0x5f1   :  { %v2130_v18 = vand.u32 4294901760, %v2129_v50 }
 0x5f2   :  { %2123 = vmatmul.f32.gmra.mxu2 %v2122_v20 }
 0x5f4   :  { %2430 = vmatmul.f32.gmra.mxu1 %v2128_v33 }
 0x5f6   :  { %2256 = vmatmul.f32.gmra.mxu3 %v2118_v8 }
 0x5f8   :  { %2349 = vmatmul.f32.gmra.mxu0 %v2127_v41 }
 0x5fa   :  { %2131 = vmatmul.f32.gmra.mxu2 %v2130_v18  ;;  %v4516_v18 = vld [vmem:[#allocation7_spill] sm:$0xff] }
 0x5fe   :  { %2260 = vmatmul.f32.gmra.mxu3 %v2126_v49 }
 0x602   :  { %2499 = vmatmul.f32.vlgmr.msrb.gmra.mxu2 %v4109_v38 }
 0x606   :  { %2564 = vmatmul.f32.vlgmr.msrb.gmra.mxu3 %v4109_v38 }
 0x60a   :  { %2503 = vmatmul.f32.gmra.mxu2 %v4214_v12 }
 0x60e   :  { %2568 = vmatmul.f32.gmra.mxu3 %v4214_v12 }
 0x612   :  { %2507 = vmatmul.f32.gmra.mxu2 %v4223_v59 }
 0x616   :  { %2572 = vmatmul.f32.gmra.mxu3 %v4223_v59 }
 0x61a   :  { %2511 = vmatmul.f32.gmra.mxu2 %v4257_v43 }
 0x61e   :  { %2576 = vmatmul.f32.gmra.mxu3 %v4257_v43 }
 0x622   :  { %2515 = vmatmul.f32.gmra.mxu2 %v4286_v29 }
 0x626   :  { %2580 = vmatmul.f32.gmra.mxu3 %v4286_v29 }
 0x62a   :  { %2519 = vmatmul.f32.gmra.mxu2 %v4307_v14 }
 0x62e   :  { %2584 = vmatmul.f32.gmra.mxu3 %v4307_v14 }
 0x632   :  { %2523 = vmatmul.f32.gmra.mxu2 %v2118_v8 }
 0x636   :  { %2588 = vmatmul.f32.gmra.mxu3 %v2118_v8 }
 0x639   :  { %v2389_v32 = vpop.f32.mrf.mxu1 }
 0x63a   :  { %2527 = vmatmul.f32.gmra.mxu2 %v2126_v49 }
 0x63d   :  { %v2315_v29 = vpop.f32.mrf.mxu0 }
 0x63e   :  { %2592 = vmatmul.f32.gmra.mxu3 %v2126_v49 }
 0x641   :  { %v2395_v30 = vpop.f32.mrf.mxu1 }
 0x644   :  { %v2076_v38 = vpop.f32.mrf.mxu2 }
 0x645   :  { %v2077_v10 = vadd.f32 %v2076_v38, %v4511_v22  ;;  %v2320_v14 = vpop.f32.mrf.mxu0 }
 0x649   :  { %v2233_v7 = vpop.f32.mrf.mxu3  ;;  %v2401_v4 = vpop.f32.mrf.mxu1 }
 0x64a   :  { %v2234_v40 = vadd.f32 %v2233_v7, %v2077_v10 }
 0x64c   :  { %v2316_v53 = vadd.f32 %v2315_v29, %v2234_v40  ;;  %v4517_v29 = vld [vmem:[#allocation10_spill] sm:$0xff] }
 0x64d   :  { %v2084_v12 = vpop.f32.mrf.mxu2  ;;  %v2325_v45 = vpop.f32.mrf.mxu0 }
 0x64e   :  { %v2085_v1 = vadd.f32 %v2084_v12, %v4512_v34  ;;  %v2390_v25 = vadd.f32 %v2389_v32, %v2316_v53 }
 0x651   :  { %v2237_v59 = vpop.f32.mrf.mxu3  ;;  %v2407_v48 = vpop.f32.mrf.mxu1 }
 0x652   :  { %v2238_v21 = vadd.f32 %v2237_v59, %v2085_v1  ;;  %v4518_v1 = vld [vmem:[#allocation11_spill] sm:$0xff] }
 0x654   :  { %v2321_v5 = vadd.f32 %v2320_v14, %v2238_v21 }
 0x655   :  { %v2092_v61 = vpop.f32.mrf.mxu2  ;;  %v2330_v28 = vpop.f32.mrf.mxu0 }
 0x656   :  { %v2093_v46 = vadd.f32 %v2092_v61, %v4513_v24  ;;  %v2396_v8 = vadd.f32 %v2395_v30, %v2321_v5 }
 0x659   :  { %v2241_v63 = vpop.f32.mrf.mxu3  ;;  %v2413_v33 = vpop.f32.mrf.mxu1 }
 0x65a   :  { %v2242_v54 = vadd.f32 %v2241_v63, %v2093_v46 }
 0x65c   :  { %v2326_v16 = vadd.f32 %v2325_v45, %v2242_v54 }
 0x65d   :  { %v2100_v57 = vpop.f32.mrf.mxu2  ;;  %v2335_v60 = vpop.f32.mrf.mxu0 }
 0x65e   :  { %v2101_v55 = vadd.f32 %v2100_v57, %v4514_v6  ;;  %v2402_v9 = vadd.f32 %v2401_v4, %v2326_v16 }
 0x661   :  { %v2245_v43 = vpop.f32.mrf.mxu3 }
 0x662   :  { %v2246_v0 = vadd.f32 %v2245_v43, %v2101_v55 }
 0x664   :  { %v2331_v44 = vadd.f32 %v2330_v28, %v2246_v0 }
 0x665   :  { %v2108_v47 = vpop.f32.mrf.mxu2  ;;  %v2340_v61 = vpop.f32.mrf.mxu0 }
 0x666   :  { %v2109_v15 = vadd.f32 %v2108_v47, %v4515_v11  ;;  %v2408_v41 = vadd.f32 %v2407_v48, %v2331_v44 }
 0x669   :  { %v2249_v3 = vpop.f32.mrf.mxu3 }
 0x66a   :  { %v2250_v31 = vadd.f32 %v2249_v3, %v2109_v15  ;;  %v2419_v3 = vpop.f32.mrf.mxu1 }
 0x66c   :  { %v2336_v7 = vadd.f32 %v2335_v60, %v2250_v31 }
 0x66d   :  { %v2116_v19 = vpop.f32.mrf.mxu2  ;;  %v2345_v30 = vpop.f32.mrf.mxu0 }
 0x66e   :  { %v2117_v38 = vadd.f32 %v2116_v19, %v4516_v18  ;;  %v2414_v57 = vadd.f32 %v2413_v33, %v2336_v7 }
 0x671   :  { %v2253_v37 = vpop.f32.mrf.mxu3 }
 0x672   :  { %v2254_v63 = vadd.f32 %v2253_v37, %v2117_v38 }
 0x674   :  { %v2341_v22 = vadd.f32 %v2340_v61, %v2254_v63 }
 0x675   :  { %v2124_v27 = vpop.f32.mrf.mxu2  ;;  %v2350_v46 = vpop.f32.mrf.mxu0 }
 0x676   :  { %v2125_v32 = vadd.f32 %v2124_v27, %v4517_v29  ;;  %v2420_v37 = vadd.f32 %v2419_v3, %v2341_v22 }
 0x679   :  { %v2257_v17 = vpop.f32.mrf.mxu3 }
 0x67a   :  { %v2258_v19 = vadd.f32 %v2257_v17, %v2125_v32 }
 0x67c   :  { %v2346_v21 = vadd.f32 %v2345_v30, %v2258_v19 }
 0x67d   :  { %v4348_v13 = vpop.f32.mrf.mxu2 }
 0x67e   :  { %v2133_v53 = vadd.f32 %v4348_v13, %v4518_v1 }
 0x681   :  { %v4351_v26 = vpop.f32.mrf.mxu3 }
 0x682   :  { %v2262_v45 = vadd.f32 %v4351_v26, %v2133_v53 }
 0x684   :  { %v2351_v5 = vadd.f32 %v2350_v46, %v2262_v45 }
 0x685   :  { %v2500_v42 = vpop.f32.mrf.mxu2 }
 0x686   :  { %v2501_v36 = vadd.f32 %v2500_v42, %v2390_v25  ;;  %v2425_v25 = vpop.f32.mrf.mxu1 }
 0x687   :  { %v2426_v17 = vadd.f32 %v2425_v25, %v2346_v21 }
 0x689   :  { %v2565_v2 = vpop.f32.mrf.mxu3 }
 0x68a   :  { %v2566_v35 = vadd.f32 %v2565_v2, %v2501_v36 }
 0x68c   :  { %2596 = vst.msk [vmem:[%s4397_s6] sm:$0xff] %vm31_vm0, %v2566_v35 }
 0x68d   :  { %v2504_v39 = vpop.f32.mrf.mxu2 }
 0x68e   :  { %v2505_v62 = vadd.f32 %v2504_v39, %v2396_v8  ;;  %v2431_v35 = vpop.f32.mrf.mxu1 }
 0x68f   :  { %v2432_v13 = vadd.f32 %v2431_v35, %v2351_v5 }
 0x691   :  { %v2569_v23 = vpop.f32.mrf.mxu3 }
 0x692   :  { %v2570_v51 = vadd.f32 %v2569_v23, %v2505_v62 }
 0x694   :  { %2597 = vst.msk [vmem:[%s4397_s6 + $0x8] sm:$0xff] %vm31_vm0, %v2570_v51 }
 0x695   :  { %v2508_v56 = vpop.f32.mrf.mxu2 }
 0x696   :  { %v2509_v58 = vadd.f32 %v2508_v56, %v2402_v9 }
 0x699   :  { %v2573_v52 = vpop.f32.mrf.mxu3 }
 0x69a   :  { %v2574_v49 = vadd.f32 %v2573_v52, %v2509_v58 }
 0x69c   :  { %2598 = vst.msk [vmem:[%s4397_s6 + $0x10] sm:$0xff] %vm31_vm0, %v2574_v49 }
 0x69d   :  { %v2512_v20 = vpop.f32.mrf.mxu2 }
 0x69e   :  { %v2513_v50 = vadd.f32 %v2512_v20, %v2408_v41 }
 0x6a1   :  { %v2577_v12 = vpop.f32.mrf.mxu3 }
 0x6a2   :  { %v2578_v59 = vadd.f32 %v2577_v12, %v2513_v50 }
 0x6a4   :  { %2599 = vst.msk [vmem:[%s4397_s6 + $0x18] sm:$0xff] %vm31_vm0, %v2578_v59 }
 0x6a5   :  { %v2516_v43 = vpop.f32.mrf.mxu2 }
 0x6a6   :  { %v2517_v47 = vadd.f32 %v2516_v43, %v2414_v57 }
 0x6a9   :  { %v2581_v10 = vpop.f32.mrf.mxu3 }
 0x6aa   :  { %v2582_v14 = vadd.f32 %v2581_v10, %v2517_v47 }
 0x6ac   :  { %2600 = vst.msk [vmem:[%s4397_s6 + $0x20] sm:$0xff] %vm31_vm0, %v2582_v14 }
 0x6ad   :  { %v2520_v40 = vpop.f32.mrf.mxu2 }
 0x6ae   :  { %v2521_v34 = vadd.f32 %v2520_v40, %v2420_v37 }
 0x6b1   :  { %v2585_v42 = vpop.f32.mrf.mxu3 }
 0x6b2   :  { %v2586_v27 = vadd.f32 %v2585_v42, %v2521_v34 }
 0x6b4   :  { %2601 = vst.msk [vmem:[%s4397_s6 + $0x28] sm:$0xff] %vm31_vm0, %v2586_v27 }
 0x6b5   :  { %v2524_v36 = vpop.f32.mrf.mxu2 }
 0x6b6   :  { %v2525_v24 = vadd.f32 %v2524_v36, %v2426_v17 }
 0x6b9   :  { %v2589_v4 = vpop.f32.mrf.mxu3 }
 0x6ba   :  { %v2590_v2 = vadd.f32 %v2589_v4, %v2525_v24 }
 0x6bc   :  { %2602 = vst.msk [vmem:[%s4397_s6 + $0x30] sm:$0xff] %vm31_vm0, %v2590_v2 }
 0x6bd   :  { %v2528_v26 = vpop.f32.mrf.mxu2 }
 0x6be   :  { %v2529_v54 = vadd.f32 %v2528_v26, %v2432_v13 }
 0x6c1   :  { %v2593_v8 = vpop.f32.mrf.mxu3 }
 0x6c2   :  { %v2594_v39 = vadd.f32 %v2593_v8, %v2529_v54 }
 0x6c4   :  { %2603 = vst.msk [vmem:[%s4397_s6 + $0x38] sm:$0xff] %vm31_vm0, %v2594_v39 }

</bundles_post_ra>
